<compile_context>
chip_gen: v7x
topology: tpu7x:2x2x1
jax: 0.10.0
libtpu: 0.0.40
codegen_flags: <defaults>
</compile_context>

<pallas_src>
import functools

import jax
import jax.numpy as jnp
from jax import lax
from jax.experimental import pallas as pl
from jax.experimental.pallas import tpu as pltpu

O_PAD = 128  # lane-dense padded output width (output_dim zero-padded)


# ---------------------------------------------------------------------------
# Fused kernel: one grid step == one block of B_BLK batch elements
# ---------------------------------------------------------------------------
def fused_forward_kernel(xcol_ref, wcol_ref, bconv_ref, wqkv_ref, wo_ref,
                         pvec_ref, w1_ref, b1_ref, w2_ref, endw_ref, endb_ref,
                         o_ref, *, n_header):
    Bb, S, K3 = xcol_ref.shape          # batch block, seq len, 3*input_dim
    D = wcol_ref.shape[1]               # true d_model (no lane padding)
    L = wqkv_ref.shape[0]               # num encoder layers
    H = n_header
    dh = D // H
    horizon = endw_ref.shape[0]
    M = Bb * S
    scale = 1.0 / float(dh) ** 0.5

    def layer_norm(y, w, b):
        # Exact LayerNorm over the full (true) d_model feature axis, eps=1e-5.
        mu = jnp.mean(y, axis=-1, keepdims=True)
        d = y - mu
        var = jnp.mean(d * d, axis=-1, keepdims=True)
        return d * lax.rsqrt(var + 1e-5) * w + b

    # --- conv embedding: one im2col matmul (B*S, 3*Cin) @ (3*Cin, D) ---
    x = jnp.dot(xcol_ref[...].reshape(M, K3), wcol_ref[...],
                preferred_element_type=jnp.float32) + bconv_ref[...]     # (M, D)

    # --- transformer encoder layers (post-LN, ReLU FFN, dropout=identity) ---
    # Unrolled Python loop: fine while L is small (switch to fori_loop + dynamic
    # ref indexing if num_layers grows beyond ~4-6).
    for l in range(L):
        pv = pvec_ref[l]                     # (7, 3*D) packed small params
        bqkv = pv[0:1, :]                    # (1, 3D)
        bo = pv[1:2, :D]
        ln1w, ln1b = pv[2:3, :D], pv[3:4, :D]
        b2 = pv[4:5, :D]
        ln2w, ln2b = pv[5:6, :D], pv[6:7, :D]

        # Fused QKV projection: single (M, D) @ (D, 3D) MXU op.
        qkv = jnp.dot(x, wqkv_ref[l],
                      preferred_element_type=jnp.float32) + bqkv         # (M, 3D)
        qkv3 = qkv.reshape(Bb, S, 3 * D)

        # Per-(batch, head) attention: flash-style batched einsums.
        ctxs = []
        for h in range(H):
            qh = qkv3[:, :, h * dh:(h + 1) * dh]                          # (Bb,S,dh)
            kh = qkv3[:, :, D + h * dh:D + (h + 1) * dh]
            vh = qkv3[:, :, 2 * D + h * dh:2 * D + (h + 1) * dh]
            s = jnp.einsum('bqd,bkd->bqk', qh, kh,
                           preferred_element_type=jnp.float32) * scale    # (Bb,S,S)
            s = s - jnp.max(s, axis=-1, keepdims=True)
            p = jnp.exp(s)
            p = p / jnp.sum(p, axis=-1, keepdims=True)   # exact softmax
            ctxs.append(jnp.einsum('bqk,bkd->bqd', p, vh,
                                   preferred_element_type=jnp.float32))   # (Bb,S,dh)
        ctx = jnp.concatenate(ctxs, axis=-1).reshape(M, D)

        # Output projection (single matmul, heads already merged along lanes).
        attn = jnp.dot(ctx, wo_ref[l],
                       preferred_element_type=jnp.float32) + bo           # (M, D)

        x1 = layer_norm(x + attn, ln1w, ln1b)

        # FFN with un-padded bf16 weights, f32 accumulation.
        h1 = jnp.dot(x1.astype(jnp.bfloat16), w1_ref[l],
                     preferred_element_type=jnp.float32) + b1_ref[l]      # (M, dff)
        h1 = jnp.maximum(h1, 0.0)
        ffn = jnp.dot(h1.astype(jnp.bfloat16), w2_ref[l],
                      preferred_element_type=jnp.float32) + b2            # (M, D)

        x = layer_norm(x1 + ffn, ln2w, ln2b)

    # --- end predictor: full contraction of the last `horizon` steps ---------
    # Conv1d(horizon, output_dim, kernel_size=d_model) on (horizon, d_model)
    # == full (horizon*d_model) contraction; done as `horizon` small matmuls
    # into a lane-dense (Bb, O_PAD) output.
    ys = []
    for b in range(Bb):
        tail_b = x[b * S + S - horizon: b * S + S, :]                     # (horizon, D)
        yb = endb_ref[...]                                                # (1, O_PAD)
        for t in range(horizon):
            yb = yb + jnp.dot(tail_b[t:t + 1, :], endw_ref[t],
                              preferred_element_type=jnp.float32)
        ys.append(yb)
    o_ref[...] = jnp.concatenate(ys, axis=0)                              # (Bb, O_PAD)


# ---------------------------------------------------------------------------
# pallas_call wrapper
# ---------------------------------------------------------------------------
def transformer_forward(xcol, kp, *, n_header, b_blk=None):
    B, S, K3 = xcol.shape
    o_pad = kp["endb"].shape[1]
    if b_blk is None:
        b_blk = B                 # fold the whole batch into one grid step
    # (If b_blk < B, it must divide B; for the output block b_blk must also be a
    #  multiple of 8 or equal to B — fine for the v7x 2-core split of large B.)
    assert B % b_blk == 0
    grid = (B // b_blk,)

    weight_names = ["wcol", "bconv", "wqkv", "wo", "pvec", "w1", "b1", "w2",
                    "endw", "endb"]
    weights = [kp[n] for n in weight_names]

    def w_spec(arr):
        nd = arr.ndim
        return pl.BlockSpec(arr.shape, lambda i, nd=nd: (0,) * nd)

    kernel = functools.partial(fused_forward_kernel, n_header=n_header)

    return pl.pallas_call(
        kernel,
        out_shape=jax.ShapeDtypeStruct((B, o_pad), jnp.float32),
        grid=grid,
        in_specs=[pl.BlockSpec((b_blk, S, K3), lambda i: (i, 0, 0))]
                 + [w_spec(w) for w in weights],
        out_specs=pl.BlockSpec((b_blk, o_pad), lambda i: (i, 0)),
        compiler_params=pltpu.CompilerParams(
            dimension_semantics=("parallel",),
            vmem_limit_bytes=32 * 1024 * 1024),
    )(xcol, *weights)


def transformer_time_series(x, kparams, *, input_dim, n_header, output_dim,
                            b_blk=None):
    """x: (batch, seq_len, num_features) -> (batch * output_dim, 1)."""
    B, S, _ = x.shape
    xs = x[..., -input_dim:]                                    # feature slice
    # im2col for the 3-tap, padding=1 Conv1d embedding (zero padding).
    xpad = jnp.pad(xs, ((0, 0), (1, 1), (0, 0)))
    xcol = jnp.concatenate(
        [xpad[:, 0:S, :], xpad[:, 1:S + 1, :], xpad[:, 2:S + 2, :]], axis=-1)
    y = transformer_forward(xcol, kparams, n_header=n_header, b_blk=b_blk)
    return y[:, :output_dim].reshape(-1, 1)                     # (B*output_dim, 1)


# ---------------------------------------------------------------------------
# Synthetic PyTorch-layout parameters + kernel-layout preparation
# ---------------------------------------------------------------------------
def make_params(key, *, input_dim, d_model, n_header, num_layers, dff,
                horizon, output_dim):
    ks = jax.random.split(key, 4 + num_layers)

    def rnd(k, shape, scale=0.05):
        return scale * jax.random.normal(k, shape, jnp.float32)

    params = {
        "conv_w": rnd(ks[0], (d_model, input_dim, 3)),          # Conv1d (out,in,k)
        "conv_b": rnd(ks[1], (d_model,)),
        "end_w": rnd(ks[2], (output_dim, horizon, d_model)),    # Conv1d (out,in,k)
        "end_b": rnd(ks[3], (output_dim,)),
        "layers": [],
    }
    for l in range(num_layers):
        kk = jax.random.split(ks[4 + l], 8)
        params["layers"].append(dict(
            in_proj_w=rnd(kk[0], (3 * d_model, d_model)),
            in_proj_b=rnd(kk[1], (3 * d_model,)),
            out_proj_w=rnd(kk[2], (d_model, d_model)),
            out_proj_b=rnd(kk[3], (d_model,)),
            ln1_w=jnp.ones((d_model,), jnp.float32),
            ln1_b=jnp.zeros((d_model,), jnp.float32),
            lin1_w=rnd(kk[4], (dff, d_model)),
            lin1_b=rnd(kk[5], (dff,)),
            lin2_w=rnd(kk[6], (d_model, dff)),
            lin2_b=rnd(kk[7], (d_model,)),
            ln2_w=jnp.ones((d_model,), jnp.float32),
            ln2_b=jnp.zeros((d_model,), jnp.float32),
        ))
    return params


def prepare_params(p, *, d_model, o_pad=O_PAD):
    """Transpose/pack PyTorch-layout weights into the fused-kernel layout."""
    D = d_model

    # Conv embedding: (D, Cin, 3) -> im2col weight (3*Cin, D), tap-major rows.
    conv_w = p["conv_w"]
    Cin = conv_w.shape[1]
    wcol = jnp.transpose(conv_w, (2, 1, 0)).reshape(3 * Cin, D)
    bconv = p["conv_b"].reshape(1, D)

    def pad_to(v, width):
        return jnp.pad(v, (0, width - v.shape[0]))

    wqkv_l, wo_l, pvec_l, w1_l, b1_l, w2_l = [], [], [], [], [], []
    for lp in p["layers"]:
        wqkv_l.append(lp["in_proj_w"].T)                        # (D, 3D): cols [q|k|v]
        wo_l.append(lp["out_proj_w"].T)                         # (D, D)
        rows = [lp["in_proj_b"],                                # row 0: bqkv (3D)
                pad_to(lp["out_proj_b"], 3 * D),                # row 1: bo
                pad_to(lp["ln1_w"], 3 * D),                     # row 2
                pad_to(lp["ln1_b"], 3 * D),                     # row 3
                pad_to(lp["lin2_b"], 3 * D),                    # row 4: b2
                pad_to(lp["ln2_w"], 3 * D),                     # row 5
                pad_to(lp["ln2_b"], 3 * D)]                     # row 6
        pvec_l.append(jnp.stack(rows, axis=0))                  # (7, 3D)
        w1_l.append(lp["lin1_w"].T.astype(jnp.bfloat16))        # (D, dff) bf16
        b1_l.append(lp["lin1_b"].reshape(1, -1))                # (1, dff) f32
        w2_l.append(lp["lin2_w"].T.astype(jnp.bfloat16))        # (dff, D) bf16

    # End predictor: (O, horizon, D) -> (horizon, D, O_PAD) lane-dense columns.
    endw = jnp.transpose(p["end_w"], (1, 2, 0))                 # (horizon, D, O)
    O = endw.shape[-1]
    endw = jnp.pad(endw, ((0, 0), (0, 0), (0, o_pad - O)))
    endb = pad_to(p["end_b"], o_pad).reshape(1, o_pad)

    return dict(
        wcol=wcol, bconv=bconv,
        wqkv=jnp.stack(wqkv_l), wo=jnp.stack(wo_l), pvec=jnp.stack(pvec_l),
        w1=jnp.stack(w1_l), b1=jnp.stack(b1_l), w2=jnp.stack(w2_l),
        endw=endw, endb=endb)


# ---------------------------------------------------------------------------
if __name__ == "__main__":
    # Small shapes consistent with the module's forward().
    B, SEQ_LEN, NUM_FEATURES = 2, 8, 6
    INPUT_DIM, D_MODEL, N_HEADER, NUM_LAYERS = 4, 32, 4, 2
    HORIZON, OUTPUT_DIM, DFF = 4, 1, 2048          # DFF = PyTorch default

    key = jax.random.PRNGKey(0)
    k_x, k_p = jax.random.split(key)
    x = jax.random.normal(k_x, (B, SEQ_LEN, NUM_FEATURES), jnp.float32)

    torch_params = make_params(k_p, input_dim=INPUT_DIM, d_model=D_MODEL,
                               n_header=N_HEADER, num_layers=NUM_LAYERS,
                               dff=DFF, horizon=HORIZON, output_dim=OUTPUT_DIM)
    kparams = prepare_params(torch_params, d_model=D_MODEL, o_pad=O_PAD)

    forward = jax.jit(transformer_time_series,
                      static_argnames=("input_dim", "n_header", "output_dim",
                                       "b_blk"))
    out = forward(x, kparams, input_dim=INPUT_DIM, n_header=N_HEADER,
                  output_dim=OUTPUT_DIM)
    out = jax.block_until_ready(out)
    assert out.shape == (B * OUTPUT_DIM, 1), out.shape
    print("KERNEL_OK")
</pallas_src>

<mosaic_0001>
module attributes {stable_mosaic.version = 11 : i64} {
  func.func @fused_forward_kernel(%arg0: i32, %arg1: memref<2x8x12xf32, #tpu.memory_space<vmem>>, %arg2: memref<12x32xf32, #tpu.memory_space<vmem>>, %arg3: memref<1x32xf32, #tpu.memory_space<vmem>>, %arg4: memref<2x32x96xf32, #tpu.memory_space<vmem>>, %arg5: memref<2x32x32xf32, #tpu.memory_space<vmem>>, %arg6: memref<2x7x96xf32, #tpu.memory_space<vmem>>, %arg7: memref<2x32x2048xbf16, #tpu.memory_space<vmem>>, %arg8: memref<2x1x2048xf32, #tpu.memory_space<vmem>>, %arg9: memref<2x2048x32xbf16, #tpu.memory_space<vmem>>, %arg10: memref<4x32x128xf32, #tpu.memory_space<vmem>>, %arg11: memref<1x128xf32, #tpu.memory_space<vmem>>, %arg12: memref<2x128xf32, #tpu.memory_space<vmem>>) attributes {dimension_semantics = [#tpu.dimension_semantics<parallel>], iteration_bounds = array<i64: 1>, scalar_prefetch = 0 : i64, scratch_operands = 0 : i64, tpu.core_type = #tpu.core_type<tc>, window_params = [{transform_indices = @transform_0, window_bounds = array<i64: 2, 8, 12>}, {pipeline_mode = #tpu.pipeline_mode<synchronous>, transform_indices = @transform_1, window_bounds = array<i64: 12, 32>}, {pipeline_mode = #tpu.pipeline_mode<synchronous>, transform_indices = @transform_2, window_bounds = array<i64: 1, 32>}, {pipeline_mode = #tpu.pipeline_mode<synchronous>, transform_indices = @transform_3, window_bounds = array<i64: 2, 32, 96>}, {pipeline_mode = #tpu.pipeline_mode<synchronous>, transform_indices = @transform_4, window_bounds = array<i64: 2, 32, 32>}, {pipeline_mode = #tpu.pipeline_mode<synchronous>, transform_indices = @transform_5, window_bounds = array<i64: 2, 7, 96>}, {pipeline_mode = #tpu.pipeline_mode<synchronous>, transform_indices = @transform_6, window_bounds = array<i64: 2, 32, 2048>}, {pipeline_mode = #tpu.pipeline_mode<synchronous>, transform_indices = @transform_7, window_bounds = array<i64: 2, 1, 2048>}, {pipeline_mode = #tpu.pipeline_mode<synchronous>, transform_indices = @transform_8, window_bounds = array<i64: 2, 2048, 32>}, {pipeline_mode = #tpu.pipeline_mode<synchronous>, transform_indices = @transform_9, window_bounds = array<i64: 4, 32, 128>}, {pipeline_mode = #tpu.pipeline_mode<synchronous>, transform_indices = @transform_10, window_bounds = array<i64: 1, 128>}, {transform_indices = @transform_11, window_bounds = array<i64: 2, 128>}]} {
    %c0 = arith.constant 0 : index
    %c0_0 = arith.constant 0 : index
    %c0_1 = arith.constant 0 : index
    %0 = vector.load %arg1[%c0, %c0_0, %c0_1] : memref<2x8x12xf32, #tpu.memory_space<vmem>>, vector<2x8x12xf32>
    %1 = vector.shape_cast %0 : vector<2x8x12xf32> to vector<16x12xf32>
    %c0_2 = arith.constant 0 : index
    %c0_3 = arith.constant 0 : index
    %2 = vector.load %arg2[%c0_2, %c0_3] : memref<12x32xf32, #tpu.memory_space<vmem>>, vector<12x32xf32>
    %cst = arith.constant dense<0.000000e+00> : vector<16x32xf32>
    %3 = tpu.matmul %1, %2, %cst {dimension_numbers = #tpu.dot_dimension_numbers<[1], [0], [0], [1], [0, 0, 1, 1], [], []>} : vector<16x12xf32>, vector<12x32xf32>, vector<16x32xf32> -> vector<16x32xf32>
    %c0_4 = arith.constant 0 : index
    %c0_5 = arith.constant 0 : index
    %4 = vector.load %arg3[%c0_4, %c0_5] : memref<1x32xf32, #tpu.memory_space<vmem>>, vector<1x32xf32>
    %5 = vector.broadcast %4 : vector<1x32xf32> to vector<16x32xf32>
    %6 = arith.addf %3, %5 : vector<16x32xf32>
    %c0_6 = arith.constant 0 : index
    %c0_7 = arith.constant 0 : index
    %c0_8 = arith.constant 0 : index
    %7 = vector.load %arg6[%c0_6, %c0_7, %c0_8] : memref<2x7x96xf32, #tpu.memory_space<vmem>>, vector<1x7x96xf32>
    %8 = vector.shape_cast %7 : vector<1x7x96xf32> to vector<7x96xf32>
    %9 = vector.extract_strided_slice %8 {offsets = [0, 0], sizes = [1, 96], strides = [1, 1]} : vector<7x96xf32> to vector<1x96xf32>
    %10 = vector.extract_strided_slice %8 {offsets = [1, 0], sizes = [1, 32], strides = [1, 1]} : vector<7x96xf32> to vector<1x32xf32>
    %11 = vector.extract_strided_slice %8 {offsets = [2, 0], sizes = [1, 32], strides = [1, 1]} : vector<7x96xf32> to vector<1x32xf32>
    %12 = vector.extract_strided_slice %8 {offsets = [3, 0], sizes = [1, 32], strides = [1, 1]} : vector<7x96xf32> to vector<1x32xf32>
    %13 = vector.extract_strided_slice %8 {offsets = [4, 0], sizes = [1, 32], strides = [1, 1]} : vector<7x96xf32> to vector<1x32xf32>
    %14 = vector.extract_strided_slice %8 {offsets = [5, 0], sizes = [1, 32], strides = [1, 1]} : vector<7x96xf32> to vector<1x32xf32>
    %15 = vector.extract_strided_slice %8 {offsets = [6, 0], sizes = [1, 32], strides = [1, 1]} : vector<7x96xf32> to vector<1x32xf32>
    %c0_9 = arith.constant 0 : index
    %c0_10 = arith.constant 0 : index
    %c0_11 = arith.constant 0 : index
    %16 = vector.load %arg4[%c0_9, %c0_10, %c0_11] : memref<2x32x96xf32, #tpu.memory_space<vmem>>, vector<1x32x96xf32>
    %17 = vector.shape_cast %16 : vector<1x32x96xf32> to vector<32x96xf32>
    %cst_12 = arith.constant dense<0.000000e+00> : vector<16x96xf32>
    %18 = tpu.matmul %6, %17, %cst_12 {dimension_numbers = #tpu.dot_dimension_numbers<[1], [0], [0], [1], [0, 0, 1, 1], [], []>} : vector<16x32xf32>, vector<32x96xf32>, vector<16x96xf32> -> vector<16x96xf32>
    %19 = vector.broadcast %9 : vector<1x96xf32> to vector<16x96xf32>
    %20 = arith.addf %18, %19 : vector<16x96xf32>
    %21 = vector.shape_cast %20 : vector<16x96xf32> to vector<2x8x96xf32>
    %22 = vector.extract_strided_slice %21 {offsets = [0, 0, 0], sizes = [2, 8, 8], strides = [1, 1, 1]} : vector<2x8x96xf32> to vector<2x8x8xf32>
    %23 = vector.extract_strided_slice %21 {offsets = [0, 0, 32], sizes = [2, 8, 8], strides = [1, 1, 1]} : vector<2x8x96xf32> to vector<2x8x8xf32>
    %24 = vector.extract_strided_slice %21 {offsets = [0, 0, 64], sizes = [2, 8, 8], strides = [1, 1, 1]} : vector<2x8x96xf32> to vector<2x8x8xf32>
    "tpu.trace_start"() <{level = 10 : i32, message = "bqd,bkd->bqk"}> : () -> ()
    %cst_13 = arith.constant dense<0.000000e+00> : vector<2x8x8xf32>
    %25 = tpu.matmul %22, %23, %cst_13 {dimension_numbers = #tpu.dot_dimension_numbers<[2], [2], [1], [1], [0, 0, 0, 1, 1, 1], [0], [0]>} : vector<2x8x8xf32>, vector<2x8x8xf32>, vector<2x8x8xf32> -> vector<2x8x8xf32>
    "tpu.trace_stop"() : () -> ()
    %cst_14 = arith.constant 0.353553385 : f32
    %26 = vector.broadcast %cst_14 : f32 to vector<2x8x8xf32>
    %27 = arith.mulf %25, %26 : vector<2x8x8xf32>
    %cst_15 = arith.constant dense<0xFF800000> : vector<2x8xf32>
    %28 = vector.multi_reduction <maximumf>, %27, %cst_15 [2] : vector<2x8x8xf32> to vector<2x8xf32>
    %29 = vector.shape_cast %28 : vector<2x8xf32> to vector<2x8x1xf32>
    %30 = vector.broadcast %29 : vector<2x8x1xf32> to vector<2x8x8xf32>
    %31 = arith.subf %27, %30 : vector<2x8x8xf32>
    %32 = math.exp %31 : vector<2x8x8xf32>
    %cst_16 = arith.constant dense<0.000000e+00> : vector<2x8xf32>
    %33 = vector.multi_reduction <add>, %32, %cst_16 [2] : vector<2x8x8xf32> to vector<2x8xf32>
    %34 = vector.shape_cast %33 : vector<2x8xf32> to vector<2x8x1xf32>
    %35 = vector.broadcast %34 : vector<2x8x1xf32> to vector<2x8x8xf32>
    %36 = arith.divf %32, %35 : vector<2x8x8xf32>
    "tpu.trace_start"() <{level = 10 : i32, message = "bqk,bkd->bqd"}> : () -> ()
    %cst_17 = arith.constant dense<0.000000e+00> : vector<2x8x8xf32>
    %37 = tpu.matmul %36, %24, %cst_17 {dimension_numbers = #tpu.dot_dimension_numbers<[2], [1], [1], [2], [0, 0, 0, 1, 1, 2], [0], [0]>} : vector<2x8x8xf32>, vector<2x8x8xf32>, vector<2x8x8xf32> -> vector<2x8x8xf32>
    "tpu.trace_stop"() : () -> ()
    %38 = vector.extract_strided_slice %21 {offsets = [0, 0, 8], sizes = [2, 8, 8], strides = [1, 1, 1]} : vector<2x8x96xf32> to vector<2x8x8xf32>
    %39 = vector.extract_strided_slice %21 {offsets = [0, 0, 40], sizes = [2, 8, 8], strides = [1, 1, 1]} : vector<2x8x96xf32> to vector<2x8x8xf32>
    %40 = vector.extract_strided_slice %21 {offsets = [0, 0, 72], sizes = [2, 8, 8], strides = [1, 1, 1]} : vector<2x8x96xf32> to vector<2x8x8xf32>
    "tpu.trace_start"() <{level = 10 : i32, message = "bqd,bkd->bqk"}> : () -> ()
    %cst_18 = arith.constant dense<0.000000e+00> : vector<2x8x8xf32>
    %41 = tpu.matmul %38, %39, %cst_18 {dimension_numbers = #tpu.dot_dimension_numbers<[2], [2], [1], [1], [0, 0, 0, 1, 1, 1], [0], [0]>} : vector<2x8x8xf32>, vector<2x8x8xf32>, vector<2x8x8xf32> -> vector<2x8x8xf32>
    "tpu.trace_stop"() : () -> ()
    %cst_19 = arith.constant 0.353553385 : f32
    %42 = vector.broadcast %cst_19 : f32 to vector<2x8x8xf32>
    %43 = arith.mulf %41, %42 : vector<2x8x8xf32>
    %cst_20 = arith.constant dense<0xFF800000> : vector<2x8xf32>
    %44 = vector.multi_reduction <maximumf>, %43, %cst_20 [2] : vector<2x8x8xf32> to vector<2x8xf32>
    %45 = vector.shape_cast %44 : vector<2x8xf32> to vector<2x8x1xf32>
    %46 = vector.broadcast %45 : vector<2x8x1xf32> to vector<2x8x8xf32>
    %47 = arith.subf %43, %46 : vector<2x8x8xf32>
    %48 = math.exp %47 : vector<2x8x8xf32>
    %cst_21 = arith.constant dense<0.000000e+00> : vector<2x8xf32>
    %49 = vector.multi_reduction <add>, %48, %cst_21 [2] : vector<2x8x8xf32> to vector<2x8xf32>
    %50 = vector.shape_cast %49 : vector<2x8xf32> to vector<2x8x1xf32>
    %51 = vector.broadcast %50 : vector<2x8x1xf32> to vector<2x8x8xf32>
    %52 = arith.divf %48, %51 : vector<2x8x8xf32>
    "tpu.trace_start"() <{level = 10 : i32, message = "bqk,bkd->bqd"}> : () -> ()
    %cst_22 = arith.constant dense<0.000000e+00> : vector<2x8x8xf32>
    %53 = tpu.matmul %52, %40, %cst_22 {dimension_numbers = #tpu.dot_dimension_numbers<[2], [1], [1], [2], [0, 0, 0, 1, 1, 2], [0], [0]>} : vector<2x8x8xf32>, vector<2x8x8xf32>, vector<2x8x8xf32> -> vector<2x8x8xf32>
    "tpu.trace_stop"() : () -> ()
    %54 = vector.extract_strided_slice %21 {offsets = [0, 0, 16], sizes = [2, 8, 8], strides = [1, 1, 1]} : vector<2x8x96xf32> to vector<2x8x8xf32>
    %55 = vector.extract_strided_slice %21 {offsets = [0, 0, 48], sizes = [2, 8, 8], strides = [1, 1, 1]} : vector<2x8x96xf32> to vector<2x8x8xf32>
    %56 = vector.extract_strided_slice %21 {offsets = [0, 0, 80], sizes = [2, 8, 8], strides = [1, 1, 1]} : vector<2x8x96xf32> to vector<2x8x8xf32>
    "tpu.trace_start"() <{level = 10 : i32, message = "bqd,bkd->bqk"}> : () -> ()
    %cst_23 = arith.constant dense<0.000000e+00> : vector<2x8x8xf32>
    %57 = tpu.matmul %54, %55, %cst_23 {dimension_numbers = #tpu.dot_dimension_numbers<[2], [2], [1], [1], [0, 0, 0, 1, 1, 1], [0], [0]>} : vector<2x8x8xf32>, vector<2x8x8xf32>, vector<2x8x8xf32> -> vector<2x8x8xf32>
    "tpu.trace_stop"() : () -> ()
    %cst_24 = arith.constant 0.353553385 : f32
    %58 = vector.broadcast %cst_24 : f32 to vector<2x8x8xf32>
    %59 = arith.mulf %57, %58 : vector<2x8x8xf32>
    %cst_25 = arith.constant dense<0xFF800000> : vector<2x8xf32>
    %60 = vector.multi_reduction <maximumf>, %59, %cst_25 [2] : vector<2x8x8xf32> to vector<2x8xf32>
    %61 = vector.shape_cast %60 : vector<2x8xf32> to vector<2x8x1xf32>
    %62 = vector.broadcast %61 : vector<2x8x1xf32> to vector<2x8x8xf32>
    %63 = arith.subf %59, %62 : vector<2x8x8xf32>
    %64 = math.exp %63 : vector<2x8x8xf32>
    %cst_26 = arith.constant dense<0.000000e+00> : vector<2x8xf32>
    %65 = vector.multi_reduction <add>, %64, %cst_26 [2] : vector<2x8x8xf32> to vector<2x8xf32>
    %66 = vector.shape_cast %65 : vector<2x8xf32> to vector<2x8x1xf32>
    %67 = vector.broadcast %66 : vector<2x8x1xf32> to vector<2x8x8xf32>
    %68 = arith.divf %64, %67 : vector<2x8x8xf32>
    "tpu.trace_start"() <{level = 10 : i32, message = "bqk,bkd->bqd"}> : () -> ()
    %cst_27 = arith.constant dense<0.000000e+00> : vector<2x8x8xf32>
    %69 = tpu.matmul %68, %56, %cst_27 {dimension_numbers = #tpu.dot_dimension_numbers<[2], [1], [1], [2], [0, 0, 0, 1, 1, 2], [0], [0]>} : vector<2x8x8xf32>, vector<2x8x8xf32>, vector<2x8x8xf32> -> vector<2x8x8xf32>
    "tpu.trace_stop"() : () -> ()
    %70 = vector.extract_strided_slice %21 {offsets = [0, 0, 24], sizes = [2, 8, 8], strides = [1, 1, 1]} : vector<2x8x96xf32> to vector<2x8x8xf32>
    %71 = vector.extract_strided_slice %21 {offsets = [0, 0, 56], sizes = [2, 8, 8], strides = [1, 1, 1]} : vector<2x8x96xf32> to vector<2x8x8xf32>
    %72 = vector.extract_strided_slice %21 {offsets = [0, 0, 88], sizes = [2, 8, 8], strides = [1, 1, 1]} : vector<2x8x96xf32> to vector<2x8x8xf32>
    "tpu.trace_start"() <{level = 10 : i32, message = "bqd,bkd->bqk"}> : () -> ()
    %cst_28 = arith.constant dense<0.000000e+00> : vector<2x8x8xf32>
    %73 = tpu.matmul %70, %71, %cst_28 {dimension_numbers = #tpu.dot_dimension_numbers<[2], [2], [1], [1], [0, 0, 0, 1, 1, 1], [0], [0]>} : vector<2x8x8xf32>, vector<2x8x8xf32>, vector<2x8x8xf32> -> vector<2x8x8xf32>
    "tpu.trace_stop"() : () -> ()
    %cst_29 = arith.constant 0.353553385 : f32
    %74 = vector.broadcast %cst_29 : f32 to vector<2x8x8xf32>
    %75 = arith.mulf %73, %74 : vector<2x8x8xf32>
    %cst_30 = arith.constant dense<0xFF800000> : vector<2x8xf32>
    %76 = vector.multi_reduction <maximumf>, %75, %cst_30 [2] : vector<2x8x8xf32> to vector<2x8xf32>
    %77 = vector.shape_cast %76 : vector<2x8xf32> to vector<2x8x1xf32>
    %78 = vector.broadcast %77 : vector<2x8x1xf32> to vector<2x8x8xf32>
    %79 = arith.subf %75, %78 : vector<2x8x8xf32>
    %80 = math.exp %79 : vector<2x8x8xf32>
    %cst_31 = arith.constant dense<0.000000e+00> : vector<2x8xf32>
    %81 = vector.multi_reduction <add>, %80, %cst_31 [2] : vector<2x8x8xf32> to vector<2x8xf32>
    %82 = vector.shape_cast %81 : vector<2x8xf32> to vector<2x8x1xf32>
    %83 = vector.broadcast %82 : vector<2x8x1xf32> to vector<2x8x8xf32>
    %84 = arith.divf %80, %83 : vector<2x8x8xf32>
    "tpu.trace_start"() <{level = 10 : i32, message = "bqk,bkd->bqd"}> : () -> ()
    %cst_32 = arith.constant dense<0.000000e+00> : vector<2x8x8xf32>
    %85 = tpu.matmul %84, %72, %cst_32 {dimension_numbers = #tpu.dot_dimension_numbers<[2], [1], [1], [2], [0, 0, 0, 1, 1, 2], [0], [0]>} : vector<2x8x8xf32>, vector<2x8x8xf32>, vector<2x8x8xf32> -> vector<2x8x8xf32>
    "tpu.trace_stop"() : () -> ()
    %86 = tpu.concatenate %37, %53, %69, %85 in 2 : vector<2x8x8xf32>, vector<2x8x8xf32>, vector<2x8x8xf32>, vector<2x8x8xf32> -> vector<2x8x32xf32>
    %87 = vector.shape_cast %86 : vector<2x8x32xf32> to vector<16x32xf32>
    %c0_33 = arith.constant 0 : index
    %c0_34 = arith.constant 0 : index
    %c0_35 = arith.constant 0 : index
    %88 = vector.load %arg5[%c0_33, %c0_34, %c0_35] : memref<2x32x32xf32, #tpu.memory_space<vmem>>, vector<1x32x32xf32>
    %89 = vector.shape_cast %88 : vector<1x32x32xf32> to vector<32x32xf32>
    %cst_36 = arith.constant dense<0.000000e+00> : vector<16x32xf32>
    %90 = tpu.matmul %87, %89, %cst_36 {dimension_numbers = #tpu.dot_dimension_numbers<[1], [0], [0], [1], [0, 0, 1, 1], [], []>} : vector<16x32xf32>, vector<32x32xf32>, vector<16x32xf32> -> vector<16x32xf32>
    %91 = vector.broadcast %10 : vector<1x32xf32> to vector<16x32xf32>
    %92 = arith.addf %90, %91 : vector<16x32xf32>
    %93 = arith.addf %6, %92 : vector<16x32xf32>
    %cst_37 = arith.constant dense<0.000000e+00> : vector<16xf32>
    %94 = vector.multi_reduction <add>, %93, %cst_37 [1] : vector<16x32xf32> to vector<16xf32>
    %95 = vector.shape_cast %94 : vector<16xf32> to vector<16x1xf32>
    %cst_38 = arith.constant 3.200000e+01 : f32
    %96 = vector.broadcast %cst_38 : f32 to vector<16x1xf32>
    %97 = arith.divf %95, %96 : vector<16x1xf32>
    %98 = vector.broadcast %97 : vector<16x1xf32> to vector<16x32xf32>
    %99 = arith.subf %93, %98 : vector<16x32xf32>
    %100 = arith.mulf %99, %99 : vector<16x32xf32>
    %cst_39 = arith.constant dense<0.000000e+00> : vector<16xf32>
    %101 = vector.multi_reduction <add>, %100, %cst_39 [1] : vector<16x32xf32> to vector<16xf32>
    %102 = vector.shape_cast %101 : vector<16xf32> to vector<16x1xf32>
    %cst_40 = arith.constant 3.200000e+01 : f32
    %103 = vector.broadcast %cst_40 : f32 to vector<16x1xf32>
    %104 = arith.divf %102, %103 : vector<16x1xf32>
    %cst_41 = arith.constant 9.99999974E-6 : f32
    %105 = vector.broadcast %cst_41 : f32 to vector<16x1xf32>
    %106 = arith.addf %104, %105 : vector<16x1xf32>
    %107 = math.rsqrt %106 : vector<16x1xf32>
    %108 = vector.broadcast %107 : vector<16x1xf32> to vector<16x32xf32>
    %109 = arith.mulf %99, %108 : vector<16x32xf32>
    %110 = vector.broadcast %11 : vector<1x32xf32> to vector<16x32xf32>
    %111 = arith.mulf %109, %110 : vector<16x32xf32>
    %112 = vector.broadcast %12 : vector<1x32xf32> to vector<16x32xf32>
    %113 = arith.addf %111, %112 : vector<16x32xf32>
    %114 = arith.truncf %113 : vector<16x32xf32> to vector<16x32xbf16>
    %c0_42 = arith.constant 0 : index
    %c0_43 = arith.constant 0 : index
    %c0_44 = arith.constant 0 : index
    %115 = vector.load %arg7[%c0_42, %c0_43, %c0_44] : memref<2x32x2048xbf16, #tpu.memory_space<vmem>>, vector<1x32x2048xbf16>
    %116 = vector.shape_cast %115 : vector<1x32x2048xbf16> to vector<32x2048xbf16>
    %cst_45 = arith.constant dense<0.000000e+00> : vector<16x2048xf32>
    %117 = tpu.matmul %114, %116, %cst_45 {dimension_numbers = #tpu.dot_dimension_numbers<[1], [0], [0], [1], [0, 0, 1, 1], [], []>} : vector<16x32xbf16>, vector<32x2048xbf16>, vector<16x2048xf32> -> vector<16x2048xf32>
    %c0_46 = arith.constant 0 : index
    %c0_47 = arith.constant 0 : index
    %c0_48 = arith.constant 0 : index
    %118 = vector.load %arg8[%c0_46, %c0_47, %c0_48] : memref<2x1x2048xf32, #tpu.memory_space<vmem>>, vector<1x1x2048xf32>
    %119 = vector.shape_cast %118 : vector<1x1x2048xf32> to vector<1x2048xf32>
    %120 = vector.broadcast %119 : vector<1x2048xf32> to vector<16x2048xf32>
    %121 = arith.addf %117, %120 : vector<16x2048xf32>
    %cst_49 = arith.constant 0.000000e+00 : f32
    %122 = vector.broadcast %cst_49 : f32 to vector<16x2048xf32>
    %123 = arith.maximumf %121, %122 : vector<16x2048xf32>
    %124 = arith.truncf %123 : vector<16x2048xf32> to vector<16x2048xbf16>
    %c0_50 = arith.constant 0 : index
    %c0_51 = arith.constant 0 : index
    %c0_52 = arith.constant 0 : index
    %125 = vector.load %arg9[%c0_50, %c0_51, %c0_52] : memref<2x2048x32xbf16, #tpu.memory_space<vmem>>, vector<1x2048x32xbf16>
    %126 = vector.shape_cast %125 : vector<1x2048x32xbf16> to vector<2048x32xbf16>
    %cst_53 = arith.constant dense<0.000000e+00> : vector<16x32xf32>
    %127 = tpu.matmul %124, %126, %cst_53 {dimension_numbers = #tpu.dot_dimension_numbers<[1], [0], [0], [1], [0, 0, 1, 1], [], []>} : vector<16x2048xbf16>, vector<2048x32xbf16>, vector<16x32xf32> -> vector<16x32xf32>
    %128 = vector.broadcast %13 : vector<1x32xf32> to vector<16x32xf32>
    %129 = arith.addf %127, %128 : vector<16x32xf32>
    %130 = arith.addf %113, %129 : vector<16x32xf32>
    %cst_54 = arith.constant dense<0.000000e+00> : vector<16xf32>
    %131 = vector.multi_reduction <add>, %130, %cst_54 [1] : vector<16x32xf32> to vector<16xf32>
    %132 = vector.shape_cast %131 : vector<16xf32> to vector<16x1xf32>
    %cst_55 = arith.constant 3.200000e+01 : f32
    %133 = vector.broadcast %cst_55 : f32 to vector<16x1xf32>
    %134 = arith.divf %132, %133 : vector<16x1xf32>
    %135 = vector.broadcast %134 : vector<16x1xf32> to vector<16x32xf32>
    %136 = arith.subf %130, %135 : vector<16x32xf32>
    %137 = arith.mulf %136, %136 : vector<16x32xf32>
    %cst_56 = arith.constant dense<0.000000e+00> : vector<16xf32>
    %138 = vector.multi_reduction <add>, %137, %cst_56 [1] : vector<16x32xf32> to vector<16xf32>
    %139 = vector.shape_cast %138 : vector<16xf32> to vector<16x1xf32>
    %cst_57 = arith.constant 3.200000e+01 : f32
    %140 = vector.broadcast %cst_57 : f32 to vector<16x1xf32>
    %141 = arith.divf %139, %140 : vector<16x1xf32>
    %cst_58 = arith.constant 9.99999974E-6 : f32
    %142 = vector.broadcast %cst_58 : f32 to vector<16x1xf32>
    %143 = arith.addf %141, %142 : vector<16x1xf32>
    %144 = math.rsqrt %143 : vector<16x1xf32>
    %145 = vector.broadcast %144 : vector<16x1xf32> to vector<16x32xf32>
    %146 = arith.mulf %136, %145 : vector<16x32xf32>
    %147 = vector.broadcast %14 : vector<1x32xf32> to vector<16x32xf32>
    %148 = arith.mulf %146, %147 : vector<16x32xf32>
    %149 = vector.broadcast %15 : vector<1x32xf32> to vector<16x32xf32>
    %150 = arith.addf %148, %149 : vector<16x32xf32>
    %c1 = arith.constant 1 : index
    %c0_59 = arith.constant 0 : index
    %c0_60 = arith.constant 0 : index
    %151 = vector.load %arg6[%c1, %c0_59, %c0_60] : memref<2x7x96xf32, #tpu.memory_space<vmem>>, vector<1x7x96xf32>
    %152 = vector.shape_cast %151 : vector<1x7x96xf32> to vector<7x96xf32>
    %153 = vector.extract_strided_slice %152 {offsets = [0, 0], sizes = [1, 96], strides = [1, 1]} : vector<7x96xf32> to vector<1x96xf32>
    %154 = vector.extract_strided_slice %152 {offsets = [1, 0], sizes = [1, 32], strides = [1, 1]} : vector<7x96xf32> to vector<1x32xf32>
    %155 = vector.extract_strided_slice %152 {offsets = [2, 0], sizes = [1, 32], strides = [1, 1]} : vector<7x96xf32> to vector<1x32xf32>
    %156 = vector.extract_strided_slice %152 {offsets = [3, 0], sizes = [1, 32], strides = [1, 1]} : vector<7x96xf32> to vector<1x32xf32>
    %157 = vector.extract_strided_slice %152 {offsets = [4, 0], sizes = [1, 32], strides = [1, 1]} : vector<7x96xf32> to vector<1x32xf32>
    %158 = vector.extract_strided_slice %152 {offsets = [5, 0], sizes = [1, 32], strides = [1, 1]} : vector<7x96xf32> to vector<1x32xf32>
    %159 = vector.extract_strided_slice %152 {offsets = [6, 0], sizes = [1, 32], strides = [1, 1]} : vector<7x96xf32> to vector<1x32xf32>
    %c1_61 = arith.constant 1 : index
    %c0_62 = arith.constant 0 : index
    %c0_63 = arith.constant 0 : index
    %160 = vector.load %arg4[%c1_61, %c0_62, %c0_63] : memref<2x32x96xf32, #tpu.memory_space<vmem>>, vector<1x32x96xf32>
    %161 = vector.shape_cast %160 : vector<1x32x96xf32> to vector<32x96xf32>
    %cst_64 = arith.constant dense<0.000000e+00> : vector<16x96xf32>
    %162 = tpu.matmul %150, %161, %cst_64 {dimension_numbers = #tpu.dot_dimension_numbers<[1], [0], [0], [1], [0, 0, 1, 1], [], []>} : vector<16x32xf32>, vector<32x96xf32>, vector<16x96xf32> -> vector<16x96xf32>
    %163 = vector.broadcast %153 : vector<1x96xf32> to vector<16x96xf32>
    %164 = arith.addf %162, %163 : vector<16x96xf32>
    %165 = vector.shape_cast %164 : vector<16x96xf32> to vector<2x8x96xf32>
    %166 = vector.extract_strided_slice %165 {offsets = [0, 0, 0], sizes = [2, 8, 8], strides = [1, 1, 1]} : vector<2x8x96xf32> to vector<2x8x8xf32>
    %167 = vector.extract_strided_slice %165 {offsets = [0, 0, 32], sizes = [2, 8, 8], strides = [1, 1, 1]} : vector<2x8x96xf32> to vector<2x8x8xf32>
    %168 = vector.extract_strided_slice %165 {offsets = [0, 0, 64], sizes = [2, 8, 8], strides = [1, 1, 1]} : vector<2x8x96xf32> to vector<2x8x8xf32>
    "tpu.trace_start"() <{level = 10 : i32, message = "bqd,bkd->bqk"}> : () -> ()
    %cst_65 = arith.constant dense<0.000000e+00> : vector<2x8x8xf32>
    %169 = tpu.matmul %166, %167, %cst_65 {dimension_numbers = #tpu.dot_dimension_numbers<[2], [2], [1], [1], [0, 0, 0, 1, 1, 1], [0], [0]>} : vector<2x8x8xf32>, vector<2x8x8xf32>, vector<2x8x8xf32> -> vector<2x8x8xf32>
    "tpu.trace_stop"() : () -> ()
    %cst_66 = arith.constant 0.353553385 : f32
    %170 = vector.broadcast %cst_66 : f32 to vector<2x8x8xf32>
    %171 = arith.mulf %169, %170 : vector<2x8x8xf32>
    %cst_67 = arith.constant dense<0xFF800000> : vector<2x8xf32>
    %172 = vector.multi_reduction <maximumf>, %171, %cst_67 [2] : vector<2x8x8xf32> to vector<2x8xf32>
    %173 = vector.shape_cast %172 : vector<2x8xf32> to vector<2x8x1xf32>
    %174 = vector.broadcast %173 : vector<2x8x1xf32> to vector<2x8x8xf32>
    %175 = arith.subf %171, %174 : vector<2x8x8xf32>
    %176 = math.exp %175 : vector<2x8x8xf32>
    %cst_68 = arith.constant dense<0.000000e+00> : vector<2x8xf32>
    %177 = vector.multi_reduction <add>, %176, %cst_68 [2] : vector<2x8x8xf32> to vector<2x8xf32>
    %178 = vector.shape_cast %177 : vector<2x8xf32> to vector<2x8x1xf32>
    %179 = vector.broadcast %178 : vector<2x8x1xf32> to vector<2x8x8xf32>
    %180 = arith.divf %176, %179 : vector<2x8x8xf32>
    "tpu.trace_start"() <{level = 10 : i32, message = "bqk,bkd->bqd"}> : () -> ()
    %cst_69 = arith.constant dense<0.000000e+00> : vector<2x8x8xf32>
    %181 = tpu.matmul %180, %168, %cst_69 {dimension_numbers = #tpu.dot_dimension_numbers<[2], [1], [1], [2], [0, 0, 0, 1, 1, 2], [0], [0]>} : vector<2x8x8xf32>, vector<2x8x8xf32>, vector<2x8x8xf32> -> vector<2x8x8xf32>
    "tpu.trace_stop"() : () -> ()
    %182 = vector.extract_strided_slice %165 {offsets = [0, 0, 8], sizes = [2, 8, 8], strides = [1, 1, 1]} : vector<2x8x96xf32> to vector<2x8x8xf32>
    %183 = vector.extract_strided_slice %165 {offsets = [0, 0, 40], sizes = [2, 8, 8], strides = [1, 1, 1]} : vector<2x8x96xf32> to vector<2x8x8xf32>
    %184 = vector.extract_strided_slice %165 {offsets = [0, 0, 72], sizes = [2, 8, 8], strides = [1, 1, 1]} : vector<2x8x96xf32> to vector<2x8x8xf32>
    "tpu.trace_start"() <{level = 10 : i32, message = "bqd,bkd->bqk"}> : () -> ()
    %cst_70 = arith.constant dense<0.000000e+00> : vector<2x8x8xf32>
    %185 = tpu.matmul %182, %183, %cst_70 {dimension_numbers = #tpu.dot_dimension_numbers<[2], [2], [1], [1], [0, 0, 0, 1, 1, 1], [0], [0]>} : vector<2x8x8xf32>, vector<2x8x8xf32>, vector<2x8x8xf32> -> vector<2x8x8xf32>
    "tpu.trace_stop"() : () -> ()
    %cst_71 = arith.constant 0.353553385 : f32
    %186 = vector.broadcast %cst_71 : f32 to vector<2x8x8xf32>
    %187 = arith.mulf %185, %186 : vector<2x8x8xf32>
    %cst_72 = arith.constant dense<0xFF800000> : vector<2x8xf32>
    %188 = vector.multi_reduction <maximumf>, %187, %cst_72 [2] : vector<2x8x8xf32> to vector<2x8xf32>
    %189 = vector.shape_cast %188 : vector<2x8xf32> to vector<2x8x1xf32>
    %190 = vector.broadcast %189 : vector<2x8x1xf32> to vector<2x8x8xf32>
    %191 = arith.subf %187, %190 : vector<2x8x8xf32>
    %192 = math.exp %191 : vector<2x8x8xf32>
    %cst_73 = arith.constant dense<0.000000e+00> : vector<2x8xf32>
    %193 = vector.multi_reduction <add>, %192, %cst_73 [2] : vector<2x8x8xf32> to vector<2x8xf32>
    %194 = vector.shape_cast %193 : vector<2x8xf32> to vector<2x8x1xf32>
    %195 = vector.broadcast %194 : vector<2x8x1xf32> to vector<2x8x8xf32>
    %196 = arith.divf %192, %195 : vector<2x8x8xf32>
    "tpu.trace_start"() <{level = 10 : i32, message = "bqk,bkd->bqd"}> : () -> ()
    %cst_74 = arith.constant dense<0.000000e+00> : vector<2x8x8xf32>
    %197 = tpu.matmul %196, %184, %cst_74 {dimension_numbers = #tpu.dot_dimension_numbers<[2], [1], [1], [2], [0, 0, 0, 1, 1, 2], [0], [0]>} : vector<2x8x8xf32>, vector<2x8x8xf32>, vector<2x8x8xf32> -> vector<2x8x8xf32>
    "tpu.trace_stop"() : () -> ()
    %198 = vector.extract_strided_slice %165 {offsets = [0, 0, 16], sizes = [2, 8, 8], strides = [1, 1, 1]} : vector<2x8x96xf32> to vector<2x8x8xf32>
    %199 = vector.extract_strided_slice %165 {offsets = [0, 0, 48], sizes = [2, 8, 8], strides = [1, 1, 1]} : vector<2x8x96xf32> to vector<2x8x8xf32>
    %200 = vector.extract_strided_slice %165 {offsets = [0, 0, 80], sizes = [2, 8, 8], strides = [1, 1, 1]} : vector<2x8x96xf32> to vector<2x8x8xf32>
    "tpu.trace_start"() <{level = 10 : i32, message = "bqd,bkd->bqk"}> : () -> ()
    %cst_75 = arith.constant dense<0.000000e+00> : vector<2x8x8xf32>
    %201 = tpu.matmul %198, %199, %cst_75 {dimension_numbers = #tpu.dot_dimension_numbers<[2], [2], [1], [1], [0, 0, 0, 1, 1, 1], [0], [0]>} : vector<2x8x8xf32>, vector<2x8x8xf32>, vector<2x8x8xf32> -> vector<2x8x8xf32>
    "tpu.trace_stop"() : () -> ()
    %cst_76 = arith.constant 0.353553385 : f32
    %202 = vector.broadcast %cst_76 : f32 to vector<2x8x8xf32>
    %203 = arith.mulf %201, %202 : vector<2x8x8xf32>
    %cst_77 = arith.constant dense<0xFF800000> : vector<2x8xf32>
    %204 = vector.multi_reduction <maximumf>, %203, %cst_77 [2] : vector<2x8x8xf32> to vector<2x8xf32>
    %205 = vector.shape_cast %204 : vector<2x8xf32> to vector<2x8x1xf32>
    %206 = vector.broadcast %205 : vector<2x8x1xf32> to vector<2x8x8xf32>
    %207 = arith.subf %203, %206 : vector<2x8x8xf32>
    %208 = math.exp %207 : vector<2x8x8xf32>
    %cst_78 = arith.constant dense<0.000000e+00> : vector<2x8xf32>
    %209 = vector.multi_reduction <add>, %208, %cst_78 [2] : vector<2x8x8xf32> to vector<2x8xf32>
    %210 = vector.shape_cast %209 : vector<2x8xf32> to vector<2x8x1xf32>
    %211 = vector.broadcast %210 : vector<2x8x1xf32> to vector<2x8x8xf32>
    %212 = arith.divf %208, %211 : vector<2x8x8xf32>
    "tpu.trace_start"() <{level = 10 : i32, message = "bqk,bkd->bqd"}> : () -> ()
    %cst_79 = arith.constant dense<0.000000e+00> : vector<2x8x8xf32>
    %213 = tpu.matmul %212, %200, %cst_79 {dimension_numbers = #tpu.dot_dimension_numbers<[2], [1], [1], [2], [0, 0, 0, 1, 1, 2], [0], [0]>} : vector<2x8x8xf32>, vector<2x8x8xf32>, vector<2x8x8xf32> -> vector<2x8x8xf32>
    "tpu.trace_stop"() : () -> ()
    %214 = vector.extract_strided_slice %165 {offsets = [0, 0, 24], sizes = [2, 8, 8], strides = [1, 1, 1]} : vector<2x8x96xf32> to vector<2x8x8xf32>
    %215 = vector.extract_strided_slice %165 {offsets = [0, 0, 56], sizes = [2, 8, 8], strides = [1, 1, 1]} : vector<2x8x96xf32> to vector<2x8x8xf32>
    %216 = vector.extract_strided_slice %165 {offsets = [0, 0, 88], sizes = [2, 8, 8], strides = [1, 1, 1]} : vector<2x8x96xf32> to vector<2x8x8xf32>
    "tpu.trace_start"() <{level = 10 : i32, message = "bqd,bkd->bqk"}> : () -> ()
    %cst_80 = arith.constant dense<0.000000e+00> : vector<2x8x8xf32>
    %217 = tpu.matmul %214, %215, %cst_80 {dimension_numbers = #tpu.dot_dimension_numbers<[2], [2], [1], [1], [0, 0, 0, 1, 1, 1], [0], [0]>} : vector<2x8x8xf32>, vector<2x8x8xf32>, vector<2x8x8xf32> -> vector<2x8x8xf32>
    "tpu.trace_stop"() : () -> ()
    %cst_81 = arith.constant 0.353553385 : f32
    %218 = vector.broadcast %cst_81 : f32 to vector<2x8x8xf32>
    %219 = arith.mulf %217, %218 : vector<2x8x8xf32>
    %cst_82 = arith.constant dense<0xFF800000> : vector<2x8xf32>
    %220 = vector.multi_reduction <maximumf>, %219, %cst_82 [2] : vector<2x8x8xf32> to vector<2x8xf32>
    %221 = vector.shape_cast %220 : vector<2x8xf32> to vector<2x8x1xf32>
    %222 = vector.broadcast %221 : vector<2x8x1xf32> to vector<2x8x8xf32>
    %223 = arith.subf %219, %222 : vector<2x8x8xf32>
    %224 = math.exp %223 : vector<2x8x8xf32>
    %cst_83 = arith.constant dense<0.000000e+00> : vector<2x8xf32>
    %225 = vector.multi_reduction <add>, %224, %cst_83 [2] : vector<2x8x8xf32> to vector<2x8xf32>
    %226 = vector.shape_cast %225 : vector<2x8xf32> to vector<2x8x1xf32>
    %227 = vector.broadcast %226 : vector<2x8x1xf32> to vector<2x8x8xf32>
    %228 = arith.divf %224, %227 : vector<2x8x8xf32>
    "tpu.trace_start"() <{level = 10 : i32, message = "bqk,bkd->bqd"}> : () -> ()
    %cst_84 = arith.constant dense<0.000000e+00> : vector<2x8x8xf32>
    %229 = tpu.matmul %228, %216, %cst_84 {dimension_numbers = #tpu.dot_dimension_numbers<[2], [1], [1], [2], [0, 0, 0, 1, 1, 2], [0], [0]>} : vector<2x8x8xf32>, vector<2x8x8xf32>, vector<2x8x8xf32> -> vector<2x8x8xf32>
    "tpu.trace_stop"() : () -> ()
    %230 = tpu.concatenate %181, %197, %213, %229 in 2 : vector<2x8x8xf32>, vector<2x8x8xf32>, vector<2x8x8xf32>, vector<2x8x8xf32> -> vector<2x8x32xf32>
    %231 = vector.shape_cast %230 : vector<2x8x32xf32> to vector<16x32xf32>
    %c1_85 = arith.constant 1 : index
    %c0_86 = arith.constant 0 : index
    %c0_87 = arith.constant 0 : index
    %232 = vector.load %arg5[%c1_85, %c0_86, %c0_87] : memref<2x32x32xf32, #tpu.memory_space<vmem>>, vector<1x32x32xf32>
    %233 = vector.shape_cast %232 : vector<1x32x32xf32> to vector<32x32xf32>
    %cst_88 = arith.constant dense<0.000000e+00> : vector<16x32xf32>
    %234 = tpu.matmul %231, %233, %cst_88 {dimension_numbers = #tpu.dot_dimension_numbers<[1], [0], [0], [1], [0, 0, 1, 1], [], []>} : vector<16x32xf32>, vector<32x32xf32>, vector<16x32xf32> -> vector<16x32xf32>
    %235 = vector.broadcast %154 : vector<1x32xf32> to vector<16x32xf32>
    %236 = arith.addf %234, %235 : vector<16x32xf32>
    %237 = arith.addf %150, %236 : vector<16x32xf32>
    %cst_89 = arith.constant dense<0.000000e+00> : vector<16xf32>
    %238 = vector.multi_reduction <add>, %237, %cst_89 [1] : vector<16x32xf32> to vector<16xf32>
    %239 = vector.shape_cast %238 : vector<16xf32> to vector<16x1xf32>
    %cst_90 = arith.constant 3.200000e+01 : f32
    %240 = vector.broadcast %cst_90 : f32 to vector<16x1xf32>
    %241 = arith.divf %239, %240 : vector<16x1xf32>
    %242 = vector.broadcast %241 : vector<16x1xf32> to vector<16x32xf32>
    %243 = arith.subf %237, %242 : vector<16x32xf32>
    %244 = arith.mulf %243, %243 : vector<16x32xf32>
    %cst_91 = arith.constant dense<0.000000e+00> : vector<16xf32>
    %245 = vector.multi_reduction <add>, %244, %cst_91 [1] : vector<16x32xf32> to vector<16xf32>
    %246 = vector.shape_cast %245 : vector<16xf32> to vector<16x1xf32>
    %cst_92 = arith.constant 3.200000e+01 : f32
    %247 = vector.broadcast %cst_92 : f32 to vector<16x1xf32>
    %248 = arith.divf %246, %247 : vector<16x1xf32>
    %cst_93 = arith.constant 9.99999974E-6 : f32
    %249 = vector.broadcast %cst_93 : f32 to vector<16x1xf32>
    %250 = arith.addf %248, %249 : vector<16x1xf32>
    %251 = math.rsqrt %250 : vector<16x1xf32>
    %252 = vector.broadcast %251 : vector<16x1xf32> to vector<16x32xf32>
    %253 = arith.mulf %243, %252 : vector<16x32xf32>
    %254 = vector.broadcast %155 : vector<1x32xf32> to vector<16x32xf32>
    %255 = arith.mulf %253, %254 : vector<16x32xf32>
    %256 = vector.broadcast %156 : vector<1x32xf32> to vector<16x32xf32>
    %257 = arith.addf %255, %256 : vector<16x32xf32>
    %258 = arith.truncf %257 : vector<16x32xf32> to vector<16x32xbf16>
    %c1_94 = arith.constant 1 : index
    %c0_95 = arith.constant 0 : index
    %c0_96 = arith.constant 0 : index
    %259 = vector.load %arg7[%c1_94, %c0_95, %c0_96] : memref<2x32x2048xbf16, #tpu.memory_space<vmem>>, vector<1x32x2048xbf16>
    %260 = vector.shape_cast %259 : vector<1x32x2048xbf16> to vector<32x2048xbf16>
    %cst_97 = arith.constant dense<0.000000e+00> : vector<16x2048xf32>
    %261 = tpu.matmul %258, %260, %cst_97 {dimension_numbers = #tpu.dot_dimension_numbers<[1], [0], [0], [1], [0, 0, 1, 1], [], []>} : vector<16x32xbf16>, vector<32x2048xbf16>, vector<16x2048xf32> -> vector<16x2048xf32>
    %c1_98 = arith.constant 1 : index
    %c0_99 = arith.constant 0 : index
    %c0_100 = arith.constant 0 : index
    %262 = vector.load %arg8[%c1_98, %c0_99, %c0_100] : memref<2x1x2048xf32, #tpu.memory_space<vmem>>, vector<1x1x2048xf32>
    %263 = vector.shape_cast %262 : vector<1x1x2048xf32> to vector<1x2048xf32>
    %264 = vector.broadcast %263 : vector<1x2048xf32> to vector<16x2048xf32>
    %265 = arith.addf %261, %264 : vector<16x2048xf32>
    %cst_101 = arith.constant 0.000000e+00 : f32
    %266 = vector.broadcast %cst_101 : f32 to vector<16x2048xf32>
    %267 = arith.maximumf %265, %266 : vector<16x2048xf32>
    %268 = arith.truncf %267 : vector<16x2048xf32> to vector<16x2048xbf16>
    %c1_102 = arith.constant 1 : index
    %c0_103 = arith.constant 0 : index
    %c0_104 = arith.constant 0 : index
    %269 = vector.load %arg9[%c1_102, %c0_103, %c0_104] : memref<2x2048x32xbf16, #tpu.memory_space<vmem>>, vector<1x2048x32xbf16>
    %270 = vector.shape_cast %269 : vector<1x2048x32xbf16> to vector<2048x32xbf16>
    %cst_105 = arith.constant dense<0.000000e+00> : vector<16x32xf32>
    %271 = tpu.matmul %268, %270, %cst_105 {dimension_numbers = #tpu.dot_dimension_numbers<[1], [0], [0], [1], [0, 0, 1, 1], [], []>} : vector<16x2048xbf16>, vector<2048x32xbf16>, vector<16x32xf32> -> vector<16x32xf32>
    %272 = vector.broadcast %157 : vector<1x32xf32> to vector<16x32xf32>
    %273 = arith.addf %271, %272 : vector<16x32xf32>
    %274 = arith.addf %257, %273 : vector<16x32xf32>
    %cst_106 = arith.constant dense<0.000000e+00> : vector<16xf32>
    %275 = vector.multi_reduction <add>, %274, %cst_106 [1] : vector<16x32xf32> to vector<16xf32>
    %276 = vector.shape_cast %275 : vector<16xf32> to vector<16x1xf32>
    %cst_107 = arith.constant 3.200000e+01 : f32
    %277 = vector.broadcast %cst_107 : f32 to vector<16x1xf32>
    %278 = arith.divf %276, %277 : vector<16x1xf32>
    %279 = vector.broadcast %278 : vector<16x1xf32> to vector<16x32xf32>
    %280 = arith.subf %274, %279 : vector<16x32xf32>
    %281 = arith.mulf %280, %280 : vector<16x32xf32>
    %cst_108 = arith.constant dense<0.000000e+00> : vector<16xf32>
    %282 = vector.multi_reduction <add>, %281, %cst_108 [1] : vector<16x32xf32> to vector<16xf32>
    %283 = vector.shape_cast %282 : vector<16xf32> to vector<16x1xf32>
    %cst_109 = arith.constant 3.200000e+01 : f32
    %284 = vector.broadcast %cst_109 : f32 to vector<16x1xf32>
    %285 = arith.divf %283, %284 : vector<16x1xf32>
    %cst_110 = arith.constant 9.99999974E-6 : f32
    %286 = vector.broadcast %cst_110 : f32 to vector<16x1xf32>
    %287 = arith.addf %285, %286 : vector<16x1xf32>
    %288 = math.rsqrt %287 : vector<16x1xf32>
    %289 = vector.broadcast %288 : vector<16x1xf32> to vector<16x32xf32>
    %290 = arith.mulf %280, %289 : vector<16x32xf32>
    %291 = vector.broadcast %158 : vector<1x32xf32> to vector<16x32xf32>
    %292 = arith.mulf %290, %291 : vector<16x32xf32>
    %293 = vector.broadcast %159 : vector<1x32xf32> to vector<16x32xf32>
    %294 = arith.addf %292, %293 : vector<16x32xf32>
    %295 = vector.extract_strided_slice %294 {offsets = [4, 0], sizes = [4, 32], strides = [1, 1]} : vector<16x32xf32> to vector<4x32xf32>
    %c0_111 = arith.constant 0 : index
    %c0_112 = arith.constant 0 : index
    %296 = vector.load %arg11[%c0_111, %c0_112] : memref<1x128xf32, #tpu.memory_space<vmem>>, vector<1x128xf32>
    %297 = vector.extract_strided_slice %295 {offsets = [0, 0], sizes = [1, 32], strides = [1, 1]} : vector<4x32xf32> to vector<1x32xf32>
    %c0_113 = arith.constant 0 : index
    %c0_114 = arith.constant 0 : index
    %c0_115 = arith.constant 0 : index
    %298 = vector.load %arg10[%c0_113, %c0_114, %c0_115] : memref<4x32x128xf32, #tpu.memory_space<vmem>>, vector<1x32x128xf32>
    %299 = vector.shape_cast %298 : vector<1x32x128xf32> to vector<32x128xf32>
    %cst_116 = arith.constant dense<0.000000e+00> : vector<1x128xf32>
    %300 = tpu.matmul %297, %299, %cst_116 {dimension_numbers = #tpu.dot_dimension_numbers<[1], [0], [0], [1], [0, 0, 1, 1], [], []>} : vector<1x32xf32>, vector<32x128xf32>, vector<1x128xf32> -> vector<1x128xf32>
    %301 = arith.addf %296, %300 : vector<1x128xf32>
    %302 = vector.extract_strided_slice %295 {offsets = [1, 0], sizes = [1, 32], strides = [1, 1]} : vector<4x32xf32> to vector<1x32xf32>
    %c1_117 = arith.constant 1 : index
    %c0_118 = arith.constant 0 : index
    %c0_119 = arith.constant 0 : index
    %303 = vector.load %arg10[%c1_117, %c0_118, %c0_119] : memref<4x32x128xf32, #tpu.memory_space<vmem>>, vector<1x32x128xf32>
    %304 = vector.shape_cast %303 : vector<1x32x128xf32> to vector<32x128xf32>
    %cst_120 = arith.constant dense<0.000000e+00> : vector<1x128xf32>
    %305 = tpu.matmul %302, %304, %cst_120 {dimension_numbers = #tpu.dot_dimension_numbers<[1], [0], [0], [1], [0, 0, 1, 1], [], []>} : vector<1x32xf32>, vector<32x128xf32>, vector<1x128xf32> -> vector<1x128xf32>
    %306 = arith.addf %301, %305 : vector<1x128xf32>
    %307 = vector.extract_strided_slice %295 {offsets = [2, 0], sizes = [1, 32], strides = [1, 1]} : vector<4x32xf32> to vector<1x32xf32>
    %c2 = arith.constant 2 : index
    %c0_121 = arith.constant 0 : index
    %c0_122 = arith.constant 0 : index
    %308 = vector.load %arg10[%c2, %c0_121, %c0_122] : memref<4x32x128xf32, #tpu.memory_space<vmem>>, vector<1x32x128xf32>
    %309 = vector.shape_cast %308 : vector<1x32x128xf32> to vector<32x128xf32>
    %cst_123 = arith.constant dense<0.000000e+00> : vector<1x128xf32>
    %310 = tpu.matmul %307, %309, %cst_123 {dimension_numbers = #tpu.dot_dimension_numbers<[1], [0], [0], [1], [0, 0, 1, 1], [], []>} : vector<1x32xf32>, vector<32x128xf32>, vector<1x128xf32> -> vector<1x128xf32>
    %311 = arith.addf %306, %310 : vector<1x128xf32>
    %312 = vector.extract_strided_slice %295 {offsets = [3, 0], sizes = [1, 32], strides = [1, 1]} : vector<4x32xf32> to vector<1x32xf32>
    %c3 = arith.constant 3 : index
    %c0_124 = arith.constant 0 : index
    %c0_125 = arith.constant 0 : index
    %313 = vector.load %arg10[%c3, %c0_124, %c0_125] : memref<4x32x128xf32, #tpu.memory_space<vmem>>, vector<1x32x128xf32>
    %314 = vector.shape_cast %313 : vector<1x32x128xf32> to vector<32x128xf32>
    %cst_126 = arith.constant dense<0.000000e+00> : vector<1x128xf32>
    %315 = tpu.matmul %312, %314, %cst_126 {dimension_numbers = #tpu.dot_dimension_numbers<[1], [0], [0], [1], [0, 0, 1, 1], [], []>} : vector<1x32xf32>, vector<32x128xf32>, vector<1x128xf32> -> vector<1x128xf32>
    %316 = arith.addf %311, %315 : vector<1x128xf32>
    %317 = vector.extract_strided_slice %294 {offsets = [12, 0], sizes = [4, 32], strides = [1, 1]} : vector<16x32xf32> to vector<4x32xf32>
    %c0_127 = arith.constant 0 : index
    %c0_128 = arith.constant 0 : index
    %318 = vector.load %arg11[%c0_127, %c0_128] : memref<1x128xf32, #tpu.memory_space<vmem>>, vector<1x128xf32>
    %319 = vector.extract_strided_slice %317 {offsets = [0, 0], sizes = [1, 32], strides = [1, 1]} : vector<4x32xf32> to vector<1x32xf32>
    %c0_129 = arith.constant 0 : index
    %c0_130 = arith.constant 0 : index
    %c0_131 = arith.constant 0 : index
    %320 = vector.load %arg10[%c0_129, %c0_130, %c0_131] : memref<4x32x128xf32, #tpu.memory_space<vmem>>, vector<1x32x128xf32>
    %321 = vector.shape_cast %320 : vector<1x32x128xf32> to vector<32x128xf32>
    %cst_132 = arith.constant dense<0.000000e+00> : vector<1x128xf32>
    %322 = tpu.matmul %319, %321, %cst_132 {dimension_numbers = #tpu.dot_dimension_numbers<[1], [0], [0], [1], [0, 0, 1, 1], [], []>} : vector<1x32xf32>, vector<32x128xf32>, vector<1x128xf32> -> vector<1x128xf32>
    %323 = arith.addf %318, %322 : vector<1x128xf32>
    %324 = vector.extract_strided_slice %317 {offsets = [1, 0], sizes = [1, 32], strides = [1, 1]} : vector<4x32xf32> to vector<1x32xf32>
    %c1_133 = arith.constant 1 : index
    %c0_134 = arith.constant 0 : index
    %c0_135 = arith.constant 0 : index
    %325 = vector.load %arg10[%c1_133, %c0_134, %c0_135] : memref<4x32x128xf32, #tpu.memory_space<vmem>>, vector<1x32x128xf32>
    %326 = vector.shape_cast %325 : vector<1x32x128xf32> to vector<32x128xf32>
    %cst_136 = arith.constant dense<0.000000e+00> : vector<1x128xf32>
    %327 = tpu.matmul %324, %326, %cst_136 {dimension_numbers = #tpu.dot_dimension_numbers<[1], [0], [0], [1], [0, 0, 1, 1], [], []>} : vector<1x32xf32>, vector<32x128xf32>, vector<1x128xf32> -> vector<1x128xf32>
    %328 = arith.addf %323, %327 : vector<1x128xf32>
    %329 = vector.extract_strided_slice %317 {offsets = [2, 0], sizes = [1, 32], strides = [1, 1]} : vector<4x32xf32> to vector<1x32xf32>
    %c2_137 = arith.constant 2 : index
    %c0_138 = arith.constant 0 : index
    %c0_139 = arith.constant 0 : index
    %330 = vector.load %arg10[%c2_137, %c0_138, %c0_139] : memref<4x32x128xf32, #tpu.memory_space<vmem>>, vector<1x32x128xf32>
    %331 = vector.shape_cast %330 : vector<1x32x128xf32> to vector<32x128xf32>
    %cst_140 = arith.constant dense<0.000000e+00> : vector<1x128xf32>
    %332 = tpu.matmul %329, %331, %cst_140 {dimension_numbers = #tpu.dot_dimension_numbers<[1], [0], [0], [1], [0, 0, 1, 1], [], []>} : vector<1x32xf32>, vector<32x128xf32>, vector<1x128xf32> -> vector<1x128xf32>
    %333 = arith.addf %328, %332 : vector<1x128xf32>
    %334 = vector.extract_strided_slice %317 {offsets = [3, 0], sizes = [1, 32], strides = [1, 1]} : vector<4x32xf32> to vector<1x32xf32>
    %c3_141 = arith.constant 3 : index
    %c0_142 = arith.constant 0 : index
    %c0_143 = arith.constant 0 : index
    %335 = vector.load %arg10[%c3_141, %c0_142, %c0_143] : memref<4x32x128xf32, #tpu.memory_space<vmem>>, vector<1x32x128xf32>
    %336 = vector.shape_cast %335 : vector<1x32x128xf32> to vector<32x128xf32>
    %cst_144 = arith.constant dense<0.000000e+00> : vector<1x128xf32>
    %337 = tpu.matmul %334, %336, %cst_144 {dimension_numbers = #tpu.dot_dimension_numbers<[1], [0], [0], [1], [0, 0, 1, 1], [], []>} : vector<1x32xf32>, vector<32x128xf32>, vector<1x128xf32> -> vector<1x128xf32>
    %338 = arith.addf %333, %337 : vector<1x128xf32>
    %339 = tpu.concatenate %316, %338 in 0 : vector<1x128xf32>, vector<1x128xf32> -> vector<2x128xf32>
    %c0_145 = arith.constant 0 : index
    %c0_146 = arith.constant 0 : index
    %340 = vector.load %arg12[%c0_145, %c0_146] : memref<2x128xf32, #tpu.memory_space<vmem>>, vector<2x128xf32>
    tpu.vector_store %arg12[%c0_145, %c0_146], %339 {strides = array<i32>} : memref<2x128xf32, #tpu.memory_space<vmem>>, vector<2x128xf32>,
    return
  }
  func.func @transform_0(%arg0: i32) -> (i32, i32, i32) {
    %c0_i32 = arith.constant 0 : i32
    %c0_i32_0 = arith.constant 0 : i32
    %c0_i32_1 = arith.constant 0 : i32
    return %arg0, %c0_i32, %c0_i32_0 : i32, i32, i32
  }
  func.func @transform_1(%arg0: i32) -> (i32, i32) {
    %c0_i32 = arith.constant 0 : i32
    %c0_i32_0 = arith.constant 0 : i32
    %c0_i32_1 = arith.constant 0 : i32
    return %c0_i32, %c0_i32_0 : i32, i32
  }
  func.func @transform_2(%arg0: i32) -> (i32, i32) {
    %c0_i32 = arith.constant 0 : i32
    %c0_i32_0 = arith.constant 0 : i32
    %c0_i32_1 = arith.constant 0 : i32
    return %c0_i32, %c0_i32_0 : i32, i32
  }
  func.func @transform_3(%arg0: i32) -> (i32, i32, i32) {
    %c0_i32 = arith.constant 0 : i32
    %c0_i32_0 = arith.constant 0 : i32
    %c0_i32_1 = arith.constant 0 : i32
    %c0_i32_2 = arith.constant 0 : i32
    return %c0_i32, %c0_i32_0, %c0_i32_1 : i32, i32, i32
  }
  func.func @transform_4(%arg0: i32) -> (i32, i32, i32) {
    %c0_i32 = arith.constant 0 : i32
    %c0_i32_0 = arith.constant 0 : i32
    %c0_i32_1 = arith.constant 0 : i32
    %c0_i32_2 = arith.constant 0 : i32
    return %c0_i32, %c0_i32_0, %c0_i32_1 : i32, i32, i32
  }
  func.func @transform_5(%arg0: i32) -> (i32, i32, i32) {
    %c0_i32 = arith.constant 0 : i32
    %c0_i32_0 = arith.constant 0 : i32
    %c0_i32_1 = arith.constant 0 : i32
    %c0_i32_2 = arith.constant 0 : i32
    return %c0_i32, %c0_i32_0, %c0_i32_1 : i32, i32, i32
  }
  func.func @transform_6(%arg0: i32) -> (i32, i32, i32) {
    %c0_i32 = arith.constant 0 : i32
    %c0_i32_0 = arith.constant 0 : i32
    %c0_i32_1 = arith.constant 0 : i32
    %c0_i32_2 = arith.constant 0 : i32
    return %c0_i32, %c0_i32_0, %c0_i32_1 : i32, i32, i32
  }
  func.func @transform_7(%arg0: i32) -> (i32, i32, i32) {
    %c0_i32 = arith.constant 0 : i32
    %c0_i32_0 = arith.constant 0 : i32
    %c0_i32_1 = arith.constant 0 : i32
    %c0_i32_2 = arith.constant 0 : i32
    return %c0_i32, %c0_i32_0, %c0_i32_1 : i32, i32, i32
  }
  func.func @transform_8(%arg0: i32) -> (i32, i32, i32) {
    %c0_i32 = arith.constant 0 : i32
    %c0_i32_0 = arith.constant 0 : i32
    %c0_i32_1 = arith.constant 0 : i32
    %c0_i32_2 = arith.constant 0 : i32
    return %c0_i32, %c0_i32_0, %c0_i32_1 : i32, i32, i32
  }
  func.func @transform_9(%arg0: i32) -> (i32, i32, i32) {
    %c0_i32 = arith.constant 0 : i32
    %c0_i32_0 = arith.constant 0 : i32
    %c0_i32_1 = arith.constant 0 : i32
    %c0_i32_2 = arith.constant 0 : i32
    return %c0_i32, %c0_i32_0, %c0_i32_1 : i32, i32, i32
  }
  func.func @transform_10(%arg0: i32) -> (i32, i32) {
    %c0_i32 = arith.constant 0 : i32
    %c0_i32_0 = arith.constant 0 : i32
    %c0_i32_1 = arith.constant 0 : i32
    return %c0_i32, %c0_i32_0 : i32, i32
  }
  func.func @transform_11(%arg0: i32) -> (i32, i32) {
    %c0_i32 = arith.constant 0 : i32
    %c0_i32_0 = arith.constant 0 : i32
    return %arg0, %c0_i32 : i32, i32
  }
}

</mosaic_0001>

<bundles_post_ra>
// kernel: transformer_time_series.1
= control target key start
LH: loop header
LB: loop body
LE: loop exit
PB: predicated region body
PF: predicated region fallthrough
CT: control target
= control target key end

     0   :  { %vm57_vm0 = vcmask 1043456   ;;  %vm50_vm1 = vcmask 97280   ;;  %vm10016_vm2 = vmmov 1   ;;  %vm145_vm4 = vcmask 261120   ;;  %s10019_s15 = smov 96   ;;  %s10020_s16 = smov 64   ;;  %s11851_s1 = inlined_call_operand.vmem [shape: f32[12,32], index: 1, kind: input, shape index: {}]   ;;  %s11852_s0 = inlined_call_operand.vmem [shape: f32[2,8,12], index: 0, kind: input, shape index: {}]   ;;  %s11853_s3 = inlined_call_operand.vmem [shape: f32[2,32,96], index: 3, kind: input, shape index: {}]   ;;  %s11854_s2 = inlined_call_operand.vmem [shape: f32[1,32], index: 2, kind: input, shape index: {}]   ;;  %s11855_s5 = inlined_call_operand.vmem [shape: f32[2,7,96], index: 5, kind: input, shape index: {}]   ;;  %s11856_s4 = inlined_call_operand.vmem [shape: f32[2,32,32], index: 4, kind: input, shape index: {}]   ;;  %s11857_s6 = inlined_call_operand.vmem [shape: bf16[2,32,2048], index: 6, kind: input, shape index: {}]   ;;  %s11858_s8 = inlined_call_operand.vmem [shape: bf16[2,2048,32], index: 8, kind: input, shape index: {}]   ;;  %s11859_s7 = inlined_call_operand.vmem [shape: f32[2,1,2048], index: 7, kind: input, shape index: {}]   ;;  %s11860_s9 = inlined_call_operand.vmem [shape: f32[4,32,128], index: 9, kind: input, shape index: {}]   ;;  %s11861_s10 = inlined_call_operand.vmem [shape: f32[1,128], index: 10, kind: input, shape index: {}]   ;;  %s11862_s11 = inlined_call_operand.vmem [shape: f32[2,128], index: 11, kind: output, shape index: {}]  }
   0x1   :  { %v41_v0 = vld [vmem:[%s11851_s1] sm:$0xff]  ;;  %v42_v1 = vld [vmem:[%s11851_s1 + $0x8] sm:$0xf]  ;;  %vm9559_vm3 = vmpackc.low %vm57_vm0, %vm10016_vm2  ;;  %v10017_v16 = vmov 0.0   ;;  %v141_v17 = vlaneseq  ;;  %vm10018_vm5 = vmmov 0   ;;  %vm230_vm6 = vcmask 64512  }
   0x2   :  { %v9558_v2 = vpack.c.bf16 %v42_v1, %v41_v0  ;;  %v39_v3 = vld [vmem:[%s11852_s0] sm:$0xff]  ;;  %v138_v5 = vld [vmem:[%s11853_s3 + $0x8] sm:$0xff]  ;;  %v139_v8 = vld [vmem:[%s11853_s3 + $0x10] sm:$0xff]  ;;  %9277 = vmatprep.subr.mxu0 %v10017_v16  ;;  %9279 = vmatprep.mubr.msk.f32.mxu0 %vm10018_vm5, %v10017_v16  ;;  %s10021_s17 = smov 88   ;;  %s10022_s18 = smov 120   ;;  %vm1583_vm7 = vcmask 195584  }
   0x3   :  { %v137_v4 = vld [vmem:[%s11853_s3] sm:$0xff]  ;;  %9263 = vmatprep.mubr.msk.f32.mxu1 %vm50_vm1, %v39_v3  ;;  %v40_v7 = vld [vmem:[%s11852_s0 + $0x8] sm:$0xff]  ;;  %v140_v9 = vld [vmem:[%s11853_s3 + $0x18] sm:$0xff]  ;;  %v10134_v18 = vshrl.u32 %v141_v17, 7  ;;  %s10023_s19 = smov 56   ;;  %s10024_s20 = smov 80  }
   0x4   :  { %9560 = vmatprep.subr.msk.bf16.mxu1 %vm9559_vm3, %v9558_v2  ;;  %v9564_v6 = vpack.c.bf16 %v138_v5, %v137_v4  ;;  %v9568_v10 = vpack.c.bf16 %v140_v9, %v139_v8  ;;  %v8060_v11 = vld [vmem:[%s11854_s2] ss:$0 sm:$0xff]  ;;  %s10025_s21 = smov 112   ;;  %s10026_s22 = smov 48   ;;  %vm1580_vm8 = vcmask 130048   ;;  %vm8053_vm9 = vcmask 1040384  }
   0x5   :  { %9563 = vmatpush3.bf16.msk.msra.mxu1 %vm9559_vm3, %v9558_v2  ;;  %v10141_v19 = vsub.s32 0, %v10134_v18  ;;  %v10146_v20 = vld [vmem:[%s11855_s5] sm:$0x7f]  ;;  %s10027_s23 = smov 72   ;;  %s10028_s24 = smov 104  }
   0x6   :  { %9565 = vmatprep.subr.bf16.mxu1 %v9564_v6  ;;  %s10029_s25 = smov 40   ;;  %s10030_s26 = smov 8  }
   0x7   :  { %v144_v21 = vrot.slane %v10146_v20, %v10141_v19  ;;  %s11865_s1 = smov 16   ;;  %s11863_s2 = smov 24  }
   0x8   :  { %9264 = vmatmul.mubr.msk.f32.vlgmr.msra.gmra.mrb[0].mxu1 %vm50_vm1, %v40_v7 }
   0x9   :  { %9567 = vmatpush3.bf16.msra.mxu1 %v9564_v6 }
   0xa   :  { %9569 = vmatprep.subr.bf16.mxu1 %v9568_v10 }
   0xd   :  { %9571 = vmatpush3.bf16.msra.mxu1 %v9568_v10 }
   0xe   :  { %9287 = vmatprep.subr.mxu1 %v10017_v16 }
  0xdb   :  { %v9265_v12 = vpop.f32.mrb[0].mxu1 }
  0xdc   :  { %v127_v13 = vpop.f32.mrb[1].mxu1  ;;  %v10126_v15 = vadd.f32 %v9265_v12, %v8060_v11 }
  0xdd   :  { %v10124_v14 = vadd.f32 %v8060_v11, %v127_v13 }
  0xdf   :  { %9274 = vmatprep.mubr.msk.f32.mxu1 %vm145_vm4, %v10124_v14 }
  0xe0   :  { %9275 = vmatmul.mubr.msk.f32.vlgmr.msra.gmra.mrb[2].mxu1 %vm145_vm4, %v10126_v15 }
  0xe1   :  { %9289 = vmatprep.mubr.msk.f32.mxu1 %vm10018_vm5, %v10017_v16 }
 0x1b3   :  { %v9276_v22 = vpop.f32.mrb[2].mxu1 }
 0x1b4   :  { %v218_v23 = vpop.f32.mrb[3].mxu1  ;;  %v10154_v25 = vadd.f32 %v9276_v22, %v144_v21 }
 0x1b5   :  { %v10150_v24 = vadd.f32 %v218_v23, %v144_v21 }
 0x1b7   :  { %228 = vrot.lane.b32.xlu0 %v10150_v24, %s10019_s15 }
 0x1bb   :  { %306 = vrot.lane.b32.xlu0 %v10154_v25, %s10019_s15 }
 0x229   :  { %v229_v26 = vpop.permute.xlu0 %228 }
 0x22a   :  { %9278 = vmatpush3.xpose.msk.msra.mxu0 %vm230_vm6, %v229_v26 }
 0x22b   :  { %9282 = vmatprep.subr.mxu0 %v10017_v16 }
 0x22d   :  { %9280 = vmatmul.mubr.msk.f32.vlgmr.msra.gmra.mrb[0].mxu0 %vm230_vm6, %v10150_v24  ;;  %v307_v27 = vpop.permute.xlu0 %306 }
 0x22e   :  { %9283 = vmatpush3.xpose.msk.msra.mxu0 %vm230_vm6, %v307_v27  ;;  %9284 = vmatprep.mubr.msk.f32.mxu0 %vm10018_vm5, %v10017_v16 }
 0x22f   :  { %9292 = vmatprep.subr.mxu0 %v10017_v16 }
 0x231   :  { %9285 = vmatmul.mubr.msk.f32.vlgmr.msra.gmra.mrb[2].mxu0 %vm230_vm6, %v10154_v25 }
 0x232   :  { %9294 = vmatprep.mubr.msk.f32.mxu0 %vm10018_vm5, %v10017_v16 }
 0x300   :  { %v301_v28 = vpop.f32.mrb[0].mxu0 }
 0x301   :  { %v382_v29 = vmul.f32 0.35355338, %v301_v28  ;;  %v9281_v30 = vpop.f32.mrb[1].mxu0 }
 0x303   :  { %v384_v31 = vsel %vm230_vm6, %v382_v29, -inf }
 0x304   :  { %385 = vmax.xlane.f32.xlu1 %v384_v31  ;;  %v378_v32 = vpop.f32.mrb[2].mxu0 }
 0x305   :  { %v383_v33 = vmul.f32 0.35355338, %v378_v32  ;;  %v9286_v34 = vpop.f32.mrb[3].mxu0 }
 0x307   :  { %v387_v35 = vsel %vm230_vm6, %v383_v33, -inf }
 0x308   :  { %388 = vmax.xlane.f32.xlu1 %v387_v35 }
 0x319   :  { %406 = vrot.lane.b32.xlu1 %v10150_v24, %s10020_s16 }
 0x31d   :  { %482 = vrot.lane.b32.xlu1 %v10154_v25, %s10020_s16 }
 0x321   :  { %560 = vrot.lane.b32.xlu1 %v10150_v24, %s10021_s17 }
 0x325   :  { %638 = vrot.lane.b32.xlu1 %v10154_v25, %s10021_s17 }
 0x391   :  { %v386_v36 = vpop.xlane.xlu1 %385 }
 0x392   :  { %v390_v37 = vsub.f32 %v382_v29, %v386_v36 }
 0x394   :  { %v392_v38 = vmul.f32 1.442695, %v390_v37 }
 0x395   :  { %v389_v39 = vpop.xlane.xlu1 %388 }
 0x396   :  { %9933 = vpow2.f32 %v392_v38  ;;  %v391_v40 = vsub.f32 %v383_v33, %v389_v39 }
 0x398   :  { %v394_v41 = vmul.f32 1.442695, %v391_v40 }
 0x399   :  { %v407_v42 = vpop.permute.xlu1 %406 }
 0x39a   :  { %9935 = vpow2.f32 %v394_v41  ;;  %9288 = vmatpush3.msra.mxu1 %v407_v42 }
 0x39b   :  { %9297 = vmatprep.subr.mxu1 %v10017_v16 }
 0x39d   :  { %v483_v43 = vpop.permute.xlu1 %482 }
 0x39e   :  { %9293 = vmatpush3.msra.mxu0 %v483_v43 }
 0x39f   :  { %9302 = vmatprep.subr.mxu0 %v10017_v16 }
 0x3a0   :  { %v9934_v44 = vpop.eup %9933 }
 0x3a1   :  { %v396_v45 = vsel %vm230_vm6, %v9934_v44, 0.0  ;;  %v561_v48 = vpop.permute.xlu1 %560 }
 0x3a2   :  { %397 = vadd.xlane.f32.xlu0 %v396_v45 }
 0x3a4   :  { %v9936_v46 = vpop.eup %9935 }
 0x3a5   :  { %v399_v47 = vsel %vm230_vm6, %v9936_v46, 0.0  ;;  %v639_v49 = vpop.permute.xlu1 %638 }
 0x3a6   :  { %400 = vadd.xlane.f32.xlu1 %v399_v47 }
 0x3b7   :  { %636 = vrot.lane.b32.xlu1 %v10154_v25, %s10022_s18 }
 0x3b8   :  { %558 = vrot.lane.b32.xlu0 %v10150_v24, %s10022_s18 }
 0x42f   :  { %v398_v50 = vpop.xlane.xlu0 %397 }
 0x430   :  { %9937 = vrcp.f32 %v398_v50 }
 0x433   :  { %v401_v51 = vpop.xlane.xlu1 %400  ;;  %v559_v56 = vpop.permute.xlu0 %558 }
 0x434   :  { %9939 = vrcp.f32 %v401_v51 }
 0x437   :  { %v637_v57 = vpop.permute.xlu1 %636 }
 0x43a   :  { %v9938_v52 = vpop.eup %9937 }
 0x43b   :  { %v403_v53 = vmul.f32 %v9938_v52, %v9934_v44 }
 0x43d   :  { %9290 = vmatmul.mubr.msk.f32.vlgmr.msra.gmra.mrb[4].mxu1 %vm230_vm6, %v403_v53 }
 0x43e   :  { %v9940_v54 = vpop.eup %9939  ;;  %9298 = vmatpush3.xpose.msk.msra.mxu1 %vm230_vm6, %v561_v48  ;;  %9299 = vmatprep.mubr.msk.f32.mxu1 %vm10018_vm5, %v10017_v16 }
 0x43f   :  { %v405_v55 = vmul.f32 %v9940_v54, %v9936_v46  ;;  %9307 = vmatprep.subr.mxu1 %v10017_v16 }
 0x441   :  { %9295 = vmatmul.mubr.msk.f32.vlgmr.msra.gmra.mrb[4].mxu0 %vm230_vm6, %v405_v55  ;;  %9300 = vmatmul.mubr.msk.f32.vlgmr.msra.gmra.mrb[6].mxu1 %vm230_vm6, %v559_v56 }
 0x442   :  { %9303 = vmatpush3.xpose.msk.msra.mxu0 %vm230_vm6, %v639_v49  ;;  %9304 = vmatprep.mubr.msk.f32.mxu0 %vm10018_vm5, %v10017_v16 }
 0x443   :  { %9312 = vmatprep.subr.mxu0 %v10017_v16  ;;  %9309 = vmatprep.mubr.msk.f32.mxu1 %vm10018_vm5, %v10017_v16 }
 0x445   :  { %9305 = vmatmul.mubr.msk.f32.vlgmr.msra.gmra.mrb[6].mxu0 %vm230_vm6, %v637_v57 }
 0x446   :  { %9314 = vmatprep.mubr.msk.f32.mxu0 %vm10018_vm5, %v10017_v16 }
 0x510   :  { %v10204_v58 = vpop.f32.mrb[4].mxu1 }
 0x511   :  { %v9291_v59 = vpop.f32.mrb[5].mxu1 }
 0x514   :  { %v10206_v60 = vpop.f32.mrb[4].mxu0  ;;  %v632_v61 = vpop.f32.mrb[6].mxu1 }
 0x515   :  { %v714_v62 = vmul.f32 0.35355338, %v632_v61  ;;  %v9296_v63 = vpop.f32.mrb[5].mxu0  ;;  %v9301_v0 = vpop.f32.mrb[7].mxu1 }
 0x517   :  { %v716_v1 = vsel %vm230_vm6, %v714_v62, -inf }
 0x518   :  { %v710_v2 = vpop.f32.mrb[6].mxu0  ;;  %717 = vmax.xlane.f32.xlu1 %v716_v1 }
 0x519   :  { %v715_v3 = vmul.f32 0.35355338, %v710_v2  ;;  %v9306_v4 = vpop.f32.mrb[7].mxu0 }
 0x51b   :  { %v719_v5 = vsel %vm230_vm6, %v715_v3, -inf }
 0x51c   :  { %720 = vmax.xlane.f32.xlu0 %v719_v5 }
 0x529   :  { %738 = vrot.lane.b32.xlu1 %v10150_v24, %s10023_s19 }
 0x52d   :  { %892 = vrot.lane.b32.xlu1 %v10150_v24, %s10024_s20 }
 0x531   :  { %970 = vrot.lane.b32.xlu1 %v10154_v25, %s10024_s20 }
 0x532   :  { %814 = vrot.lane.b32.xlu0 %v10154_v25, %s10023_s19 }
 0x536   :  { %890 = vrot.lane.b32.xlu0 %v10150_v24, %s10025_s21 }
 0x5a5   :  { %v718_v6 = vpop.xlane.xlu1 %717 }
 0x5a6   :  { %v722_v7 = vsub.f32 %v714_v62, %v718_v6 }
 0x5a8   :  { %v724_v8 = vmul.f32 1.442695, %v722_v7 }
 0x5a9   :  { %v739_v9 = vpop.permute.xlu1 %738  ;;  %v721_v10 = vpop.xlane.xlu0 %720 }
 0x5aa   :  { %9941 = vpow2.f32 %v724_v8  ;;  %v723_v11 = vsub.f32 %v715_v3, %v721_v10  ;;  %9308 = vmatpush3.msra.mxu1 %v739_v9 }
 0x5ab   :  { %9317 = vmatprep.subr.mxu1 %v10017_v16 }
 0x5ac   :  { %v726_v12 = vmul.f32 1.442695, %v723_v11 }
 0x5ad   :  { %v815_v13 = vpop.permute.xlu0 %814  ;;  %v893_v26 = vpop.permute.xlu1 %892 }
 0x5ae   :  { %9943 = vpow2.f32 %v726_v12  ;;  %9313 = vmatpush3.msra.mxu0 %v815_v13 }
 0x5af   :  { %9322 = vmatprep.subr.mxu0 %v10017_v16 }
 0x5b1   :  { %v971_v27 = vpop.permute.xlu1 %970  ;;  %v891_v34 = vpop.permute.xlu0 %890 }
 0x5b4   :  { %v9942_v17 = vpop.eup %9941 }
 0x5b5   :  { %v728_v21 = vsel %vm230_vm6, %v9942_v17, 0.0 }
 0x5b6   :  { %729 = vadd.xlane.f32.xlu1 %v728_v21 }
 0x5b8   :  { %v9944_v22 = vpop.eup %9943 }
 0x5b9   :  { %v731_v23 = vsel %vm230_vm6, %v9944_v22, 0.0 }
 0x5ba   :  { %732 = vadd.xlane.f32.xlu1 %v731_v23 }
 0x5cb   :  { %968 = vrot.lane.b32.xlu1 %v10154_v25, %s10025_s21 }
 0x643   :  { %v730_v28 = vpop.xlane.xlu1 %729 }
 0x644   :  { %9945 = vrcp.f32 %v730_v28 }
 0x647   :  { %v733_v29 = vpop.xlane.xlu1 %732 }
 0x648   :  { %9947 = vrcp.f32 %v733_v29 }
 0x64b   :  { %v969_v35 = vpop.permute.xlu1 %968 }
 0x64e   :  { %v9946_v30 = vpop.eup %9945 }
 0x64f   :  { %v735_v31 = vmul.f32 %v9946_v30, %v9942_v17 }
 0x651   :  { %9310 = vmatmul.mubr.msk.f32.vlgmr.msra.gmra.mrb[8].mxu1 %vm230_vm6, %v735_v31 }
 0x652   :  { %v9948_v32 = vpop.eup %9947  ;;  %9318 = vmatpush3.xpose.msk.msra.mxu1 %vm230_vm6, %v893_v26  ;;  %9319 = vmatprep.mubr.msk.f32.mxu1 %vm10018_vm5, %v10017_v16 }
 0x653   :  { %v737_v33 = vmul.f32 %v9948_v32, %v9944_v22  ;;  %9327 = vmatprep.subr.mxu1 %v10017_v16 }
 0x655   :  { %9315 = vmatmul.mubr.msk.f32.vlgmr.msra.gmra.mrb[8].mxu0 %vm230_vm6, %v737_v33  ;;  %9320 = vmatmul.mubr.msk.f32.vlgmr.msra.gmra.mrb[10].mxu1 %vm230_vm6, %v891_v34 }
 0x656   :  { %9323 = vmatpush3.xpose.msk.msra.mxu0 %vm230_vm6, %v971_v27  ;;  %9324 = vmatprep.mubr.msk.f32.mxu0 %vm10018_vm5, %v10017_v16 }
 0x657   :  { %9332 = vmatprep.subr.mxu0 %v10017_v16  ;;  %9329 = vmatprep.mubr.msk.f32.mxu1 %vm10018_vm5, %v10017_v16 }
 0x659   :  { %9325 = vmatmul.mubr.msk.f32.vlgmr.msra.gmra.mrb[10].mxu0 %vm230_vm6, %v969_v35 }
 0x65a   :  { %9334 = vmatprep.mubr.msk.f32.mxu0 %vm10018_vm5, %v10017_v16 }
 0x724   :  { %v10242_v36 = vpop.f32.mrb[8].mxu1 }
 0x725   :  { %v9311_v37 = vpop.f32.mrb[9].mxu1 }
 0x728   :  { %v10244_v38 = vpop.f32.mrb[8].mxu0  ;;  %v964_v39 = vpop.f32.mrb[10].mxu1 }
 0x729   :  { %v1046_v40 = vmul.f32 0.35355338, %v964_v39  ;;  %v9316_v41 = vpop.f32.mrb[9].mxu0  ;;  %v9321_v42 = vpop.f32.mrb[11].mxu1 }
 0x72b   :  { %v1048_v43 = vsel %vm230_vm6, %v1046_v40, -inf }
 0x72c   :  { %v1042_v44 = vpop.f32.mrb[10].mxu0  ;;  %1049 = vmax.xlane.f32.xlu0 %v1048_v43 }
 0x72d   :  { %v1047_v45 = vmul.f32 0.35355338, %v1042_v44  ;;  %v9326_v46 = vpop.f32.mrb[11].mxu0 }
 0x72f   :  { %v1051_v47 = vsel %vm230_vm6, %v1047_v45, -inf }
 0x730   :  { %1052 = vmax.xlane.f32.xlu1 %v1051_v47  ;;  %v1588_v47 = vld [vmem:[%s11856_s4 + $0x10] sm:$0xff] }
 0x741   :  { %1070 = vrot.lane.b32.xlu1 %v10150_v24, %s10026_s22 }
 0x742   :  { %1146 = vrot.lane.b32.xlu0 %v10154_v25, %s10026_s22 }
 0x745   :  { %1224 = vrot.lane.b32.xlu1 %v10150_v24, %s10027_s23 }
 0x749   :  { %1302 = vrot.lane.b32.xlu1 %v10154_v25, %s10027_s23 }
 0x74d   :  { %1300 = vrot.lane.b32.xlu1 %v10154_v25, %s10028_s24 }
 0x7b9   :  { %v1050_v48 = vpop.xlane.xlu0 %1049 }
 0x7ba   :  { %v1054_v49 = vsub.f32 %v1046_v40, %v1050_v48  ;;  %v1589_v48 = vld [vmem:[%s11856_s4 + $0x18] sm:$0xff] }
 0x7bc   :  { %v1056_v50 = vmul.f32 1.442695, %v1054_v49  ;;  %v9576_v49 = vpack.c.bf16 %v1589_v48, %v1588_v47 }
 0x7bd   :  { %v1053_v51 = vpop.xlane.xlu1 %1052  ;;  %v1147_v52 = vpop.permute.xlu0 %1146 }
 0x7be   :  { %9949 = vpow2.f32 %v1056_v50  ;;  %v1055_v53 = vsub.f32 %v1047_v45, %v1053_v51  ;;  %9333 = vmatpush3.msra.mxu0 %v1147_v52  ;;  %v1587_v45 = vld [vmem:[%s11856_s4 + $0x8] sm:$0xff] }
 0x7bf   :  { %9342 = vmatprep.subr.mxu0 %v10017_v16 }
 0x7c0   :  { %v1058_v54 = vmul.f32 1.442695, %v1055_v53 }
 0x7c1   :  { %v1071_v55 = vpop.permute.xlu1 %1070 }
 0x7c2   :  { %9951 = vpow2.f32 %v1058_v54  ;;  %9328 = vmatpush3.msra.mxu1 %v1071_v55 }
 0x7c3   :  { %9337 = vmatprep.subr.mxu1 %v10017_v16 }
 0x7c5   :  { %v1225_v0 = vpop.permute.xlu1 %1224 }
 0x7c8   :  { %v9950_v56 = vpop.eup %9949 }
 0x7c9   :  { %v1060_v57 = vsel %vm230_vm6, %v9950_v56, 0.0  ;;  %v1303_v4 = vpop.permute.xlu1 %1302 }
 0x7ca   :  { %1061 = vadd.xlane.f32.xlu0 %v1060_v57 }
 0x7cc   :  { %v9952_v59 = vpop.eup %9951 }
 0x7cd   :  { %v1063_v61 = vsel %vm230_vm6, %v9952_v59, 0.0  ;;  %v1301_v7 = vpop.permute.xlu1 %1300 }
 0x7ce   :  { %1064 = vadd.xlane.f32.xlu0 %v1063_v61 }
 0x7e4   :  { %1222 = vrot.lane.b32.xlu0 %v10150_v24, %s10028_s24 }
 0x857   :  { %v1062_v62 = vpop.xlane.xlu0 %1061 }
 0x858   :  { %9953 = vrcp.f32 %v1062_v62 }
 0x85b   :  { %v1065_v63 = vpop.xlane.xlu0 %1064 }
 0x85c   :  { %9955 = vrcp.f32 %v1065_v63 }
 0x85f   :  { %v1223_v6 = vpop.permute.xlu0 %1222 }
 0x862   :  { %v9954_v1 = vpop.eup %9953 }
 0x863   :  { %v1067_v2 = vmul.f32 %v9954_v1, %v9950_v56 }
 0x865   :  { %9330 = vmatmul.mubr.msk.f32.vlgmr.msra.gmra.mrb[12].mxu1 %vm230_vm6, %v1067_v2 }
 0x866   :  { %v9956_v3 = vpop.eup %9955  ;;  %9338 = vmatpush3.xpose.msk.msra.mxu1 %vm230_vm6, %v1225_v0  ;;  %9339 = vmatprep.mubr.msk.f32.mxu1 %vm10018_vm5, %v10017_v16 }
 0x867   :  { %v1069_v5 = vmul.f32 %v9956_v3, %v9952_v59  ;;  %9347 = vmatprep.subr.mxu1 %v10017_v16 }
 0x869   :  { %9335 = vmatmul.mubr.msk.f32.vlgmr.msra.gmra.mrb[12].mxu0 %vm230_vm6, %v1069_v5  ;;  %9340 = vmatmul.mubr.msk.f32.vlgmr.msra.gmra.mrb[14].mxu1 %vm230_vm6, %v1223_v6 }
 0x86a   :  { %9343 = vmatpush3.xpose.msk.msra.mxu0 %vm230_vm6, %v1303_v4  ;;  %9344 = vmatprep.mubr.msk.f32.mxu0 %vm10018_vm5, %v10017_v16 }
 0x86b   :  { %9352 = vmatprep.subr.mxu0 %v10017_v16  ;;  %9349 = vmatprep.mubr.msk.f32.mxu1 %vm10018_vm5, %v10017_v16 }
 0x86d   :  { %9345 = vmatmul.mubr.msk.f32.vlgmr.msra.gmra.mrb[14].mxu0 %vm230_vm6, %v1301_v7 }
 0x86e   :  { %9354 = vmatprep.mubr.msk.f32.mxu0 %vm10018_vm5, %v10017_v16 }
 0x938   :  { %v1142_v8 = vpop.f32.mrb[12].mxu1 }
 0x939   :  { %v9331_v9 = vpop.f32.mrb[13].mxu1 }
 0x93c   :  { %v1218_v10 = vpop.f32.mrb[12].mxu0  ;;  %v1296_v11 = vpop.f32.mrb[14].mxu1 }
 0x93d   :  { %v1378_v12 = vmul.f32 0.35355338, %v1296_v11  ;;  %v9336_v13 = vpop.f32.mrb[13].mxu0  ;;  %v9341_v17 = vpop.f32.mrb[15].mxu1 }
 0x93f   :  { %v1380_v21 = vsel %vm230_vm6, %v1378_v12, -inf }
 0x940   :  { %v1374_v22 = vpop.f32.mrb[14].mxu0  ;;  %1381 = vmax.xlane.f32.xlu0 %v1380_v21 }
 0x941   :  { %v1379_v23 = vmul.f32 0.35355338, %v1374_v22  ;;  %v9346_v26 = vpop.f32.mrb[15].mxu0 }
 0x943   :  { %v1383_v27 = vsel %vm230_vm6, %v1379_v23, -inf }
 0x944   :  { %1384 = vmax.xlane.f32.xlu1 %v1383_v27  ;;  %v1717_v27 = vld [vmem:[%s11857_s6] sm:$0xff] }
 0x955   :  { %1402 = vrot.lane.b32.xlu1 %v10150_v24, %s10029_s25 }
 0x959   :  { %1556 = vrot.lane.b32.xlu1 %v10242_v36, %s10030_s26 }
 0x95d   :  { %1558 = vrot.lane.b32.xlu1 %v10244_v38, %s10030_s26 }
 0x961   :  { %1566 = vrot.lane.b32.xlu1 %v1218_v10, %s11865_s1 }
 0x9cd   :  { %v1382_v28 = vpop.xlane.xlu0 %1381 }
 0x9ce   :  { %v1386_v29 = vsub.f32 %v1378_v12, %v1382_v28  ;;  %v1725_v28 = vld [vmem:[%s11857_s6 + $0x40] sm:$0xff] }
 0x9d0   :  { %v1388_v30 = vmul.f32 1.442695, %v1386_v29  ;;  %v1718_v29 = vld [vmem:[%s11857_s6 + $0x8] sm:$0xff] }
 0x9d1   :  { %v1385_v31 = vpop.xlane.xlu1 %1384 }
 0x9d2   :  { %9957 = vpow2.f32 %v1388_v30  ;;  %v1387_v32 = vsub.f32 %v1379_v23, %v1385_v31  ;;  %v8093_v30 = vcombine.high %v1717_v27, %v1725_v28  ;;  %v1726_v31 = vld [vmem:[%s11857_s6 + $0x48] sm:$0xff] }
 0x9d4   :  { %v1390_v33 = vmul.f32 1.442695, %v1387_v32  ;;  %v8092_v32 = vcombine.low %v1717_v27, %v1725_v28  ;;  %v1746_v27 = vld [vmem:[%s11857_s6 + $0xe8] sm:$0xff] }
 0x9d5   :  { %v1403_v34 = vpop.permute.xlu1 %1402 }
 0x9d6   :  { %9959 = vpow2.f32 %v1390_v33  ;;  %9348 = vmatpush3.msra.mxu1 %v1403_v34  ;;  %v8094_v33 = vcombine.low %v1718_v29, %v1726_v31  ;;  %v8095_v34 = vcombine.high %v1718_v29, %v1726_v31 }
 0x9d9   :  { %v1557_v54 = vpop.permute.xlu1 %1556 }
 0x9da   :  { %v1578_v57 = vsel %vm230_vm6, %v10204_v58, %v1557_v54  ;;  %v10321_v58 = vsub.s32 1, %v10134_v18 }
 0x9dc   :  { %v9958_v24 = vpop.eup %9957  ;;  %v1593_v4 = vrot.slane %v10146_v20, %v10321_v58 }
 0x9dd   :  { %v1392_v35 = vsel %vm230_vm6, %v9958_v24, 0.0  ;;  %v1559_v55 = vpop.permute.xlu1 %1558 }
 0x9de   :  { %1393 = vadd.xlane.f32.xlu0 %v1392_v35  ;;  %v1579_v0 = vsel %vm230_vm6, %v10206_v60, %v1559_v55  ;;  %v1741_v35 = vld [vmem:[%s11857_s6 + $0xc0] sm:$0xff]  ;;  %v10377_v55 = vsub.s32 3, %v10134_v18 }
 0x9e0   :  { %v9960_v36 = vpop.eup %9959 }
 0x9e1   :  { %v1395_v37 = vsel %vm230_vm6, %v9960_v36, 0.0  ;;  %v1567_v59 = vpop.permute.xlu1 %1566 }
 0x9e2   :  { %1396 = vadd.xlane.f32.xlu0 %v1395_v37  ;;  %v1582_v1 = vsel %vm1580_vm8, %v1579_v0, %v1567_v59 }
 0x9f8   :  { %1478 = vrot.lane.b32.xlu0 %v10154_v25, %s10029_s25  ;;  %v1586_v25 = vld [vmem:[%s11856_s4] sm:$0xff] }
 0x9f9   :  { %v9572_v46 = vpack.c.bf16 %v1587_v45, %v1586_v25  ;;  %v10033_v25 = vmov 0  }
 0x9fb   :  { %9573 = vmatprep.subr.bf16.mxu1 %v9572_v46 }
 0x9fc   :  { %1564 = vrot.lane.b32.xlu0 %v1142_v8, %s11865_s1 }
 0xa6b   :  { %v1394_v38 = vpop.xlane.xlu0 %1393 }
 0xa6c   :  { %9961 = vrcp.f32 %v1394_v38  ;;  %v1742_v38 = vld [vmem:[%s11857_s6 + $0xc8] sm:$0xff] }
 0xa6f   :  { %v1397_v39 = vpop.xlane.xlu0 %1396 }
 0xa70   :  { %9963 = vrcp.f32 %v1397_v39 }
 0xa73   :  { %v1479_v40 = vpop.permute.xlu0 %1478 }
 0xa74   :  { %9353 = vmatpush3.msra.mxu0 %v1479_v40 }
 0xa75   :  { %1996 = vmatprep.subr.bf16.mxu0 %v8093_v30 }
 0xa76   :  { %v9962_v41 = vpop.eup %9961 }
 0xa77   :  { %v1399_v42 = vmul.f32 %v9962_v41, %v9958_v24  ;;  %v1565_v56 = vpop.permute.xlu0 %1564  ;;  %v1733_v24 = vld [vmem:[%s11857_s6 + $0x80] sm:$0xff] }
 0xa78   :  { %v1581_v61 = vsel %vm1580_vm8, %v1578_v57, %v1565_v56  ;;  %v8109_v37 = vcombine.high %v1733_v24, %v1741_v35  ;;  %v8108_v39 = vcombine.low %v1733_v24, %v1741_v35  ;;  %v1732_v24 = vld [vmem:[%s11857_s6 + $0x78] sm:$0xff] }
 0xa79   :  { %9350 = vmatmul.mubr.msk.f32.vlgmr.msra.gmra.mrb[16].mxu1 %vm230_vm6, %v1399_v42  ;;  %v1719_v42 = vld [vmem:[%s11857_s6 + $0x10] sm:$0xff] }
 0xa7a   :  { %v9964_v43 = vpop.eup %9963  ;;  %9575 = vmatpush3.bf16.msra.mxu1 %v9572_v46  ;;  %v1728_v46 = vld [vmem:[%s11857_s6 + $0x58] sm:$0xff] }
 0xa7b   :  { %v1401_v44 = vmul.f32 %v9964_v43, %v9960_v36  ;;  %9577 = vmatprep.subr.bf16.mxu1 %v9576_v49  ;;  %v1734_v36 = vld [vmem:[%s11857_s6 + $0x88] sm:$0xff]  ;;  %v1727_v43 = vld [vmem:[%s11857_s6 + $0x50] sm:$0xff] }
 0xa7c   :  { %v8110_v40 = vcombine.low %v1734_v36, %v1742_v38  ;;  %v8111_v41 = vcombine.high %v1734_v36, %v1742_v38  ;;  %v8097_v45 = vcombine.high %v1719_v42, %v1727_v43  ;;  %v8096_v47 = vcombine.low %v1719_v42, %v1727_v43  ;;  %v1748_v42 = vld [vmem:[%s11857_s6 + $0xf8] sm:$0xff] }
 0xa7d   :  { %9355 = vmatmul.mubr.msk.f32.vlgmr.msra.gmra.mrb[16].mxu0 %vm230_vm6, %v1401_v44  ;;  %v1720_v44 = vld [vmem:[%s11857_s6 + $0x18] sm:$0xff] }
 0xa7e   :  { %9579 = vmatpush3.bf16.msra.mxu1 %v9576_v49  ;;  %1997 = vmatpush1.bf16.msra.mxu0 %v8092_v32  ;;  %v8098_v48 = vcombine.low %v1720_v44, %v1728_v46  ;;  %v8099_v49 = vcombine.high %v1720_v44, %v1728_v46  ;;  %v1723_v32 = vld [vmem:[%s11857_s6 + $0x30] sm:$0xff] }
 0xa7f   :  { %2039 = vmatprep.subr.bf16.mxu1 %v8095_v34  ;;  %1998 = vmatprep.subr.bf16.mxu0 %v8109_v37  ;;  %v1724_v34 = vld [vmem:[%s11857_s6 + $0x38] sm:$0xff] }
 0xa80   :  { %2028 = vmatprep.mubr.bf16.mxu0 %v10033_v25  ;;  %v8107_v44 = vcombine.high %v1724_v34, %v1732_v24  ;;  %v8106_v46 = vcombine.low %v1724_v34, %v1732_v24 }
 0xa82   :  { %1999 = vmatpush1.bf16.msra.mxu0 %v8108_v39  ;;  %v1739_v39 = vld [vmem:[%s11857_s6 + $0xb0] sm:$0xff] }
 0xa83   :  { %2082 = vmatprep.subr.bf16.mxu0 %v8097_v45 }
 0xb4c   :  { %v1474_v50 = vpop.f32.mrb[16].mxu1 }
 0xb4d   :  { %1572 = vrot.lane.b32.xlu0 %v1474_v50, %s11863_s2  ;;  %v9351_v51 = vpop.f32.mrb[17].mxu1 }
 0xb4e   :  { %v10374_v51 = vsub.s32 2, %v10134_v18 }
 0xb50   :  { %v1550_v52 = vpop.f32.mrb[16].mxu0 }
 0xb51   :  { %1574 = vrot.lane.b32.xlu1 %v1550_v52, %s11863_s2  ;;  %v9356_v53 = vpop.f32.mrb[17].mxu0 }
 0xbbf   :  { %v1573_v62 = vpop.permute.xlu0 %1572 }
 0xbc0   :  { %v1584_v63 = vsel %vm1583_vm7, %v1581_v61, %v1573_v62  ;;  %v10013_v61 = vld [vmem:[%s11855_s5] sm:$0x7f] }
 0xbc1   :  { %9365 = vmatprep.mubr.msk.f32.mxu1 %vm145_vm4, %v1584_v63  ;;  %v1707_v62 = vrot.slane %v10013_v61, %v10374_v51 }
 0xbc3   :  { %v1575_v2 = vpop.permute.xlu1 %1574 }
 0xbc4   :  { %v1585_v3 = vsel %vm1583_vm7, %v1582_v1, %v1575_v2  ;;  %v1713_v1 = vrot.slane %v10013_v61, %v10377_v55  ;;  %v9683_v61 = vld [vmem:[%s11858_s8 + $0x8] sm:$0xff]  }
 0xbc5   :  { %9366 = vmatmul.mubr.msk.f32.vlgmr.msra.gmra.mrb[18].mxu1 %vm145_vm4, %v1585_v3 }
 0xbc6   :  { %2040 = vmatpush1.bf16.msra.mxu1 %v8094_v33  ;;  %2071 = vmatprep.mubr.bf16.mxu1 %v10033_v25  ;;  %v1731_v33 = vld [vmem:[%s11857_s6 + $0x70] sm:$0xff] }
 0xbc7   :  { %2041 = vmatprep.subr.bf16.mxu1 %v8111_v41  ;;  %v1740_v41 = vld [vmem:[%s11857_s6 + $0xb8] sm:$0xff]  ;;  %v8105_v43 = vcombine.high %v1723_v32, %v1731_v33  ;;  %v8104_v45 = vcombine.low %v1723_v32, %v1731_v33 }
 0xbca   :  { %2042 = vmatpush1.bf16.msra.mxu1 %v8110_v40  ;;  %v1747_v40 = vld [vmem:[%s11857_s6 + $0xf0] sm:$0xff] }
 0xbcb   :  { %2125 = vmatprep.subr.bf16.mxu1 %v8099_v49  ;;  %v9677_v49 = vld [vmem:[%s11858_s8 + $0x40] sm:$0xff]  }
 0xc98   :  { %v9367_v5 = vpop.f32.mrb[18].mxu1 }
 0xc99   :  { %v1672_v6 = vadd.f32 %v9367_v5, %v1593_v4  ;;  %v1666_v7 = vpop.f32.mrb[19].mxu1  ;;  %v1743_v5 = vld [vmem:[%s11857_s6 + $0xd0] sm:$0xff] }
 0xc9a   :  { %v1667_v8 = vadd.f32 %v1666_v7, %v1593_v4  ;;  %v1735_v4 = vld [vmem:[%s11857_s6 + $0x90] sm:$0xff]  ;;  %v1744_v7 = vld [vmem:[%s11857_s6 + $0xd8] sm:$0xff] }
 0xc9b   :  { %v1676_v9 = vadd.f32 %v1672_v6, %v10126_v15  ;;  %v1736_v6 = vld [vmem:[%s11857_s6 + $0x98] sm:$0xff] }
 0xc9c   :  { %v1675_v60 = vadd.f32 %v1667_v8, %v10124_v14 }
 0xc9d   :  { %v1680_v10 = vsel %vm145_vm4, %v1676_v9, 0.0 }
 0xc9e   :  { %1681 = vadd.xlane.f32.xlu1 %v1680_v10  ;;  %v1677_v11 = vsel %vm145_vm4, %v1675_v60, 0.0  ;;  %v1721_v10 = vld [vmem:[%s11857_s6 + $0x20] sm:$0xff] }
 0xc9f   :  { %1678 = vadd.xlane.f32.xlu0 %v1677_v11  ;;  %v1729_v11 = vld [vmem:[%s11857_s6 + $0x60] sm:$0xff] }
 0xca0   :  { %v8101_v28 = vcombine.high %v1721_v10, %v1729_v11  ;;  %v8100_v30 = vcombine.low %v1721_v10, %v1729_v11  ;;  %v9695_v10 = vld [vmem:[%s11858_s8 + $0x20] sm:$0xff]  }
 0xca1   :  { %v9696_v11 = vld [vmem:[%s11858_s8 + $0xa0] sm:$0xff]  }
 0xd2b   :  { %v1682_v12 = vpop.xlane.xlu1 %1681 }
 0xd2c   :  { %v1685_v13 = vmul.f32 0.03125, %v1682_v12  ;;  %v1679_v17 = vpop.xlane.xlu0 %1678  ;;  %v1722_v12 = vld [vmem:[%s11857_s6 + $0x28] sm:$0xff] }
 0xd2d   :  { %v1684_v21 = vmul.f32 0.03125, %v1679_v17 }
 0xd2e   :  { %v10329_v22 = vsub.f32 %v1676_v9, %v1685_v13  ;;  %v1730_v13 = vld [vmem:[%s11857_s6 + $0x68] sm:$0xff] }
 0xd2f   :  { %v1686_v20 = vsub.f32 %v1675_v60, %v1684_v21  ;;  %v8113_v21 = vcombine.high %v1735_v4, %v1743_v5  ;;  %v8103_v29 = vcombine.high %v1722_v12, %v1730_v13  ;;  %v8102_v31 = vcombine.low %v1722_v12, %v1730_v13  ;;  %v9697_v12 = vld [vmem:[%s11858_s8 + $0x68] sm:$0xff]  }
 0xd30   :  { %v1689_v15 = vmul.f32 %v10329_v22, %v10329_v22  ;;  %v9698_v13 = vld [vmem:[%s11858_s8 + $0xe8] sm:$0xff]  }
 0xd31   :  { %v1688_v23 = vmul.f32 %v1686_v20, %v1686_v20 }
 0xd32   :  { %v1693_v14 = vsel %vm145_vm4, %v1689_v15, 0.0  ;;  %v1745_v15 = vld [vmem:[%s11857_s6 + $0xe0] sm:$0xff] }
 0xd33   :  { %v1690_v26 = vsel %vm145_vm4, %v1688_v23, 0.0  ;;  %v8114_v23 = vcombine.low %v1736_v6, %v1744_v7 }
 0xd34   :  { %1691 = vadd.xlane.f32.xlu0 %v1690_v26  ;;  %v1737_v26 = vld [vmem:[%s11857_s6 + $0xa0] sm:$0xff] }
 0xd35   :  { %v8117_v35 = vcombine.high %v1737_v26, %v1745_v15  ;;  %v8116_v37 = vcombine.low %v1737_v26, %v1745_v15  ;;  %v9704_v26 = vld [vmem:[%s11858_s8 + $0xb0] sm:$0xff]   ;;  %v9705_v15 = vld [vmem:[%s11858_s8 + $0x78] sm:$0xff]  }
 0xd38   :  { %1694 = vadd.xlane.f32.xlu0 %v1693_v14  ;;  %v1738_v14 = vld [vmem:[%s11857_s6 + $0xa8] sm:$0xff] }
 0xd39   :  { %v8119_v36 = vcombine.high %v1738_v14, %v1746_v27  ;;  %v8118_v38 = vcombine.low %v1738_v14, %v1746_v27  ;;  %v9706_v14 = vld [vmem:[%s11858_s8 + $0xf8] sm:$0xff]  }
 0xd3a   :  { %v9707_v27 = vld [vmem:[%s11858_s8 + $0x38] sm:$0xff]  }
 0xdc1   :  { %v1692_v50 = vpop.xlane.xlu0 %1691 }
 0xdc2   :  { %v1696_v52 = vmul.f32 0.03125, %v1692_v50  ;;  %v9678_v50 = vld [vmem:[%s11858_s8 + $0xc0] sm:$0xff]  }
 0xdc4   :  { %v1698_v53 = vadd.f32 1e-05, %v1696_v52  ;;  %v8120_v52 = vcombine.low %v1739_v39, %v1747_v40 }
 0xdc5   :  { %v1695_v54 = vpop.xlane.xlu0 %1694 }
 0xdc6   :  { %9965 = vrsqrt.f32 %v1698_v53  ;;  %v1697_v56 = vmul.f32 0.03125, %v1695_v54  ;;  %v8122_v53 = vcombine.low %v1740_v41, %v1748_v42  ;;  %v9679_v54 = vld [vmem:[%s11858_s8] sm:$0xff]  }
 0xdc8   :  { %v1699_v57 = vadd.f32 1e-05, %v1697_v56  ;;  %v9680_v56 = vld [vmem:[%s11858_s8 + $0x80] sm:$0xff]  }
 0xdca   :  { %9967 = vrsqrt.f32 %v1699_v57  ;;  %v9681_v57 = vld [vmem:[%s11858_s8 + $0x48] sm:$0xff]  }
 0xdd0   :  { %v9966_v59 = vpop.eup %9965 }
 0xdd1   :  { %v1702_v63 = vmul.f32 %v9966_v59, %v1686_v20  ;;  %v8112_v20 = vcombine.low %v1735_v4, %v1743_v5  ;;  %v9682_v59 = vld [vmem:[%s11858_s8 + $0xc8] sm:$0xff]   ;;  %v9690_v4 = vld [vmem:[%s11858_s8 + $0xd8] sm:$0xff]  }
 0xdd2   :  { %v9691_v5 = vld [vmem:[%s11858_s8 + $0x18] sm:$0xff]  }
 0xdd3   :  { %v1708_v2 = vmul.f32 %v1707_v62, %v1702_v63  ;;  %v9685_v63 = vld [vmem:[%s11858_s8 + $0x50] sm:$0xff]  }
 0xdd4   :  { %v9968_v0 = vpop.eup %9967 }
 0xdd5   :  { %v1703_v3 = vmul.f32 %v9968_v0, %v10329_v22  ;;  %v10397_v9 = vadd.f32 %v1713_v1, %v1708_v2  ;;  %v8115_v22 = vcombine.high %v1736_v6, %v1744_v7  ;;  %v9686_v0 = vld [vmem:[%s11858_s8 + $0xd0] sm:$0xff]   ;;  %v9692_v6 = vld [vmem:[%s11858_s8 + $0x98] sm:$0xff]   ;;  %v9693_v7 = vld [vmem:[%s11858_s8 + $0x60] sm:$0xff]  }
 0xdd6   :  { %v9688_v2 = vld [vmem:[%s11858_s8 + $0x90] sm:$0xff]  }
 0xdd7   :  { %v1709_v8 = vmul.f32 %v1707_v62, %v1703_v3  ;;  %v9684_v62 = vld [vmem:[%s11858_s8 + $0x88] sm:$0xff]   ;;  %v9689_v3 = vld [vmem:[%s11858_s8 + $0x58] sm:$0xff]  }
 0xdd9   :  { %v10399_v60 = vadd.f32 %v1713_v1, %v1709_v8  ;;  %v9687_v1 = vld [vmem:[%s11858_s8 + $0x10] sm:$0xff]   ;;  %v9694_v8 = vld [vmem:[%s11858_s8 + $0xe0] sm:$0xff]  }
 0xddb   :  { %v10415_v17 = vpack.c.bf16 %v10399_v60, %v10397_v9 }
 0xddd   :  { %8124 = vmatmul.mubr.msk.bf16.vlgmr.msra.gmra.mrb[20].mxu0 %vm145_vm4, %v10415_v17  ;;  %8125 = vmatmul.mubr.msk.bf16.vlgmr.msra.gmra.mrb[20].mxu1 %vm145_vm4, %v10415_v17 }
 0xdde   :  { %2083 = vmatpush1.bf16.msra.mxu0 %v8096_v47  ;;  %2126 = vmatpush1.bf16.msra.mxu1 %v8098_v48  ;;  %v8121_v47 = vcombine.high %v1739_v39, %v1747_v40  ;;  %v8123_v48 = vcombine.high %v1740_v41, %v1748_v42  ;;  %v10591_v39 = vsub.s32 5, %v10134_v18  ;;  %v10594_v40 = vsub.s32 7, %v10134_v18 }
 0xddf   :  { %2084 = vmatprep.subr.bf16.mxu0 %v8113_v21  ;;  %2127 = vmatprep.subr.bf16.mxu1 %v8115_v22  ;;  %v9700_v21 = vld [vmem:[%s11858_s8 + $0xa8] sm:$0xff]   ;;  %v9701_v22 = vld [vmem:[%s11858_s8 + $0x70] sm:$0xff]  }
 0xde0   :  { %2114 = vmatprep.mubr.bf16.mxu0 %v10033_v25  ;;  %2157 = vmatprep.mubr.bf16.mxu1 %v10033_v25 }
 0xde2   :  { %2085 = vmatpush1.bf16.msra.mxu0 %v8112_v20  ;;  %2128 = vmatpush1.bf16.msra.mxu1 %v8114_v23  ;;  %v9702_v20 = vld [vmem:[%s11858_s8 + $0xf0] sm:$0xff]  }
 0xde3   :  { %2168 = vmatprep.subr.bf16.mxu0 %v8101_v28  ;;  %2211 = vmatprep.subr.bf16.mxu1 %v8103_v29  ;;  %v9703_v23 = vld [vmem:[%s11858_s8 + $0x30] sm:$0xff]   ;;  %v9708_v28 = vld [vmem:[%s11858_s8 + $0xb8] sm:$0xff]   ;;  %v9709_v29 = vld [vmem:[%s11858_s8 + $0x140] sm:$0xff]  }
 0xde5   :  { %8126 = vmatmul.mubr.msk.bf16.vlgmr.msra.gmra.mrb[24].mxu0 %vm145_vm4, %v10415_v17  ;;  %8127 = vmatmul.mubr.msk.bf16.vlgmr.msra.gmra.mrb[24].mxu1 %vm145_vm4, %v10415_v17 }
 0xde6   :  { %2169 = vmatpush1.bf16.msra.mxu0 %v8100_v30  ;;  %2212 = vmatpush1.bf16.msra.mxu1 %v8102_v31  ;;  %v9710_v30 = vld [vmem:[%s11858_s8 + $0x1c0] sm:$0xff]  }
 0xde7   :  { %2170 = vmatprep.subr.bf16.mxu0 %v8117_v35  ;;  %2213 = vmatprep.subr.bf16.mxu1 %v8119_v36  ;;  %v1749_v31 = vld [vmem:[%s11859_s7] sm:$0xff]  ;;  %v10585_v35 = vsub.s32 4, %v10134_v18  ;;  %v10588_v36 = vsub.s32 6, %v10134_v18 }
 0xde8   :  { %2200 = vmatprep.mubr.bf16.mxu0 %v10033_v25  ;;  %2243 = vmatprep.mubr.bf16.mxu1 %v10033_v25  ;;  %v1756_v32 = vrot.slane %v1749_v31, %v10141_v19  ;;  %v1764_v33 = vrot.slane %v1749_v31, %v10374_v51  ;;  %v1760_v34 = vrot.slane %v1749_v31, %v10321_v58 }
 0xde9   :  { %v1768_v24 = vrot.slane %v1749_v31, %v10377_v55  ;;  %v1776_v18 = vrot.slane %v1749_v31, %v10591_v39 }
 0xdea   :  { %2171 = vmatpush1.bf16.msra.mxu0 %v8116_v37  ;;  %2214 = vmatpush1.bf16.msra.mxu1 %v8118_v38 }
 0xdeb   :  { %2254 = vmatprep.subr.bf16.mxu0 %v8105_v43  ;;  %2297 = vmatprep.subr.bf16.mxu1 %v8107_v44 }
 0xded   :  { %8128 = vmatmul.mubr.msk.bf16.vlgmr.msra.gmra.mrb[28].mxu0 %vm145_vm4, %v10415_v17  ;;  %8129 = vmatmul.mubr.msk.bf16.vlgmr.msra.gmra.mrb[28].mxu1 %vm145_vm4, %v10415_v17 }
 0xdee   :  { %2255 = vmatpush1.bf16.msra.mxu0 %v8104_v45  ;;  %2298 = vmatpush1.bf16.msra.mxu1 %v8106_v46 }
 0xdef   :  { %2256 = vmatprep.subr.bf16.mxu0 %v8121_v47  ;;  %2299 = vmatprep.subr.bf16.mxu1 %v8123_v48 }
 0xdf0   :  { %2286 = vmatprep.mubr.bf16.mxu0 %v10033_v25  ;;  %2329 = vmatprep.mubr.bf16.mxu1 %v10033_v25 }
 0xdf2   :  { %2257 = vmatpush1.bf16.msra.mxu0 %v8120_v52  ;;  %2300 = vmatpush1.bf16.msra.mxu1 %v8122_v53 }
 0xdf3   :  { %8823 = vmatprep.subr.bf16.mxu0 %v9677_v49  ;;  %8845 = vmatprep.subr.bf16.mxu1 %v9678_v50 }
 0xdf5   :  { %8130 = vmatmul.mubr.msk.bf16.vlgmr.msra.gmra.mrb[32].mxu0 %vm145_vm4, %v10415_v17  ;;  %8131 = vmatmul.mubr.msk.bf16.vlgmr.msra.gmra.mrb[32].mxu1 %vm145_vm4, %v10415_v17  ;;  %v9699_v17 = vld [vmem:[%s11858_s8 + $0x28] sm:$0xff]  }
 0xdf6   :  { %8824 = vmatpush3.bf16.msra.mxu0 %v9679_v54  ;;  %8846 = vmatpush3.bf16.msra.mxu1 %v9680_v56  ;;  %v1772_v54 = vrot.slane %v1749_v31, %v10585_v35  ;;  %v1780_v56 = vrot.slane %v1749_v31, %v10588_v36 }
 0xdf7   :  { %8825 = vmatprep.subr.bf16.mxu0 %v9681_v57  ;;  %8847 = vmatprep.subr.bf16.mxu1 %v9682_v59 }
 0xdfa   :  { %8826 = vmatpush3.bf16.msra.mxu0 %v9683_v61  ;;  %8848 = vmatpush3.bf16.msra.mxu1 %v9684_v62  ;;  %v1784_v61 = vrot.slane %v1749_v31, %v10594_v40 }
 0xdfb   :  { %8827 = vmatprep.subr.bf16.mxu0 %v9685_v63  ;;  %8849 = vmatprep.subr.bf16.mxu1 %v9686_v0 }
 0xdfe   :  { %8828 = vmatpush3.bf16.msra.mxu0 %v9687_v1  ;;  %8850 = vmatpush3.bf16.msra.mxu1 %v9688_v2 }
 0xdff   :  { %8829 = vmatprep.subr.bf16.mxu0 %v9689_v3  ;;  %8851 = vmatprep.subr.bf16.mxu1 %v9690_v4 }
 0xe02   :  { %8830 = vmatpush3.bf16.msra.mxu0 %v9691_v5  ;;  %8852 = vmatpush3.bf16.msra.mxu1 %v9692_v6  ;;  %v10603_v6 = vld [vmem:[%s11859_s7 + $0x8] sm:$0xff] }
 0xe03   :  { %8831 = vmatprep.subr.bf16.mxu0 %v9693_v7  ;;  %8853 = vmatprep.subr.bf16.mxu1 %v9694_v8 }
 0xe06   :  { %8832 = vmatpush3.bf16.msra.mxu0 %v9695_v10  ;;  %8854 = vmatpush3.bf16.msra.mxu1 %v9696_v11 }
 0xe07   :  { %8833 = vmatprep.subr.bf16.mxu0 %v9697_v12  ;;  %8855 = vmatprep.subr.bf16.mxu1 %v9698_v13 }
 0xe0a   :  { %8834 = vmatpush3.bf16.msra.mxu0 %v9699_v17  ;;  %8856 = vmatpush3.bf16.msra.mxu1 %v9700_v21  ;;  %v9711_v17 = vld [vmem:[%s11858_s8 + $0x100] sm:$0xff]  }
 0xe0b   :  { %8835 = vmatprep.subr.bf16.mxu0 %v9701_v22  ;;  %8857 = vmatprep.subr.bf16.mxu1 %v9702_v20  ;;  %v9712_v21 = vld [vmem:[%s11858_s8 + $0x180] sm:$0xff]  }
 0xe0e   :  { %8836 = vmatpush3.bf16.msra.mxu0 %v9703_v23  ;;  %8858 = vmatpush3.bf16.msra.mxu1 %v9704_v26 }
 0xe0f   :  { %8837 = vmatprep.subr.bf16.mxu0 %v9705_v15  ;;  %8859 = vmatprep.subr.bf16.mxu1 %v9706_v14  ;;  %v9713_v15 = vld [vmem:[%s11858_s8 + $0x148] sm:$0xff]  }
 0xe10   :  { %v9714_v14 = vld [vmem:[%s11858_s8 + $0x1c8] sm:$0xff]  }
 0xe12   :  { %8838 = vmatpush3.bf16.msra.mxu0 %v9707_v27  ;;  %8860 = vmatpush3.bf16.msra.mxu1 %v9708_v28  ;;  %v1788_v27 = vrot.slane %v10603_v6, %v10141_v19 }
 0xe13   :  { %8867 = vmatprep.subr.bf16.mxu0 %v9709_v29  ;;  %8889 = vmatprep.subr.bf16.mxu1 %v9710_v30 }
 0xeb0   :  { %v2030_v37 = vpop.f32.mrb[20].mxu0  ;;  %v2073_v38 = vpop.f32.mrb[20].mxu1 }
 0xeb1   :  { %v2031_v41 = vadd.f32 %v2030_v37, %v1756_v32  ;;  %v2074_v42 = vadd.f32 %v2073_v38, %v1764_v33  ;;  %v2032_v43 = vpop.f32.mrb[21].mxu0  ;;  %v2075_v44 = vpop.f32.mrb[21].mxu1  ;;  %v1792_v38 = vrot.slane %v10603_v6, %v10321_v58 }
 0xeb2   :  { %v2033_v45 = vadd.f32 %v2032_v43, %v1760_v34  ;;  %v2076_v46 = vadd.f32 %v2075_v44, %v1768_v24  ;;  %v2034_v47 = vpop.f32.mrb[22].mxu0  ;;  %v2077_v48 = vpop.f32.mrb[22].mxu1  ;;  %v9715_v43 = vld [vmem:[%s11858_s8 + $0x108] sm:$0xff]  }
 0xeb3   :  { %v2035_v49 = vadd.f32 %v2034_v47, %v1756_v32  ;;  %v2078_v50 = vadd.f32 %v2077_v48, %v1764_v33  ;;  %v2036_v52 = vpop.f32.mrb[23].mxu0  ;;  %v2079_v53 = vpop.f32.mrb[23].mxu1  ;;  %v2340_v62 = vmax.f32 %v2031_v41, 0.0  ;;  %v2342_v63 = vmax.f32 %v2074_v42, 0.0  ;;  %v9716_v44 = vld [vmem:[%s11858_s8 + $0x188] sm:$0xff]  }
 0xeb4   :  { %v2037_v57 = vadd.f32 %v2036_v52, %v1760_v34  ;;  %v2080_v59 = vadd.f32 %v2079_v53, %v1768_v24  ;;  %v2341_v2 = vmax.f32 %v2033_v45, 0.0  ;;  %v2343_v3 = vmax.f32 %v2076_v46, 0.0  ;;  %v9718_v52 = vld [vmem:[%s11858_s8 + $0x1d0] sm:$0xff]  }
 0xeb5   :  { %v2356_v0 = vmax.f32 %v2035_v49, 0.0  ;;  %v2358_v1 = vmax.f32 %v2078_v50, 0.0  ;;  %v1796_v32 = vrot.slane %v10603_v6, %v10374_v51  ;;  %v1800_v45 = vrot.slane %v10603_v6, %v10377_v55  ;;  %v9717_v50 = vld [vmem:[%s11858_s8 + $0x150] sm:$0xff]  }
 0xeb6   :  { %v2357_v4 = vmax.f32 %v2037_v57, 0.0  ;;  %v2359_v5 = vmax.f32 %v2080_v59, 0.0 }
 0xeb7   :  { %v2372_v7 = vpack.c.bf16 %v2356_v0, %v2340_v62  ;;  %v2374_v8 = vpack.c.bf16 %v2358_v1, %v2342_v63  ;;  %v9719_v1 = vld [vmem:[%s11858_s8 + $0x110] sm:$0xff]  }
 0xeb8   :  { %v2373_v10 = vpack.c.bf16 %v2357_v4, %v2341_v2  ;;  %v2375_v11 = vpack.c.bf16 %v2359_v5, %v2343_v3  ;;  %v2116_v12 = vpop.f32.mrb[24].mxu0  ;;  %v2159_v13 = vpop.f32.mrb[24].mxu1  ;;  %v9720_v2 = vld [vmem:[%s11858_s8 + $0x190] sm:$0xff]  }
 0xeb9   :  { %v2117_v22 = vadd.f32 %v2116_v12, %v1772_v54  ;;  %v2160_v20 = vadd.f32 %v2159_v13, %v1780_v56  ;;  %v2118_v23 = vpop.f32.mrb[25].mxu0  ;;  %v2161_v26 = vpop.f32.mrb[25].mxu1 }
 0xeba   :  { %v2119_v28 = vadd.f32 %v2118_v23, %v1776_v18  ;;  %v2162_v29 = vadd.f32 %v2161_v26, %v1784_v61  ;;  %v2120_v30 = vpop.f32.mrb[26].mxu0  ;;  %v2163_v31 = vpop.f32.mrb[26].mxu1  ;;  %3448 = vmatprep.mubr.bf16.mxu0 %v2373_v10  ;;  %3489 = vmatprep.mubr.bf16.mxu1 %v2375_v11  ;;  %v9722_v10 = vld [vmem:[%s11858_s8 + $0x1d8] sm:$0xff]  }
 0xebb   :  { %v2121_v33 = vadd.f32 %v2120_v30, %v1772_v54  ;;  %v2164_v34 = vadd.f32 %v2163_v31, %v1780_v56  ;;  %v2122_v24 = vpop.f32.mrb[27].mxu0  ;;  %v2165_v37 = vpop.f32.mrb[27].mxu1  ;;  %3449 = vmatmul.mubr.bf16.vlgmr.msra.gmra.mrb[36].mxu0 %v2372_v7  ;;  %3490 = vmatmul.mubr.bf16.vlgmr.msra.gmra.mrb[36].mxu1 %v2374_v8  ;;  %v2344_v46 = vmax.f32 %v2117_v22, 0.0  ;;  %v2346_v47 = vmax.f32 %v2160_v20, 0.0  ;;  %v9721_v8 = vld [vmem:[%s11858_s8 + $0x158] sm:$0xff]  }
 0xebc   :  { %v2123_v41 = vadd.f32 %v2122_v24, %v1776_v18  ;;  %v2166_v42 = vadd.f32 %v2165_v37, %v1784_v61  ;;  %8868 = vmatpush3.bf16.msra.mxu0 %v9711_v17  ;;  %8890 = vmatpush3.bf16.msra.mxu1 %v9712_v21  ;;  %v2345_v53 = vmax.f32 %v2119_v28, 0.0  ;;  %v2347_v54 = vmax.f32 %v2162_v29, 0.0  ;;  %v9723_v30 = vld [vmem:[%s11858_s8 + $0x118] sm:$0xff]   ;;  %v9725_v37 = vld [vmem:[%s11858_s8 + $0x160] sm:$0xff]  }
 0xebd   :  { %v2360_v48 = vmax.f32 %v2121_v33, 0.0  ;;  %v2362_v49 = vmax.f32 %v2164_v34, 0.0  ;;  %8869 = vmatprep.subr.bf16.mxu0 %v9713_v15  ;;  %8891 = vmatprep.subr.bf16.mxu1 %v9714_v14  ;;  %v1804_v21 = vrot.slane %v10603_v6, %v10585_v35  ;;  %v1812_v15 = vrot.slane %v10603_v6, %v10588_v36 }
 0xebe   :  { %v2361_v56 = vmax.f32 %v2123_v41, 0.0  ;;  %v2363_v57 = vmax.f32 %v2166_v42, 0.0  ;;  %v1808_v14 = vrot.slane %v10603_v6, %v10591_v39  ;;  %v1816_v31 = vrot.slane %v10603_v6, %v10594_v40 }
 0xebf   :  { %v10637_v59 = vpack.c.bf16 %v2360_v48, %v2344_v46  ;;  %v10639_v18 = vpack.c.bf16 %v2362_v49, %v2346_v47 }
 0xec0   :  { %v2377_v61 = vpack.c.bf16 %v2361_v56, %v2345_v53  ;;  %v2379_v62 = vpack.c.bf16 %v2363_v57, %v2347_v54  ;;  %8870 = vmatpush3.bf16.msra.mxu0 %v9715_v43  ;;  %8892 = vmatpush3.bf16.msra.mxu1 %v9716_v44  ;;  %v2202_v63 = vpop.f32.mrb[28].mxu0  ;;  %v2245_v0 = vpop.f32.mrb[28].mxu1 }
 0xec1   :  { %v2203_v3 = vadd.f32 %v2202_v63, %v1788_v27  ;;  %v2246_v4 = vadd.f32 %v2245_v0, %v1796_v32  ;;  %v2204_v5 = vpop.f32.mrb[29].mxu0  ;;  %v2247_v7 = vpop.f32.mrb[29].mxu1  ;;  %8871 = vmatprep.subr.bf16.mxu0 %v9717_v50  ;;  %8893 = vmatprep.subr.bf16.mxu1 %v9718_v52  ;;  %v9727_v50 = vld [vmem:[%s11858_s8 + $0x120] sm:$0xff]  }
 0xec2   :  { %v2205_v11 = vadd.f32 %v2204_v5, %v1792_v38  ;;  %v2248_v12 = vadd.f32 %v2247_v7, %v1800_v45  ;;  %v2206_v13 = vpop.f32.mrb[30].mxu0  ;;  %v2249_v17 = vpop.f32.mrb[30].mxu1  ;;  %3530 = vmatprep.mubr.bf16.mxu0 %v2377_v61  ;;  %3571 = vmatprep.mubr.bf16.mxu1 %v2379_v62  ;;  %v9728_v52 = vld [vmem:[%s11858_s8 + $0x1a0] sm:$0xff]   ;;  %v9729_v61 = vld [vmem:[%s11858_s8 + $0x168] sm:$0xff]  }
 0xec3   :  { %v2207_v22 = vadd.f32 %v2206_v13, %v1788_v27  ;;  %v2250_v20 = vadd.f32 %v2249_v17, %v1796_v32  ;;  %v2208_v23 = vpop.f32.mrb[31].mxu0  ;;  %v2251_v26 = vpop.f32.mrb[31].mxu1  ;;  %v9724_v27 = vld [vmem:[%s11858_s8 + $0x198] sm:$0xff]   ;;  %v2348_v32 = vmax.f32 %v2203_v3, 0.0  ;;  %v2350_v33 = vmax.f32 %v2246_v4, 0.0  ;;  %v9730_v62 = vld [vmem:[%s11858_s8 + $0x1e8] sm:$0xff]  }
 0xec4   :  { %v2209_v28 = vadd.f32 %v2208_v23, %v1792_v38  ;;  %v2252_v29 = vadd.f32 %v2251_v26, %v1800_v45  ;;  %8872 = vmatpush3.bf16.msra.mxu0 %v9719_v1  ;;  %8894 = vmatpush3.bf16.msra.mxu1 %v9720_v2  ;;  %v9726_v38 = vld [vmem:[%s11858_s8 + $0x1e0] sm:$0xff]   ;;  %v2349_v41 = vmax.f32 %v2205_v11, 0.0  ;;  %v2351_v42 = vmax.f32 %v2248_v12, 0.0  ;;  %v9731_v11 = vld [vmem:[%s11858_s8 + $0x128] sm:$0xff]   ;;  %v9734_v23 = vld [vmem:[%s11858_s8 + $0x1f0] sm:$0xff]  }
 0xec5   :  { %v2364_v34 = vmax.f32 %v2207_v22, 0.0  ;;  %v2366_v24 = vmax.f32 %v2250_v20, 0.0  ;;  %8873 = vmatprep.subr.bf16.mxu0 %v9721_v8  ;;  %8895 = vmatprep.subr.bf16.mxu1 %v9722_v10  ;;  %v9732_v12 = vld [vmem:[%s11858_s8 + $0x1a8] sm:$0xff]  }
 0xec6   :  { %v2365_v43 = vmax.f32 %v2209_v28, 0.0  ;;  %v2367_v44 = vmax.f32 %v2252_v29, 0.0 }
 0xec7   :  { %v10673_v45 = vpack.c.bf16 %v2364_v34, %v2348_v32  ;;  %v10675_v6 = vpack.c.bf16 %v2366_v24, %v2350_v33  ;;  %v9735_v32 = vld [vmem:[%s11858_s8 + $0x130] sm:$0xff]   ;;  %v9737_v34 = vld [vmem:[%s11858_s8 + $0x178] sm:$0xff]  }
 0xec8   :  { %v10677_v46 = vpack.c.bf16 %v2365_v43, %v2349_v41  ;;  %v10679_v47 = vpack.c.bf16 %v2367_v44, %v2351_v42  ;;  %8874 = vmatpush3.bf16.msra.mxu0 %v9723_v30  ;;  %8896 = vmatpush3.bf16.msra.mxu1 %v9724_v27  ;;  %v2288_v48 = vpop.f32.mrb[32].mxu0  ;;  %v2331_v49 = vpop.f32.mrb[32].mxu1  ;;  %v9736_v33 = vld [vmem:[%s11858_s8 + $0x1b0] sm:$0xff]   ;;  %v9738_v24 = vld [vmem:[%s11858_s8 + $0x1f8] sm:$0xff]   ;;  %v9741_v41 = vld [vmem:[%s11858_s8 + $0x240] sm:$0xff]  }
 0xec9   :  { %v2289_v53 = vadd.f32 %v2288_v48, %v1804_v21  ;;  %v2332_v54 = vadd.f32 %v2331_v49, %v1812_v15  ;;  %v2290_v56 = vpop.f32.mrb[33].mxu0  ;;  %v2333_v57 = vpop.f32.mrb[33].mxu1  ;;  %8875 = vmatprep.subr.bf16.mxu0 %v9725_v37  ;;  %8897 = vmatprep.subr.bf16.mxu1 %v9726_v38  ;;  %v9739_v37 = vld [vmem:[%s11858_s8 + $0x138] sm:$0xff]   ;;  %v9742_v42 = vld [vmem:[%s11858_s8 + $0x2c0] sm:$0xff]   ;;  %v9745_v48 = vld [vmem:[%s11858_s8 + $0x248] sm:$0xff]  }
 0xeca   :  { %v2291_v63 = vadd.f32 %v2290_v56, %v1808_v14  ;;  %v2334_v0 = vadd.f32 %v2333_v57, %v1816_v31  ;;  %v2292_v1 = vpop.f32.mrb[34].mxu0  ;;  %v2335_v2 = vpop.f32.mrb[34].mxu1  ;;  %v9740_v38 = vld [vmem:[%s11858_s8 + $0x1b8] sm:$0xff]   ;;  %v9743_v43 = vld [vmem:[%s11858_s8 + $0x200] sm:$0xff]   ;;  %v9746_v49 = vld [vmem:[%s11858_s8 + $0x2c8] sm:$0xff]  }
 0xecb   :  { %v2293_v3 = vadd.f32 %v2292_v1, %v1804_v21  ;;  %v2336_v4 = vadd.f32 %v2335_v2, %v1812_v15  ;;  %v2294_v5 = vpop.f32.mrb[35].mxu0  ;;  %v2337_v7 = vpop.f32.mrb[35].mxu1  ;;  %v2352_v13 = vmax.f32 %v2289_v53, 0.0  ;;  %v2354_v17 = vmax.f32 %v2332_v54, 0.0  ;;  %v9733_v21 = vld [vmem:[%s11858_s8 + $0x170] sm:$0xff]   ;;  %v9744_v44 = vld [vmem:[%s11858_s8 + $0x280] sm:$0xff]  }
 0xecc   :  { %v2295_v8 = vadd.f32 %v2294_v5, %v1808_v14  ;;  %v2338_v10 = vadd.f32 %v2337_v7, %v1816_v31  ;;  %8876 = vmatpush3.bf16.msra.mxu0 %v9727_v50  ;;  %8898 = vmatpush3.bf16.msra.mxu1 %v9728_v52  ;;  %v2353_v26 = vmax.f32 %v2291_v63, 0.0  ;;  %v2355_v15 = vmax.f32 %v2334_v0, 0.0  ;;  %v9747_v50 = vld [vmem:[%s11858_s8 + $0x208] sm:$0xff]   ;;  %v9753_v53 = vld [vmem:[%s11858_s8 + $0x258] sm:$0xff]   ;;  %v9759_v63 = vld [vmem:[%s11858_s8 + $0x220] sm:$0xff]  }
 0xecd   :  { %v2368_v22 = vmax.f32 %v2293_v3, 0.0  ;;  %v2370_v20 = vmax.f32 %v2336_v4, 0.0  ;;  %8877 = vmatprep.subr.bf16.mxu0 %v9729_v61  ;;  %8899 = vmatprep.subr.bf16.mxu1 %v9730_v62  ;;  %v9748_v52 = vld [vmem:[%s11858_s8 + $0x288] sm:$0xff]   ;;  %v9754_v54 = vld [vmem:[%s11858_s8 + $0x2d8] sm:$0xff]   ;;  %v9757_v61 = vld [vmem:[%s11858_s8 + $0x260] sm:$0xff]  }
 0xece   :  { %v2369_v14 = vmax.f32 %v2295_v8, 0.0  ;;  %v2371_v28 = vmax.f32 %v2338_v10, 0.0  ;;  %v9755_v56 = vld [vmem:[%s11858_s8 + $0x218] sm:$0xff]   ;;  %v9758_v62 = vld [vmem:[%s11858_s8 + $0x2e0] sm:$0xff]   ;;  %v9761_v1 = vld [vmem:[%s11858_s8 + $0x268] sm:$0xff]  }
 0xecf   :  { %v10705_v29 = vpack.c.bf16 %v2368_v22, %v2352_v13  ;;  %v10707_v30 = vpack.c.bf16 %v2370_v20, %v2354_v17  ;;  %v9756_v57 = vld [vmem:[%s11858_s8 + $0x298] sm:$0xff]   ;;  %v9760_v0 = vld [vmem:[%s11858_s8 + $0x2a0] sm:$0xff]   ;;  %v9762_v2 = vld [vmem:[%s11858_s8 + $0x2e8] sm:$0xff]  }
 0xed0   :  { %v10709_v27 = vpack.c.bf16 %v2369_v14, %v2353_v26  ;;  %v10711_v31 = vpack.c.bf16 %v2371_v28, %v2355_v15  ;;  %8878 = vmatpush3.bf16.msra.mxu0 %v9731_v11  ;;  %8900 = vmatpush3.bf16.msra.mxu1 %v9732_v12  ;;  %v9763_v3 = vld [vmem:[%s11858_s8 + $0x228] sm:$0xff]   ;;  %v9765_v5 = vld [vmem:[%s11858_s8 + $0x270] sm:$0xff]   ;;  %v9769_v11 = vld [vmem:[%s11858_s8 + $0x278] sm:$0xff]  }
 0xed1   :  { %8879 = vmatprep.subr.bf16.mxu0 %v9733_v21  ;;  %8901 = vmatprep.subr.bf16.mxu1 %v9734_v23  ;;  %v9764_v4 = vld [vmem:[%s11858_s8 + $0x2a8] sm:$0xff]   ;;  %v9766_v7 = vld [vmem:[%s11858_s8 + $0x2f0] sm:$0xff]   ;;  %v9770_v12 = vld [vmem:[%s11858_s8 + $0x2f8] sm:$0xff]  }
 0xed2   :  { %v9767_v8 = vld [vmem:[%s11858_s8 + $0x230] sm:$0xff]   ;;  %v9771_v13 = vld [vmem:[%s11858_s8 + $0x238] sm:$0xff]   ;;  %v9773_v22 = vld [vmem:[%s11858_s8 + $0x340] sm:$0xff]  }
 0xed3   :  { %v9768_v10 = vld [vmem:[%s11858_s8 + $0x2b0] sm:$0xff]   ;;  %v9772_v17 = vld [vmem:[%s11858_s8 + $0x2b8] sm:$0xff]   ;;  %v9774_v20 = vld [vmem:[%s11858_s8 + $0x3c0] sm:$0xff]  }
 0xed4   :  { %8880 = vmatpush3.bf16.msra.mxu0 %v9735_v32  ;;  %8902 = vmatpush3.bf16.msra.mxu1 %v9736_v33  ;;  %v9775_v21 = vld [vmem:[%s11858_s8 + $0x300] sm:$0xff]   ;;  %v9777_v26 = vld [vmem:[%s11858_s8 + $0x348] sm:$0xff]   ;;  %v9784_v32 = vld [vmem:[%s11858_s8 + $0x390] sm:$0xff]  }
 0xed5   :  { %8881 = vmatprep.subr.bf16.mxu0 %v9737_v34  ;;  %8903 = vmatprep.subr.bf16.mxu1 %v9738_v24  ;;  %v9776_v23 = vld [vmem:[%s11858_s8 + $0x380] sm:$0xff]   ;;  %v9778_v15 = vld [vmem:[%s11858_s8 + $0x3c8] sm:$0xff]   ;;  %v9786_v33 = vld [vmem:[%s11858_s8 + $0x3d8] sm:$0xff]  }
 0xed6   :  { %v9779_v14 = vld [vmem:[%s11858_s8 + $0x308] sm:$0xff]   ;;  %v9787_v34 = vld [vmem:[%s11858_s8 + $0x318] sm:$0xff]  }
 0xed7   :  { %v9780_v28 = vld [vmem:[%s11858_s8 + $0x388] sm:$0xff]   ;;  %v9788_v24 = vld [vmem:[%s11858_s8 + $0x398] sm:$0xff]  }
 0xed8   :  { %8882 = vmatpush3.bf16.msra.mxu0 %v9739_v37  ;;  %8904 = vmatpush3.bf16.msra.mxu1 %v9740_v38  ;;  %v9789_v37 = vld [vmem:[%s11858_s8 + $0x360] sm:$0xff]  }
 0xed9   :  { %8911 = vmatprep.subr.bf16.mxu0 %v9741_v41  ;;  %8933 = vmatprep.subr.bf16.mxu1 %v9742_v42  ;;  %v9790_v38 = vld [vmem:[%s11858_s8 + $0x3e0] sm:$0xff]  }
 0xeda   :  { %v9791_v41 = vld [vmem:[%s11858_s8 + $0x320] sm:$0xff]  }
 0xedb   :  { %3531 = vmatmul.mubr.bf16.vlgmr.msra.gmra.mrb[40].mxu0 %v10637_v59  ;;  %3572 = vmatmul.mubr.bf16.vlgmr.msra.gmra.mrb[40].mxu1 %v10639_v18  ;;  %v9749_v59 = vld [vmem:[%s11858_s8 + $0x250] sm:$0xff]   ;;  %v9792_v42 = vld [vmem:[%s11858_s8 + $0x3a0] sm:$0xff]  }
 0xedc   :  { %8912 = vmatpush3.bf16.msra.mxu0 %v9743_v43  ;;  %3612 = vmatprep.mubr.bf16.mxu0 %v10677_v46  ;;  %v9750_v18 = vld [vmem:[%s11858_s8 + $0x2d0] sm:$0xff]   ;;  %v9793_v43 = vld [vmem:[%s11858_s8 + $0x368] sm:$0xff]  }
 0xedd   :  { %8934 = vmatpush3.bf16.msra.mxu1 %v9744_v44  ;;  %3653 = vmatprep.mubr.bf16.mxu1 %v10679_v47  ;;  %v9751_v46 = vld [vmem:[%s11858_s8 + $0x210] sm:$0xff]   ;;  %v9794_v44 = vld [vmem:[%s11858_s8 + $0x3e8] sm:$0xff]  }
 0xede   :  { %8913 = vmatprep.subr.bf16.mxu0 %v9745_v48  ;;  %8935 = vmatprep.subr.bf16.mxu1 %v9746_v49  ;;  %v9752_v47 = vld [vmem:[%s11858_s8 + $0x290] sm:$0xff]   ;;  %v9795_v48 = vld [vmem:[%s11858_s8 + $0x328] sm:$0xff]  }
 0xedf   :  { %v9796_v49 = vld [vmem:[%s11858_s8 + $0x3a8] sm:$0xff]  }
 0xee0   :  { %8914 = vmatpush3.bf16.msra.mxu0 %v9747_v50  ;;  %v9797_v50 = vld [vmem:[%s11858_s8 + $0x370] sm:$0xff]  }
 0xee1   :  { %8936 = vmatpush3.bf16.msra.mxu1 %v9748_v52  ;;  %8915 = vmatprep.subr.bf16.mxu0 %v9749_v59  ;;  %v9798_v52 = vld [vmem:[%s11858_s8 + $0x3f0] sm:$0xff]  }
 0xee2   :  { %8937 = vmatprep.subr.bf16.mxu1 %v9750_v18  ;;  %v9799_v59 = vld [vmem:[%s11858_s8 + $0x330] sm:$0xff]  }
 0xee3   :  { %v9800_v18 = vld [vmem:[%s11858_s8 + $0x3b0] sm:$0xff]  }
 0xee4   :  { %8916 = vmatpush3.bf16.msra.mxu0 %v9751_v46  ;;  %v9801_v46 = vld [vmem:[%s11858_s8 + $0x378] sm:$0xff]  }
 0xee5   :  { %8938 = vmatpush3.bf16.msra.mxu1 %v9752_v47  ;;  %8917 = vmatprep.subr.bf16.mxu0 %v9753_v53  ;;  %v9802_v47 = vld [vmem:[%s11858_s8 + $0x3f8] sm:$0xff]  }
 0xee6   :  { %8939 = vmatprep.subr.bf16.mxu1 %v9754_v54  ;;  %v9803_v53 = vld [vmem:[%s11858_s8 + $0x338] sm:$0xff]  }
 0xee7   :  { %v9804_v54 = vld [vmem:[%s11858_s8 + $0x3b8] sm:$0xff]  }
 0xee8   :  { %8918 = vmatpush3.bf16.msra.mxu0 %v9755_v56 }
 0xee9   :  { %8940 = vmatpush3.bf16.msra.mxu1 %v9756_v57  ;;  %8919 = vmatprep.subr.bf16.mxu0 %v9757_v61  ;;  %v10939_v61 = vld [vmem:[%s11855_s5] sm:$0x7f] }
 0xeea   :  { %8941 = vmatprep.subr.bf16.mxu1 %v9758_v62  ;;  %v2647_v62 = vrot.slane %v10939_v61, %v10585_v35 }
 0xeec   :  { %8920 = vmatpush3.bf16.msra.mxu0 %v9759_v63 }
 0xeed   :  { %8942 = vmatpush3.bf16.msra.mxu1 %v9760_v0  ;;  %8921 = vmatprep.subr.bf16.mxu0 %v9761_v1 }
 0xeee   :  { %8943 = vmatprep.subr.bf16.mxu1 %v9762_v2 }
 0xef0   :  { %8922 = vmatpush3.bf16.msra.mxu0 %v9763_v3 }
 0xef1   :  { %8944 = vmatpush3.bf16.msra.mxu1 %v9764_v4  ;;  %8923 = vmatprep.subr.bf16.mxu0 %v9765_v5 }
 0xef2   :  { %8945 = vmatprep.subr.bf16.mxu1 %v9766_v7 }
 0xef4   :  { %8924 = vmatpush3.bf16.msra.mxu0 %v9767_v8 }
 0xef5   :  { %8946 = vmatpush3.bf16.msra.mxu1 %v9768_v10  ;;  %8925 = vmatprep.subr.bf16.mxu0 %v9769_v11 }
 0xef6   :  { %8947 = vmatprep.subr.bf16.mxu1 %v9770_v12 }
 0xef8   :  { %8926 = vmatpush3.bf16.msra.mxu0 %v9771_v13 }
 0xef9   :  { %8948 = vmatpush3.bf16.msra.mxu1 %v9772_v17  ;;  %8955 = vmatprep.subr.bf16.mxu0 %v9773_v22 }
 0xefa   :  { %8977 = vmatprep.subr.bf16.mxu1 %v9774_v20 }
 0xefb   :  { %3613 = vmatmul.mubr.bf16.vlgmr.msra.gmra.mrb[44].mxu0 %v10673_v45  ;;  %v9781_v45 = vld [vmem:[%s11858_s8 + $0x350] sm:$0xff]  }
 0xefc   :  { %3654 = vmatmul.mubr.bf16.vlgmr.msra.gmra.mrb[44].mxu1 %v10675_v6  ;;  %8956 = vmatpush3.bf16.msra.mxu0 %v9775_v21  ;;  %v9782_v6 = vld [vmem:[%s11858_s8 + $0x3d0] sm:$0xff]  }
 0xefd   :  { %3694 = vmatprep.mubr.bf16.mxu0 %v10709_v27  ;;  %8978 = vmatpush3.bf16.msra.mxu1 %v9776_v23  ;;  %v9783_v27 = vld [vmem:[%s11858_s8 + $0x310] sm:$0xff]  }
 0xefe   :  { %3735 = vmatprep.mubr.bf16.mxu1 %v10711_v31  ;;  %8957 = vmatprep.subr.bf16.mxu0 %v9777_v26  ;;  %v9785_v31 = vld [vmem:[%s11858_s8 + $0x358] sm:$0xff]  }
 0xeff   :  { %8979 = vmatprep.subr.bf16.mxu1 %v9778_v15 }
 0xf00   :  { %8958 = vmatpush3.bf16.msra.mxu0 %v9779_v14 }
 0xf01   :  { %8980 = vmatpush3.bf16.msra.mxu1 %v9780_v28  ;;  %8959 = vmatprep.subr.bf16.mxu0 %v9781_v45 }
 0xf02   :  { %8981 = vmatprep.subr.bf16.mxu1 %v9782_v6 }
 0xf04   :  { %8960 = vmatpush3.bf16.msra.mxu0 %v9783_v27 }
 0xf05   :  { %8982 = vmatpush3.bf16.msra.mxu1 %v9784_v32  ;;  %8961 = vmatprep.subr.bf16.mxu0 %v9785_v31 }
 0xf06   :  { %8983 = vmatprep.subr.bf16.mxu1 %v9786_v33 }
 0xf08   :  { %8962 = vmatpush3.bf16.msra.mxu0 %v9787_v34 }
 0xf09   :  { %8984 = vmatpush3.bf16.msra.mxu1 %v9788_v24  ;;  %8963 = vmatprep.subr.bf16.mxu0 %v9789_v37 }
 0xf0a   :  { %8985 = vmatprep.subr.bf16.mxu1 %v9790_v38 }
 0xf0c   :  { %8964 = vmatpush3.bf16.msra.mxu0 %v9791_v41 }
 0xf0d   :  { %8986 = vmatpush3.bf16.msra.mxu1 %v9792_v42  ;;  %8965 = vmatprep.subr.bf16.mxu0 %v9793_v43 }
 0xf0e   :  { %8987 = vmatprep.subr.bf16.mxu1 %v9794_v44 }
 0xf10   :  { %8966 = vmatpush3.bf16.msra.mxu0 %v9795_v48 }
 0xf11   :  { %8988 = vmatpush3.bf16.msra.mxu1 %v9796_v49  ;;  %8967 = vmatprep.subr.bf16.mxu0 %v9797_v50 }
 0xf12   :  { %8989 = vmatprep.subr.bf16.mxu1 %v9798_v52 }
 0xf14   :  { %8968 = vmatpush3.bf16.msra.mxu0 %v9799_v59 }
 0xf15   :  { %8990 = vmatpush3.bf16.msra.mxu1 %v9800_v18  ;;  %8969 = vmatprep.subr.bf16.mxu0 %v9801_v46 }
 0xf16   :  { %8991 = vmatprep.subr.bf16.mxu1 %v9802_v47 }
 0xf18   :  { %8970 = vmatpush3.bf16.msra.mxu0 %v9803_v53 }
 0xf19   :  { %8992 = vmatpush3.bf16.msra.mxu1 %v9804_v54 }
 0xf1a   :  { %9384 = vmatprep.subr.mxu1 %v10017_v16 }
 0xf1b   :  { %3695 = vmatmul.mubr.bf16.vlgmr.msra.gmra.mrb[48].mxu0 %v10705_v29 }
 0xf1c   :  { %3736 = vmatmul.mubr.bf16.vlgmr.msra.gmra.mrb[48].mxu1 %v10707_v30 }
 0xf1d   :  { %9386 = vmatprep.mubr.msk.f32.mxu1 %vm10018_vm5, %v10017_v16 }
 0xf8e   :  { %v8839_v56 = vpop.f32.mrb[36].mxu0  ;;  %v8861_v57 = vpop.f32.mrb[36].mxu1 }
 0xf8f   :  { %v8840_v63 = vpop.f32.mrb[37].mxu0  ;;  %v8862_v0 = vpop.f32.mrb[37].mxu1 }
 0xf90   :  { %v8841_v1 = vadd.f32 %v8840_v63, %v8839_v56  ;;  %v8863_v2 = vadd.f32 %v8862_v0, %v8861_v57  ;;  %v8842_v29 = vpop.f32.mrb[38].mxu0  ;;  %v8864_v3 = vpop.f32.mrb[38].mxu1 }
 0xf91   :  { %v8843_v30 = vpop.f32.mrb[39].mxu0  ;;  %v8865_v4 = vpop.f32.mrb[39].mxu1 }
 0xf92   :  { %v3451_v5 = vadd.f32 %v8841_v1, %v2647_v62  ;;  %v8844_v7 = vadd.f32 %v8843_v30, %v8842_v29  ;;  %v8866_v8 = vadd.f32 %v8865_v4, %v8864_v3 }
 0xf94   :  { %v3492_v10 = vadd.f32 %v8863_v2, %v3451_v5  ;;  %v3454_v11 = vadd.f32 %v8844_v7, %v2647_v62 }
 0xf96   :  { %v3495_v12 = vadd.f32 %v8866_v8, %v3454_v11 }
 0xfae   :  { %v8883_v13 = vpop.f32.mrb[40].mxu0  ;;  %v8905_v17 = vpop.f32.mrb[40].mxu1 }
 0xfaf   :  { %v8884_v22 = vpop.f32.mrb[41].mxu0  ;;  %v8906_v20 = vpop.f32.mrb[41].mxu1 }
 0xfb0   :  { %v8885_v21 = vadd.f32 %v8884_v22, %v8883_v13  ;;  %v8907_v23 = vadd.f32 %v8906_v20, %v8905_v17  ;;  %v8886_v26 = vpop.f32.mrb[42].mxu0  ;;  %v8908_v15 = vpop.f32.mrb[42].mxu1 }
 0xfb1   :  { %v8887_v14 = vpop.f32.mrb[43].mxu0  ;;  %v8909_v28 = vpop.f32.mrb[43].mxu1 }
 0xfb2   :  { %v3533_v45 = vadd.f32 %v8885_v21, %v3492_v10  ;;  %v8888_v6 = vadd.f32 %v8887_v14, %v8886_v26  ;;  %v8910_v27 = vadd.f32 %v8909_v28, %v8908_v15 }
 0xfb4   :  { %v3574_v32 = vadd.f32 %v8907_v23, %v3533_v45  ;;  %v3536_v31 = vadd.f32 %v8888_v6, %v3495_v12  ;;  %v8262_v45 = vld [vmem:[%s11853_s3 + $0x28] sm:$0xff] }
 0xfb6   :  { %v3577_v33 = vadd.f32 %v8910_v27, %v3536_v31  ;;  %v8263_v27 = vld [vmem:[%s11853_s3 + $0x30] sm:$0xff] }
 0xfce   :  { %v8927_v34 = vpop.f32.mrb[44].mxu0 }
 0xfcf   :  { %v8949_v24 = vpop.f32.mrb[44].mxu1  ;;  %v8928_v37 = vpop.f32.mrb[45].mxu0 }
 0xfd0   :  { %v8929_v38 = vadd.f32 %v8928_v37, %v8927_v34  ;;  %v8950_v41 = vpop.f32.mrb[45].mxu1  ;;  %v8930_v42 = vpop.f32.mrb[46].mxu0 }
 0xfd1   :  { %v8951_v43 = vadd.f32 %v8950_v41, %v8949_v24  ;;  %v8952_v44 = vpop.f32.mrb[46].mxu1  ;;  %v8931_v48 = vpop.f32.mrb[47].mxu0 }
 0xfd2   :  { %v3615_v49 = vadd.f32 %v8929_v38, %v3574_v32  ;;  %v8932_v50 = vadd.f32 %v8931_v48, %v8930_v42  ;;  %v8953_v52 = vpop.f32.mrb[47].mxu1  ;;  %v8264_v32 = vld [vmem:[%s11853_s3 + $0x38] sm:$0xff]  ;;  %v3775_v42 = vrot.slane %v10939_v61, %v10591_v39  ;;  %v3781_v48 = vrot.slane %v10939_v61, %v10588_v36  ;;  %v10979_v61 = vld [vmem:[%s11855_s5 + $0x8] sm:$0x7f] }
 0xfd3   :  { %v8954_v59 = vadd.f32 %v8953_v52, %v8952_v44  ;;  %v9584_v31 = vpack.c.bf16 %v8264_v32, %v8263_v27 }
 0xfd4   :  { %v3656_v18 = vadd.f32 %v8951_v43, %v3615_v49  ;;  %v3618_v46 = vadd.f32 %v8932_v50, %v3577_v33 }
 0xfd6   :  { %v3659_v47 = vadd.f32 %v8954_v59, %v3618_v46 }
 0xfee   :  { %v8971_v53 = vpop.f32.mrb[48].mxu0 }
 0xfef   :  { %v8993_v54 = vpop.f32.mrb[48].mxu1  ;;  %v8972_v56 = vpop.f32.mrb[49].mxu0 }
 0xff0   :  { %v8973_v57 = vadd.f32 %v8972_v56, %v8971_v53  ;;  %v8994_v62 = vpop.f32.mrb[49].mxu1  ;;  %v8974_v63 = vpop.f32.mrb[50].mxu0 }
 0xff1   :  { %v8995_v0 = vadd.f32 %v8994_v62, %v8993_v54  ;;  %v8996_v1 = vpop.f32.mrb[50].mxu1  ;;  %v8975_v2 = vpop.f32.mrb[51].mxu0 }
 0xff2   :  { %v3697_v29 = vadd.f32 %v8973_v57, %v3656_v18  ;;  %v8976_v3 = vadd.f32 %v8975_v2, %v8974_v63  ;;  %v8997_v30 = vpop.f32.mrb[51].mxu1 }
 0xff3   :  { %v8998_v4 = vadd.f32 %v8997_v30, %v8996_v1 }
 0xff4   :  { %v3738_v5 = vadd.f32 %v8995_v0, %v3697_v29  ;;  %v3700_v7 = vadd.f32 %v8976_v3, %v3659_v47  ;;  %v3794_v47 = vrot.slane %v10979_v61, %v10141_v19 }
 0xff6   :  { %v3741_v8 = vadd.f32 %v8998_v4, %v3700_v7  ;;  %v3744_v10 = vadd.f32 %v3738_v5, %v10397_v9 }
 0xff8   :  { %v3746_v11 = vsel %vm145_vm4, %v3744_v10, 0.0  ;;  %v3745_v12 = vadd.f32 %v3741_v8, %v10399_v60  ;;  %v8261_v60 = vld [vmem:[%s11853_s3 + $0x20] sm:$0xff] }
 0xff9   :  { %3747 = vadd.xlane.f32.xlu1 %v3746_v11  ;;  %v9580_v6 = vpack.c.bf16 %v8262_v45, %v8261_v60 }
 0xffa   :  { %v3749_v13 = vsel %vm145_vm4, %v3745_v12, 0.0 }
 0xffb   :  { %3750 = vadd.xlane.f32.xlu0 %v3749_v13  ;;  %9581 = vmatprep.subr.bf16.mxu0 %v9580_v6 }
 0xffc   :  { %9583 = vmatpush3.bf16.msra.mxu0 %v9580_v6 }
 0xffd   :  { %9585 = vmatprep.subr.bf16.mxu0 %v9584_v31 }
0x1000   :  { %9587 = vmatpush3.bf16.msra.mxu0 %v9584_v31 }
0x1001   :  { %9379 = vmatprep.subr.mxu0 %v10017_v16 }
0x1086   :  { %v3748_v17 = vpop.xlane.xlu1 %3747 }
0x1087   :  { %v3752_v22 = vmul.f32 0.03125, %v3748_v17 }
0x1088   :  { %v3751_v20 = vpop.xlane.xlu0 %3750 }
0x1089   :  { %v3754_v21 = vsub.f32 %v3744_v10, %v3752_v22  ;;  %v3753_v23 = vmul.f32 0.03125, %v3751_v20 }
0x108b   :  { %v3755_v26 = vsub.f32 %v3745_v12, %v3753_v23  ;;  %v3756_v15 = vmul.f32 %v3754_v21, %v3754_v21 }
0x108d   :  { %v3758_v14 = vsel %vm145_vm4, %v3756_v15, 0.0  ;;  %v3757_v28 = vmul.f32 %v3755_v26, %v3755_v26 }
0x108e   :  { %3759 = vadd.xlane.f32.xlu1 %v3758_v14 }
0x108f   :  { %v3761_v9 = vsel %vm145_vm4, %v3757_v28, 0.0 }
0x1090   :  { %3762 = vadd.xlane.f32.xlu0 %v3761_v9 }
0x111b   :  { %v3760_v33 = vpop.xlane.xlu1 %3759 }
0x111c   :  { %v3764_v34 = vmul.f32 0.03125, %v3760_v33 }
0x111d   :  { %v3763_v24 = vpop.xlane.xlu0 %3762 }
0x111e   :  { %v3766_v37 = vadd.f32 1e-05, %v3764_v34  ;;  %v3765_v38 = vmul.f32 0.03125, %v3763_v24 }
0x1120   :  { %9969 = vrsqrt.f32 %v3766_v37  ;;  %v3767_v41 = vadd.f32 1e-05, %v3765_v38 }
0x1122   :  { %9971 = vrsqrt.f32 %v3767_v41 }
0x112a   :  { %v9970_v43 = vpop.eup %9969 }
0x112b   :  { %v3770_v44 = vmul.f32 %v9970_v43, %v3754_v21 }
0x112c   :  { %v9972_v49 = vpop.eup %9971 }
0x112d   :  { %v3771_v50 = vmul.f32 %v9972_v49, %v3755_v26  ;;  %v3776_v52 = vmul.f32 %v3775_v42, %v3770_v44 }
0x112f   :  { %v3777_v59 = vmul.f32 %v3775_v42, %v3771_v50  ;;  %v10966_v18 = vadd.f32 %v3781_v48, %v3776_v52 }
0x1131   :  { %v10968_v46 = vadd.f32 %v3781_v48, %v3777_v59  ;;  %9376 = vmatprep.mubr.msk.f32.mxu0 %vm145_vm4, %v10966_v18 }
0x1133   :  { %9377 = vmatmul.mubr.msk.f32.vlgmr.msra.gmra.mrb[18].mxu0 %vm145_vm4, %v10968_v46 }
0x1134   :  { %9381 = vmatprep.mubr.msk.f32.mxu0 %vm10018_vm5, %v10017_v16 }
0x1206   :  { %v9378_v53 = vpop.f32.mrb[18].mxu0 }
0x1207   :  { %v10983_v54 = vadd.f32 %v9378_v53, %v3794_v47  ;;  %v3867_v56 = vpop.f32.mrb[19].mxu0 }
0x1208   :  { %v10985_v57 = vadd.f32 %v3867_v56, %v3794_v47 }
0x1209   :  { %3954 = vrot.lane.b32.xlu0 %v10983_v54, %s10019_s15 }
0x120a   :  { %3877 = vrot.lane.b32.xlu1 %v10985_v57, %s10019_s15  ;;  %s11867_s15 = smov 16  }
0x127b   :  { %v3955_v62 = vpop.permute.xlu0 %3954 }
0x127c   :  { %9385 = vmatpush3.xpose.msk.msra.mxu1 %vm230_vm6, %v3955_v62  ;;  %v3878_v63 = vpop.permute.xlu1 %3877 }
0x127d   :  { %9380 = vmatpush3.xpose.msk.msra.mxu0 %vm230_vm6, %v3878_v63  ;;  %9394 = vmatprep.subr.mxu1 %v10017_v16 }
0x127e   :  { %9389 = vmatprep.subr.mxu0 %v10017_v16 }
0x127f   :  { %9387 = vmatmul.mubr.msk.f32.vlgmr.msra.gmra.mrb[52].mxu1 %vm230_vm6, %v10983_v54 }
0x1280   :  { %9382 = vmatmul.mubr.msk.f32.vlgmr.msra.gmra.mrb[52].mxu0 %vm230_vm6, %v10985_v57  ;;  %9396 = vmatprep.mubr.msk.f32.mxu1 %vm10018_vm5, %v10017_v16 }
0x1281   :  { %9391 = vmatprep.mubr.msk.f32.mxu0 %vm10018_vm5, %v10017_v16 }
0x1352   :  { %v4026_v0 = vpop.f32.mrb[52].mxu1 }
0x1353   :  { %v4031_v1 = vmul.f32 0.35355338, %v4026_v0  ;;  %v3949_v2 = vpop.f32.mrb[52].mxu0  ;;  %v9388_v29 = vpop.f32.mrb[53].mxu1 }
0x1354   :  { %v4030_v3 = vmul.f32 0.35355338, %v3949_v2  ;;  %v9383_v30 = vpop.f32.mrb[53].mxu0 }
0x1355   :  { %v4035_v4 = vsel %vm230_vm6, %v4031_v1, -inf }
0x1356   :  { %4036 = vmax.xlane.f32.xlu0 %v4035_v4  ;;  %v4032_v5 = vsel %vm230_vm6, %v4030_v3, -inf }
0x1357   :  { %4033 = vmax.xlane.f32.xlu1 %v4032_v5 }
0x1368   :  { %4054 = vrot.lane.b32.xlu1 %v10985_v57, %s10020_s16 }
0x136c   :  { %4130 = vrot.lane.b32.xlu0 %v10983_v54, %s10020_s16  ;;  %4208 = vrot.lane.b32.xlu1 %v10985_v57, %s10021_s17 }
0x1370   :  { %4286 = vrot.lane.b32.xlu1 %v10983_v54, %s10021_s17 }
0x13e3   :  { %v4037_v7 = vpop.xlane.xlu0 %4036 }
0x13e4   :  { %v4039_v8 = vsub.f32 %v4031_v1, %v4037_v7  ;;  %v4034_v10 = vpop.xlane.xlu1 %4033 }
0x13e5   :  { %v4038_v11 = vsub.f32 %v4030_v3, %v4034_v10 }
0x13e6   :  { %v4042_v12 = vmul.f32 1.442695, %v4039_v8 }
0x13e7   :  { %v4040_v13 = vmul.f32 1.442695, %v4038_v11  ;;  %v4131_v17 = vpop.permute.xlu0 %4130 }
0x13e8   :  { %9973 = vpow2.f32 %v4042_v12  ;;  %9395 = vmatpush3.msra.mxu1 %v4131_v17  ;;  %v4055_v22 = vpop.permute.xlu1 %4054 }
0x13e9   :  { %9975 = vpow2.f32 %v4040_v13  ;;  %9390 = vmatpush3.msra.mxu0 %v4055_v22  ;;  %9404 = vmatprep.subr.mxu1 %v10017_v16 }
0x13ea   :  { %9399 = vmatprep.subr.mxu0 %v10017_v16 }
0x13ec   :  { %v4209_v15 = vpop.permute.xlu1 %4208 }
0x13f0   :  { %v4287_v14 = vpop.permute.xlu1 %4286 }
0x13f2   :  { %v9974_v20 = vpop.eup %9973 }
0x13f3   :  { %v9976_v21 = vpop.eup %9975  ;;  %v4047_v23 = vsel %vm230_vm6, %v9974_v20, 0.0 }
0x13f4   :  { %4048 = vadd.xlane.f32.xlu0 %v4047_v23  ;;  %v4044_v26 = vsel %vm230_vm6, %v9976_v21, 0.0 }
0x13f5   :  { %4045 = vadd.xlane.f32.xlu1 %v4044_v26 }
0x1406   :  { %4284 = vrot.lane.b32.xlu1 %v10983_v54, %s10022_s18 }
0x140a   :  { %4206 = vrot.lane.b32.xlu0 %v10985_v57, %s10022_s18 }
0x1481   :  { %v4049_v28 = vpop.xlane.xlu0 %4048 }
0x1482   :  { %9977 = vrcp.f32 %v4049_v28  ;;  %v4046_v9 = vpop.xlane.xlu1 %4045 }
0x1483   :  { %9979 = vrcp.f32 %v4046_v9 }
0x1485   :  { %v4207_v31 = vpop.permute.xlu0 %4206 }
0x1486   :  { %v4285_v32 = vpop.permute.xlu1 %4284 }
0x148c   :  { %v9978_v60 = vpop.eup %9977 }
0x148d   :  { %v9980_v45 = vpop.eup %9979  ;;  %v4053_v6 = vmul.f32 %v9978_v60, %v9974_v20 }
0x148e   :  { %v4051_v27 = vmul.f32 %v9980_v45, %v9976_v21 }
0x148f   :  { %9397 = vmatmul.mubr.msk.f32.vlgmr.msra.gmra.mrb[54].mxu1 %vm230_vm6, %v4053_v6 }
0x1490   :  { %9405 = vmatpush3.xpose.msk.msra.mxu1 %vm230_vm6, %v4287_v14  ;;  %9392 = vmatmul.mubr.msk.f32.vlgmr.msra.gmra.mrb[54].mxu0 %vm230_vm6, %v4051_v27 }
0x1491   :  { %9400 = vmatpush3.xpose.msk.msra.mxu0 %vm230_vm6, %v4209_v15  ;;  %9406 = vmatprep.mubr.msk.f32.mxu1 %vm10018_vm5, %v10017_v16 }
0x1492   :  { %9401 = vmatprep.mubr.msk.f32.mxu0 %vm10018_vm5, %v10017_v16  ;;  %9409 = vmatprep.subr.mxu0 %v10017_v16 }
0x1493   :  { %9407 = vmatmul.mubr.msk.f32.vlgmr.msra.gmra.mrb[56].mxu1 %vm230_vm6, %v4285_v32  ;;  %9414 = vmatprep.subr.mxu1 %v10017_v16 }
0x1494   :  { %9402 = vmatmul.mubr.msk.f32.vlgmr.msra.gmra.mrb[56].mxu0 %vm230_vm6, %v4207_v31  ;;  %9416 = vmatprep.mubr.msk.f32.mxu1 %vm10018_vm5, %v10017_v16 }
0x1495   :  { %9411 = vmatprep.mubr.msk.f32.mxu0 %vm10018_vm5, %v10017_v16 }
0x1562   :  { %v11037_v33 = vpop.f32.mrb[54].mxu1 }
0x1563   :  { %v11039_v34 = vpop.f32.mrb[54].mxu0  ;;  %v9398_v24 = vpop.f32.mrb[55].mxu1 }
0x1564   :  { %v9393_v37 = vpop.f32.mrb[55].mxu0 }
0x1566   :  { %v4358_v38 = vpop.f32.mrb[56].mxu1 }
0x1567   :  { %v4363_v41 = vmul.f32 0.35355338, %v4358_v38  ;;  %v4280_v42 = vpop.f32.mrb[56].mxu0  ;;  %v9408_v43 = vpop.f32.mrb[57].mxu1 }
0x1568   :  { %v4362_v44 = vmul.f32 0.35355338, %v4280_v42  ;;  %v9403_v48 = vpop.f32.mrb[57].mxu0 }
0x1569   :  { %v4367_v49 = vsel %vm230_vm6, %v4363_v41, -inf }
0x156a   :  { %4368 = vmax.xlane.f32.xlu1 %v4367_v49  ;;  %v4364_v50 = vsel %vm230_vm6, %v4362_v44, -inf }
0x156b   :  { %4365 = vmax.xlane.f32.xlu0 %v4364_v50 }
0x157b   :  { %4386 = vrot.lane.b32.xlu1 %v10985_v57, %s10023_s19 }
0x157f   :  { %4540 = vrot.lane.b32.xlu1 %v10985_v57, %s10024_s20 }
0x1581   :  { %4462 = vrot.lane.b32.xlu0 %v10983_v54, %s10023_s19 }
0x1583   :  { %4618 = vrot.lane.b32.xlu1 %v10983_v54, %s10024_s20 }
0x1587   :  { %4616 = vrot.lane.b32.xlu1 %v10983_v54, %s10025_s21 }
0x15f7   :  { %v4369_v52 = vpop.xlane.xlu1 %4368 }
0x15f8   :  { %v4371_v59 = vsub.f32 %v4363_v41, %v4369_v52  ;;  %v4366_v47 = vpop.xlane.xlu0 %4365 }
0x15f9   :  { %v4370_v53 = vsub.f32 %v4362_v44, %v4366_v47 }
0x15fa   :  { %v4374_v56 = vmul.f32 1.442695, %v4371_v59 }
0x15fb   :  { %v4372_v62 = vmul.f32 1.442695, %v4370_v53  ;;  %v4387_v63 = vpop.permute.xlu1 %4386 }
0x15fc   :  { %9981 = vpow2.f32 %v4374_v56  ;;  %9410 = vmatpush3.msra.mxu0 %v4387_v63  ;;  %v4463_v0 = vpop.permute.xlu0 %4462 }
0x15fd   :  { %9415 = vmatpush3.msra.mxu1 %v4463_v0  ;;  %9419 = vmatprep.subr.mxu0 %v10017_v16  ;;  %9983 = vpow2.f32 %v4372_v62 }
0x15fe   :  { %9424 = vmatprep.subr.mxu1 %v10017_v16 }
0x15ff   :  { %v4541_v5 = vpop.permute.xlu1 %4540 }
0x1603   :  { %v4619_v8 = vpop.permute.xlu1 %4618 }
0x1606   :  { %v9982_v1 = vpop.eup %9981 }
0x1607   :  { %v4379_v2 = vsel %vm230_vm6, %v9982_v1, 0.0  ;;  %v9984_v29 = vpop.eup %9983  ;;  %v4617_v13 = vpop.permute.xlu1 %4616 }
0x1608   :  { %4380 = vadd.xlane.f32.xlu0 %v4379_v2  ;;  %v4376_v3 = vsel %vm230_vm6, %v9984_v29, 0.0 }
0x160c   :  { %4377 = vadd.xlane.f32.xlu0 %v4376_v3 }
0x1622   :  { %4538 = vrot.lane.b32.xlu0 %v10985_v57, %s10025_s21 }
0x1695   :  { %v4381_v30 = vpop.xlane.xlu0 %4380 }
0x1696   :  { %9985 = vrcp.f32 %v4381_v30 }
0x1699   :  { %v4378_v4 = vpop.xlane.xlu0 %4377 }
0x169a   :  { %9987 = vrcp.f32 %v4378_v4 }
0x169d   :  { %v4539_v17 = vpop.permute.xlu0 %4538 }
0x16a0   :  { %v9986_v7 = vpop.eup %9985 }
0x16a1   :  { %v4385_v10 = vmul.f32 %v9986_v7, %v9982_v1 }
0x16a3   :  { %9417 = vmatmul.mubr.msk.f32.vlgmr.msra.gmra.mrb[58].mxu1 %vm230_vm6, %v4385_v10 }
0x16a4   :  { %v9988_v11 = vpop.eup %9987  ;;  %9425 = vmatpush3.xpose.msk.msra.mxu1 %vm230_vm6, %v4619_v8  ;;  %9426 = vmatprep.mubr.msk.f32.mxu1 %vm10018_vm5, %v10017_v16 }
0x16a5   :  { %v4383_v12 = vmul.f32 %v9988_v11, %v9984_v29  ;;  %9434 = vmatprep.subr.mxu1 %v10017_v16 }
0x16a7   :  { %9412 = vmatmul.mubr.msk.f32.vlgmr.msra.gmra.mrb[58].mxu0 %vm230_vm6, %v4383_v12  ;;  %9427 = vmatmul.mubr.msk.f32.vlgmr.msra.gmra.mrb[60].mxu1 %vm230_vm6, %v4617_v13 }
0x16a8   :  { %9420 = vmatpush3.xpose.msk.msra.mxu0 %vm230_vm6, %v4541_v5  ;;  %9421 = vmatprep.mubr.msk.f32.mxu0 %vm10018_vm5, %v10017_v16 }
0x16a9   :  { %9429 = vmatprep.subr.mxu0 %v10017_v16  ;;  %9436 = vmatprep.mubr.msk.f32.mxu1 %vm10018_vm5, %v10017_v16 }
0x16ab   :  { %9422 = vmatmul.mubr.msk.f32.vlgmr.msra.gmra.mrb[60].mxu0 %vm230_vm6, %v4539_v17 }
0x16ac   :  { %9431 = vmatprep.mubr.msk.f32.mxu0 %vm10018_vm5, %v10017_v16 }
0x1776   :  { %v11075_v22 = vpop.f32.mrb[58].mxu1 }
0x1777   :  { %v9418_v20 = vpop.f32.mrb[59].mxu1 }
0x177a   :  { %v11077_v21 = vpop.f32.mrb[58].mxu0  ;;  %v4690_v23 = vpop.f32.mrb[60].mxu1 }
0x177b   :  { %v4695_v26 = vmul.f32 0.35355338, %v4690_v23  ;;  %v9413_v15 = vpop.f32.mrb[59].mxu0  ;;  %v9428_v14 = vpop.f32.mrb[61].mxu1 }
0x177d   :  { %v4699_v28 = vsel %vm230_vm6, %v4695_v26, -inf }
0x177e   :  { %4700 = vmax.xlane.f32.xlu1 %v4699_v28  ;;  %v4612_v9 = vpop.f32.mrb[60].mxu0 }
0x177f   :  { %v4694_v60 = vmul.f32 0.35355338, %v4612_v9  ;;  %v9423_v45 = vpop.f32.mrb[61].mxu0 }
0x1781   :  { %v4696_v6 = vsel %vm230_vm6, %v4694_v60, -inf }
0x1782   :  { %4697 = vmax.xlane.f32.xlu0 %v4696_v6 }
0x178f   :  { %4718 = vrot.lane.b32.xlu1 %v10985_v57, %s10026_s22 }
0x1793   :  { %4872 = vrot.lane.b32.xlu1 %v10985_v57, %s10027_s23 }
0x1797   :  { %4950 = vrot.lane.b32.xlu1 %v10983_v54, %s10027_s23 }
0x1798   :  { %4794 = vrot.lane.b32.xlu0 %v10983_v54, %s10026_s22 }
0x179b   :  { %4948 = vrot.lane.b32.xlu1 %v10983_v54, %s10028_s24 }
0x180b   :  { %v4701_v27 = vpop.xlane.xlu1 %4700 }
0x180c   :  { %v4703_v32 = vsub.f32 %v4695_v26, %v4701_v27 }
0x180e   :  { %v4706_v31 = vmul.f32 1.442695, %v4703_v32 }
0x180f   :  { %v4719_v24 = vpop.permute.xlu1 %4718  ;;  %v4698_v37 = vpop.xlane.xlu0 %4697 }
0x1810   :  { %9989 = vpow2.f32 %v4706_v31  ;;  %v4702_v38 = vsub.f32 %v4694_v60, %v4698_v37  ;;  %9430 = vmatpush3.msra.mxu0 %v4719_v24  ;;  %v8292_v37 = vld [vmem:[%s11856_s4 + $0x28] sm:$0xff] }
0x1811   :  { %9439 = vmatprep.subr.mxu0 %v10017_v16 }
0x1812   :  { %v4704_v41 = vmul.f32 1.442695, %v4702_v38 }
0x1813   :  { %v4795_v42 = vpop.permute.xlu0 %4794  ;;  %v4873_v59 = vpop.permute.xlu1 %4872 }
0x1814   :  { %9991 = vpow2.f32 %v4704_v41  ;;  %9435 = vmatpush3.msra.mxu1 %v4795_v42  ;;  %v8293_v41 = vld [vmem:[%s11856_s4 + $0x30] sm:$0xff]  ;;  %v8294_v42 = vld [vmem:[%s11856_s4 + $0x38] sm:$0xff] }
0x1815   :  { %9444 = vmatprep.subr.mxu1 %v10017_v16 }
0x1817   :  { %v4951_v53 = vpop.permute.xlu1 %4950 }
0x181a   :  { %v9990_v43 = vpop.eup %9989 }
0x181b   :  { %v4711_v44 = vsel %vm230_vm6, %v9990_v43, 0.0  ;;  %v4949_v0 = vpop.permute.xlu1 %4948 }
0x181c   :  { %4712 = vadd.xlane.f32.xlu0 %v4711_v44 }
0x181e   :  { %v9992_v48 = vpop.eup %9991 }
0x181f   :  { %v4708_v49 = vsel %vm230_vm6, %v9992_v48, 0.0 }
0x1820   :  { %4709 = vadd.xlane.f32.xlu0 %v4708_v49 }
0x1836   :  { %4870 = vrot.lane.b32.xlu0 %v10985_v57, %s10028_s24  ;;  %s11868_s24 = smov 24  }
0x18a9   :  { %v4713_v50 = vpop.xlane.xlu0 %4712 }
0x18aa   :  { %9993 = vrcp.f32 %v4713_v50 }
0x18ad   :  { %v4710_v52 = vpop.xlane.xlu0 %4709 }
0x18ae   :  { %9995 = vrcp.f32 %v4710_v52 }
0x18b1   :  { %v4871_v1 = vpop.permute.xlu0 %4870 }
0x18b4   :  { %v9994_v47 = vpop.eup %9993 }
0x18b5   :  { %v4717_v56 = vmul.f32 %v9994_v47, %v9990_v43  ;;  %v9592_v43 = vpack.c.bf16 %v8294_v42, %v8293_v41  ;;  %v8299_v42 = vld [vmem:[%s11857_s6 + $0x110] sm:$0xff] }
0x18b7   :  { %9437 = vmatmul.mubr.msk.f32.vlgmr.msra.gmra.mrb[62].mxu1 %vm230_vm6, %v4717_v56 }
0x18b8   :  { %v9996_v62 = vpop.eup %9995  ;;  %9445 = vmatpush3.xpose.msk.msra.mxu1 %vm230_vm6, %v4951_v53  ;;  %9446 = vmatprep.mubr.msk.f32.mxu1 %vm10018_vm5, %v10017_v16 }
0x18b9   :  { %v4715_v63 = vmul.f32 %v9996_v62, %v9992_v48  ;;  %9454 = vmatprep.subr.mxu1 %v10017_v16 }
0x18bb   :  { %9432 = vmatmul.mubr.msk.f32.vlgmr.msra.gmra.mrb[62].mxu0 %vm230_vm6, %v4715_v63  ;;  %9447 = vmatmul.mubr.msk.f32.vlgmr.msra.gmra.mrb[64].mxu1 %vm230_vm6, %v4949_v0 }
0x18bc   :  { %9440 = vmatpush3.xpose.msk.msra.mxu0 %vm230_vm6, %v4873_v59  ;;  %9441 = vmatprep.mubr.msk.f32.mxu0 %vm10018_vm5, %v10017_v16 }
0x18bd   :  { %9449 = vmatprep.subr.mxu0 %v10017_v16  ;;  %9456 = vmatprep.mubr.msk.f32.mxu1 %vm10018_vm5, %v10017_v16 }
0x18bf   :  { %9442 = vmatmul.mubr.msk.f32.vlgmr.msra.gmra.mrb[64].mxu0 %vm230_vm6, %v4871_v1 }
0x18c0   :  { %9451 = vmatprep.mubr.msk.f32.mxu0 %vm10018_vm5, %v10017_v16 }
0x198a   :  { %v4866_v2 = vpop.f32.mrb[62].mxu1 }
0x198b   :  { %v9438_v29 = vpop.f32.mrb[63].mxu1 }
0x198e   :  { %v4790_v3 = vpop.f32.mrb[62].mxu0  ;;  %v5022_v30 = vpop.f32.mrb[64].mxu1 }
0x198f   :  { %v5027_v4 = vmul.f32 0.35355338, %v5022_v30  ;;  %v9433_v5 = vpop.f32.mrb[63].mxu0  ;;  %v9448_v7 = vpop.f32.mrb[65].mxu1 }
0x1991   :  { %v5031_v8 = vsel %vm230_vm6, %v5027_v4, -inf }
0x1992   :  { %5032 = vmax.xlane.f32.xlu1 %v5031_v8  ;;  %v4944_v10 = vpop.f32.mrb[64].mxu0 }
0x1993   :  { %v5026_v11 = vmul.f32 0.35355338, %v4944_v10  ;;  %v9443_v12 = vpop.f32.mrb[65].mxu0 }
0x1995   :  { %v5028_v13 = vsel %vm230_vm6, %v5026_v11, -inf }
0x1996   :  { %5029 = vmax.xlane.f32.xlu0 %v5028_v13 }
0x19a3   :  { %5050 = vrot.lane.b32.xlu1 %v10985_v57, %s10029_s25 }
0x19a7   :  { %5204 = vrot.lane.b32.xlu1 %v11077_v21, %s10030_s26 }
0x19ab   :  { %5206 = vrot.lane.b32.xlu1 %v11075_v22, %s10030_s26 }
0x19af   :  { %5214 = vrot.lane.b32.xlu1 %v4866_v2, %s11867_s15 }
0x1a1f   :  { %v5033_v17 = vpop.xlane.xlu1 %5032 }
0x1a20   :  { %v5035_v20 = vsub.f32 %v5027_v4, %v5033_v17 }
0x1a22   :  { %v5038_v23 = vmul.f32 1.442695, %v5035_v20 }
0x1a23   :  { %v5051_v26 = vpop.permute.xlu1 %5050  ;;  %v5030_v15 = vpop.xlane.xlu0 %5029 }
0x1a24   :  { %9997 = vpow2.f32 %v5038_v23  ;;  %v5034_v14 = vsub.f32 %v5026_v11, %v5030_v15  ;;  %9450 = vmatpush3.msra.mxu0 %v5051_v26 }
0x1a26   :  { %v5036_v28 = vmul.f32 1.442695, %v5034_v14 }
0x1a27   :  { %v5205_v52 = vpop.permute.xlu1 %5204 }
0x1a28   :  { %9999 = vpow2.f32 %v5036_v28  ;;  %v5226_v56 = vsel %vm230_vm6, %v11039_v34, %v5205_v52  ;;  %v5240_v34 = vrot.slane %v10979_v61, %v10321_v58 }
0x1a2b   :  { %v5207_v59 = vpop.permute.xlu1 %5206 }
0x1a2c   :  { %v5227_v63 = vsel %vm230_vm6, %v11037_v33, %v5207_v59 }
0x1a2e   :  { %v9998_v9 = vpop.eup %9997 }
0x1a2f   :  { %v5043_v57 = vsel %vm230_vm6, %v9998_v9, 0.0  ;;  %v5215_v47 = vpop.permute.xlu1 %5214 }
0x1a30   :  { %5044 = vadd.xlane.f32.xlu0 %v5043_v57  ;;  %v5229_v2 = vsel %vm1580_vm8, %v5227_v63, %v5215_v47  ;;  %v8298_v57 = vld [vmem:[%s11857_s6 + $0x108] sm:$0xff] }
0x1a32   :  { %v10000_v21 = vpop.eup %9999 }
0x1a33   :  { %v5040_v60 = vsel %vm230_vm6, %v10000_v21, 0.0 }
0x1a34   :  { %5041 = vadd.xlane.f32.xlu0 %v5040_v60  ;;  %v8306_v60 = vld [vmem:[%s11857_s6 + $0x148] sm:$0xff] }
0x1a4a   :  { %5126 = vrot.lane.b32.xlu0 %v10983_v54, %s10029_s25  ;;  %v8291_v54 = vld [vmem:[%s11856_s4 + $0x20] sm:$0xff] }
0x1a4b   :  { %v9588_v38 = vpack.c.bf16 %v8292_v37, %v8291_v54  ;;  %v8322_v54 = vld [vmem:[%s11857_s6 + $0x1c8] sm:$0xff] }
0x1a4d   :  { %9589 = vmatprep.subr.bf16.mxu0 %v9588_v38 }
0x1a4e   :  { %5212 = vrot.lane.b32.xlu0 %v4790_v3, %s11867_s15 }
0x1abd   :  { %v5045_v22 = vpop.xlane.xlu0 %5044 }
0x1abe   :  { %10001 = vrcp.f32 %v5045_v22 }
0x1ac1   :  { %v5042_v45 = vpop.xlane.xlu0 %5041 }
0x1ac2   :  { %10003 = vrcp.f32 %v5042_v45  ;;  %v8333_v45 = vcombine.low %v8298_v57, %v8306_v60 }
0x1ac5   :  { %v5127_v6 = vpop.permute.xlu0 %5126 }
0x1ac6   :  { %9455 = vmatpush3.msra.mxu1 %v5127_v6  ;;  %v8334_v6 = vcombine.high %v8298_v57, %v8306_v60  ;;  %v8325_v57 = vld [vmem:[%s11857_s6 + $0x1e0] sm:$0xff]  ;;  %v8326_v60 = vld [vmem:[%s11857_s6 + $0x1e8] sm:$0xff] }
0x1ac8   :  { %v10002_v27 = vpop.eup %10001 }
0x1ac9   :  { %v5049_v32 = vmul.f32 %v10002_v27, %v9998_v9  ;;  %v5213_v53 = vpop.permute.xlu0 %5212  ;;  %v8305_v9 = vld [vmem:[%s11857_s6 + $0x140] sm:$0xff] }
0x1aca   :  { %v5228_v0 = vsel %vm1580_vm8, %v5226_v56, %v5213_v53  ;;  %v8313_v27 = vld [vmem:[%s11857_s6 + $0x180] sm:$0xff] }
0x1acb   :  { %9457 = vmatmul.mubr.msk.f32.vlgmr.msra.gmra.mrb[66].mxu1 %vm230_vm6, %v5049_v32  ;;  %v8321_v32 = vld [vmem:[%s11857_s6 + $0x1c0] sm:$0xff] }
0x1acc   :  { %v10004_v31 = vpop.eup %10003  ;;  %5676 = vmatprep.mubr.bf16.mxu1 %v10033_v25  ;;  %v8347_v37 = vcombine.low %v8313_v27, %v8321_v32 }
0x1acd   :  { %v5047_v24 = vmul.f32 %v10004_v31, %v10000_v21  ;;  %v8314_v31 = vld [vmem:[%s11857_s6 + $0x188] sm:$0xff] }
0x1ace   :  { %v8350_v41 = vcombine.high %v8314_v31, %v8322_v54 }
0x1acf   :  { %9452 = vmatmul.mubr.msk.f32.vlgmr.msra.gmra.mrb[66].mxu0 %vm230_vm6, %v5047_v24  ;;  %v8348_v24 = vcombine.high %v8313_v27, %v8321_v32  ;;  %v8303_v32 = vld [vmem:[%s11857_s6 + $0x130] sm:$0xff] }
0x1ad0   :  { %9591 = vmatpush3.bf16.msra.mxu0 %v9588_v38  ;;  %v8349_v38 = vcombine.low %v8314_v31, %v8322_v54  ;;  %v8311_v31 = vld [vmem:[%s11857_s6 + $0x170] sm:$0xff]  ;;  %v8312_v54 = vld [vmem:[%s11857_s6 + $0x178] sm:$0xff] }
0x1ad1   :  { %9593 = vmatprep.subr.bf16.mxu0 %v9592_v43 }
0x1ad4   :  { %9595 = vmatpush3.bf16.msra.mxu0 %v9592_v43  ;;  %v8307_v43 = vld [vmem:[%s11857_s6 + $0x150] sm:$0xff] }
0x1ad5   :  { %5687 = vmatprep.subr.bf16.mxu0 %v8334_v6 }
0x1b9e   :  { %v5198_v44 = vpop.f32.mrb[66].mxu1 }
0x1b9f   :  { %5222 = vrot.lane.b32.xlu1 %v5198_v44, %s11868_s24  ;;  %v9458_v48 = vpop.f32.mrb[67].mxu1  ;;  %v8300_v44 = vld [vmem:[%s11857_s6 + $0x118] sm:$0xff] }
0x1ba0   :  { %v8335_v48 = vcombine.low %v8299_v42, %v8307_v43 }
0x1ba2   :  { %v5122_v49 = vpop.f32.mrb[66].mxu0 }
0x1ba3   :  { %5220 = vrot.lane.b32.xlu0 %v5122_v49, %s11868_s24  ;;  %v9453_v50 = vpop.f32.mrb[67].mxu0  ;;  %v8336_v49 = vcombine.high %v8299_v42, %v8307_v43  ;;  %v8319_v43 = vld [vmem:[%s11857_s6 + $0x1b0] sm:$0xff] }
0x1ba4   :  { %v8308_v50 = vld [vmem:[%s11857_s6 + $0x158] sm:$0xff] }
0x1ba5   :  { %v8337_v52 = vcombine.low %v8300_v44, %v8308_v50  ;;  %v8338_v59 = vcombine.high %v8300_v44, %v8308_v50  ;;  %v8327_v44 = vld [vmem:[%s11857_s6 + $0x1f0] sm:$0xff]  ;;  %v8343_v50 = vcombine.low %v8303_v32, %v8311_v31 }
0x1c11   :  { %v5223_v62 = vpop.permute.xlu1 %5222 }
0x1c12   :  { %v5231_v3 = vsel %vm1583_vm7, %v5229_v2, %v5223_v62  ;;  %v5353_v2 = vrot.slane %v10979_v61, %v10374_v51 }
0x1c15   :  { %v5221_v1 = vpop.permute.xlu0 %5220 }
0x1c16   :  { %v5230_v29 = vsel %vm1583_vm7, %v5228_v0, %v5221_v1 }
0x1c17   :  { %9467 = vmatprep.mubr.msk.f32.mxu0 %vm145_vm4, %v5230_v29 }
0x1c18   :  { %9468 = vmatmul.mubr.msk.f32.vlgmr.msra.gmra.mrb[68].mxu0 %vm145_vm4, %v5231_v3 }
0x1c19   :  { %5719 = vmatprep.mubr.bf16.mxu0 %v10033_v25  ;;  %5688 = vmatpush1.bf16.msra.mxu0 %v8333_v45 }
0x1c1a   :  { %5689 = vmatprep.subr.bf16.mxu0 %v8350_v41  ;;  %v8344_v41 = vcombine.high %v8303_v32, %v8311_v31 }
0x1c1d   :  { %5690 = vmatpush1.bf16.msra.mxu0 %v8349_v38 }
0x1c1e   :  { %5773 = vmatprep.subr.bf16.mxu0 %v8338_v59  ;;  %v8360_v59 = vcombine.high %v8319_v43, %v8327_v44 }
0x1ceb   :  { %v9469_v30 = vpop.f32.mrb[68].mxu0 }
0x1cec   :  { %v5319_v33 = vadd.f32 %v9469_v30, %v5240_v34  ;;  %v5313_v4 = vpop.f32.mrb[69].mxu0 }
0x1ced   :  { %v5314_v5 = vadd.f32 %v5313_v4, %v5240_v34  ;;  %v5359_v34 = vrot.slane %v10979_v61, %v10377_v55 }
0x1cee   :  { %v5323_v7 = vadd.f32 %v5319_v33, %v10968_v46 }
0x1cef   :  { %v5322_v8 = vadd.f32 %v5314_v5, %v10966_v18  ;;  %v8297_v18 = vld [vmem:[%s11857_s6 + $0x100] sm:$0xff]  ;;  %v8315_v5 = vld [vmem:[%s11857_s6 + $0x190] sm:$0xff] }
0x1cf0   :  { %v5327_v10 = vsel %vm145_vm4, %v5323_v7, 0.0  ;;  %v8332_v21 = vcombine.high %v8297_v18, %v8305_v9  ;;  %v8331_v22 = vcombine.low %v8297_v18, %v8305_v9  ;;  %v8317_v9 = vld [vmem:[%s11857_s6 + $0x1a0] sm:$0xff] }
0x1cf1   :  { %5328 = vadd.xlane.f32.xlu1 %v5327_v10  ;;  %v5324_v11 = vsel %vm145_vm4, %v5322_v8, 0.0  ;;  %v8324_v10 = vld [vmem:[%s11857_s6 + $0x1d8] sm:$0xff]  ;;  %v8356_v6 = vcombine.high %v8317_v9, %v8325_v57 }
0x1cf2   :  { %5325 = vadd.xlane.f32.xlu0 %v5324_v11  ;;  %5644 = vmatprep.subr.bf16.mxu1 %v8332_v21  ;;  %v8318_v21 = vld [vmem:[%s11857_s6 + $0x1a8] sm:$0xff] }
0x1cf3   :  { %5645 = vmatpush1.bf16.msra.mxu1 %v8331_v22  ;;  %v8358_v27 = vcombine.high %v8318_v21, %v8326_v60  ;;  %v8357_v38 = vcombine.low %v8318_v21, %v8326_v60  ;;  %v9834_v21 = vld [vmem:[%s11858_s8 + $0x4f8] sm:$0xff]  }
0x1cf4   :  { %5646 = vmatprep.subr.bf16.mxu1 %v8348_v24  ;;  %v8304_v24 = vld [vmem:[%s11857_s6 + $0x138] sm:$0xff] }
0x1cf5   :  { %v8346_v42 = vcombine.high %v8304_v24, %v8312_v54  ;;  %v9835_v60 = vld [vmem:[%s11858_s8 + $0x438] sm:$0xff]  }
0x1cf7   :  { %5647 = vmatpush1.bf16.msra.mxu1 %v8347_v37  ;;  %v8355_v37 = vcombine.low %v8317_v9, %v8325_v57  ;;  %v9832_v9 = vld [vmem:[%s11858_s8 + $0x4b0] sm:$0xff]   ;;  %v9833_v57 = vld [vmem:[%s11858_s8 + $0x478] sm:$0xff]  }
0x1cf8   :  { %5730 = vmatprep.subr.bf16.mxu1 %v8336_v49  ;;  %v8328_v49 = vld [vmem:[%s11857_s6 + $0x1f8] sm:$0xff] }
0x1d7e   :  { %v5329_v12 = vpop.xlane.xlu1 %5328 }
0x1d7f   :  { %v5331_v13 = vmul.f32 0.03125, %v5329_v12  ;;  %v5326_v17 = vpop.xlane.xlu0 %5325 }
0x1d80   :  { %v5330_v20 = vmul.f32 0.03125, %v5326_v17 }
0x1d81   :  { %v5333_v23 = vsub.f32 %v5323_v7, %v5331_v13  ;;  %v8323_v7 = vld [vmem:[%s11857_s6 + $0x1d0] sm:$0xff] }
0x1d82   :  { %v5332_v26 = vsub.f32 %v5322_v8, %v5330_v20  ;;  %v8316_v8 = vld [vmem:[%s11857_s6 + $0x198] sm:$0xff]  ;;  %v8352_v13 = vcombine.high %v8315_v5, %v8323_v7  ;;  %v8301_v20 = vld [vmem:[%s11857_s6 + $0x120] sm:$0xff] }
0x1d83   :  { %v5335_v28 = vmul.f32 %v5333_v23, %v5333_v23  ;;  %v8354_v17 = vcombine.high %v8316_v8, %v8324_v10 }
0x1d84   :  { %v5334_v15 = vmul.f32 %v5332_v26, %v5332_v26 }
0x1d85   :  { %v5339_v46 = vsel %vm145_vm4, %v5335_v28, 0.0  ;;  %v8353_v28 = vcombine.low %v8316_v8, %v8324_v10  ;;  %v9819_v8 = vld [vmem:[%s11858_s8 + $0x418] sm:$0xff]  }
0x1d86   :  { %v5336_v14 = vsel %vm145_vm4, %v5334_v15, 0.0  ;;  %v8310_v15 = vld [vmem:[%s11857_s6 + $0x168] sm:$0xff]  ;;  %v9820_v10 = vld [vmem:[%s11858_s8 + $0x498] sm:$0xff]  }
0x1d87   :  { %5337 = vadd.xlane.f32.xlu0 %v5336_v14  ;;  %v8351_v14 = vcombine.low %v8315_v5, %v8323_v7  ;;  %v9817_v5 = vld [vmem:[%s11858_s8 + $0x458] sm:$0xff]  }
0x1d88   :  { %v9818_v7 = vld [vmem:[%s11858_s8 + $0x4d8] sm:$0xff]  }
0x1d8b   :  { %5340 = vadd.xlane.f32.xlu0 %v5339_v46 }
0x1e14   :  { %v5338_v47 = vpop.xlane.xlu0 %5337 }
0x1e15   :  { %v5342_v53 = vmul.f32 0.03125, %v5338_v47 }
0x1e17   :  { %v5344_v56 = vadd.f32 1e-05, %v5342_v53  ;;  %v8359_v53 = vcombine.low %v8319_v43, %v8327_v44 }
0x1e18   :  { %v5341_v62 = vpop.xlane.xlu0 %5340 }
0x1e19   :  { %10005 = vrsqrt.f32 %v5344_v56  ;;  %v5343_v63 = vmul.f32 0.03125, %v5341_v62  ;;  %v9805_v62 = vld [vmem:[%s11858_s8 + $0x440] sm:$0xff]  }
0x1e1b   :  { %v5345_v0 = vadd.f32 1e-05, %v5343_v63  ;;  %v9806_v63 = vld [vmem:[%s11858_s8 + $0x4c0] sm:$0xff]  }
0x1e1d   :  { %10007 = vrsqrt.f32 %v5345_v0  ;;  %v9807_v0 = vld [vmem:[%s11858_s8 + $0x400] sm:$0xff]  }
0x1e23   :  { %v10006_v1 = vpop.eup %10005 }
0x1e24   :  { %v5348_v29 = vmul.f32 %v10006_v1, %v5332_v26  ;;  %v8302_v26 = vld [vmem:[%s11857_s6 + $0x128] sm:$0xff]  ;;  %v9808_v1 = vld [vmem:[%s11858_s8 + $0x480] sm:$0xff]  }
0x1e25   :  { %v8342_v18 = vcombine.high %v8302_v26, %v8310_v15  ;;  %v8341_v45 = vcombine.low %v8302_v26, %v8310_v15  ;;  %v9826_v26 = vld [vmem:[%s11858_s8 + $0x4e8] sm:$0xff]  }
0x1e26   :  { %v5354_v30 = vmul.f32 %v5353_v2, %v5348_v29  ;;  %v9811_v29 = vld [vmem:[%s11858_s8 + $0x408] sm:$0xff]  }
0x1e27   :  { %v10008_v3 = vpop.eup %10007  ;;  %v9827_v15 = vld [vmem:[%s11858_s8 + $0x428] sm:$0xff]  }
0x1e28   :  { %v5349_v33 = vmul.f32 %v10008_v3, %v5333_v23  ;;  %v11215_v61 = vadd.f32 %v5359_v34, %v5354_v30  ;;  %v8309_v23 = vld [vmem:[%s11857_s6 + $0x160] sm:$0xff]  ;;  %v9812_v3 = vld [vmem:[%s11858_s8 + $0x488] sm:$0xff]   ;;  %v9814_v30 = vld [vmem:[%s11858_s8 + $0x4d0] sm:$0xff]  }
0x1e29   :  { %v8340_v46 = vcombine.high %v8301_v20, %v8309_v23  ;;  %v8339_v22 = vcombine.low %v8301_v20, %v8309_v23  ;;  %v9824_v20 = vld [vmem:[%s11858_s8 + $0x4a0] sm:$0xff]   ;;  %v9825_v23 = vld [vmem:[%s11858_s8 + $0x468] sm:$0xff]  }
0x1e2a   :  { %v5355_v4 = vmul.f32 %v5353_v2, %v5349_v33  ;;  %v9809_v2 = vld [vmem:[%s11858_s8 + $0x448] sm:$0xff]   ;;  %v9815_v33 = vld [vmem:[%s11858_s8 + $0x410] sm:$0xff]  }
0x1e2c   :  { %v11217_v11 = vadd.f32 %v5359_v34, %v5355_v4  ;;  %v9813_v34 = vld [vmem:[%s11858_s8 + $0x450] sm:$0xff]  }
0x1e2d   :  { %v9816_v4 = vld [vmem:[%s11858_s8 + $0x490] sm:$0xff]  }
0x1e2e   :  { %v11221_v12 = vpack.c.bf16 %v11217_v11, %v11215_v61 }
0x1e30   :  { %8363 = vmatmul.mubr.msk.bf16.vlgmr.msra.gmra.mrb[68].mxu1 %vm145_vm4, %v11221_v12  ;;  %8364 = vmatmul.mubr.msk.bf16.vlgmr.msra.gmra.mrb[72].mxu0 %vm145_vm4, %v11221_v12 }
0x1e31   :  { %5731 = vmatpush1.bf16.msra.mxu1 %v8335_v48  ;;  %5774 = vmatpush1.bf16.msra.mxu0 %v8337_v52  ;;  %v8320_v48 = vld [vmem:[%s11857_s6 + $0x1b8] sm:$0xff]  ;;  %v8345_v52 = vcombine.low %v8304_v24, %v8312_v54 }
0x1e32   :  { %5732 = vmatprep.subr.bf16.mxu1 %v8352_v13  ;;  %5775 = vmatprep.subr.bf16.mxu0 %v8354_v17  ;;  %v8362_v47 = vcombine.high %v8320_v48, %v8328_v49  ;;  %v8361_v56 = vcombine.low %v8320_v48, %v8328_v49  ;;  %v9822_v13 = vld [vmem:[%s11858_s8 + $0x4e0] sm:$0xff]  }
0x1e33   :  { %5762 = vmatprep.mubr.bf16.mxu1 %v10033_v25  ;;  %5805 = vmatprep.mubr.bf16.mxu0 %v10033_v25  ;;  %v9823_v17 = vld [vmem:[%s11858_s8 + $0x420] sm:$0xff]  }
0x1e35   :  { %5733 = vmatpush1.bf16.msra.mxu1 %v8351_v14  ;;  %5776 = vmatpush1.bf16.msra.mxu0 %v8353_v28  ;;  %v9828_v14 = vld [vmem:[%s11858_s8 + $0x4a8] sm:$0xff]   ;;  %v9829_v28 = vld [vmem:[%s11858_s8 + $0x470] sm:$0xff]  }
0x1e36   :  { %5816 = vmatprep.subr.bf16.mxu1 %v8340_v46  ;;  %5859 = vmatprep.subr.bf16.mxu0 %v8342_v18  ;;  %v9830_v46 = vld [vmem:[%s11858_s8 + $0x4f0] sm:$0xff]  }
0x1e37   :  { %v9831_v18 = vld [vmem:[%s11858_s8 + $0x430] sm:$0xff]  }
0x1e38   :  { %8365 = vmatmul.mubr.msk.bf16.vlgmr.msra.gmra.mrb[72].mxu1 %vm145_vm4, %v11221_v12  ;;  %8366 = vmatmul.mubr.msk.bf16.vlgmr.msra.gmra.mrb[76].mxu0 %vm145_vm4, %v11221_v12 }
0x1e39   :  { %5817 = vmatpush1.bf16.msra.mxu1 %v8339_v22  ;;  %5860 = vmatpush1.bf16.msra.mxu0 %v8341_v45  ;;  %v9836_v22 = vld [vmem:[%s11858_s8 + $0x4b8] sm:$0xff]   ;;  %v9837_v45 = vld [vmem:[%s11858_s8 + $0x540] sm:$0xff]  }
0x1e3a   :  { %5818 = vmatprep.subr.bf16.mxu1 %v8356_v6  ;;  %5861 = vmatprep.subr.bf16.mxu0 %v8358_v27  ;;  %v9838_v6 = vld [vmem:[%s11858_s8 + $0x5c0] sm:$0xff]   ;;  %v8329_v27 = vld [vmem:[%s11859_s7 + $0x10] sm:$0xff] }
0x1e3b   :  { %5848 = vmatprep.mubr.bf16.mxu1 %v10033_v25  ;;  %5891 = vmatprep.mubr.bf16.mxu0 %v10033_v25  ;;  %v5404_v32 = vrot.slane %v8329_v27, %v10141_v19  ;;  %v5412_v31 = vrot.slane %v8329_v27, %v10374_v51  ;;  %v5408_v24 = vrot.slane %v8329_v27, %v10321_v58 }
0x1e3c   :  { %v5416_v54 = vrot.slane %v8329_v27, %v10377_v55 }
0x1e3d   :  { %5819 = vmatpush1.bf16.msra.mxu1 %v8355_v37  ;;  %5862 = vmatpush1.bf16.msra.mxu0 %v8357_v38 }
0x1e3e   :  { %5902 = vmatprep.subr.bf16.mxu1 %v8344_v41  ;;  %5945 = vmatprep.subr.bf16.mxu0 %v8346_v42 }
0x1e40   :  { %8367 = vmatmul.mubr.msk.bf16.vlgmr.msra.gmra.mrb[76].mxu1 %vm145_vm4, %v11221_v12  ;;  %8368 = vmatmul.mubr.msk.bf16.vlgmr.msra.gmra.mrb[80].mxu0 %vm145_vm4, %v11221_v12 }
0x1e41   :  { %5903 = vmatpush1.bf16.msra.mxu1 %v8343_v50  ;;  %5946 = vmatpush1.bf16.msra.mxu0 %v8345_v52 }
0x1e42   :  { %5904 = vmatprep.subr.bf16.mxu1 %v8360_v59  ;;  %5947 = vmatprep.subr.bf16.mxu0 %v8362_v47 }
0x1e43   :  { %5934 = vmatprep.mubr.bf16.mxu1 %v10033_v25  ;;  %5977 = vmatprep.mubr.bf16.mxu0 %v10033_v25  ;;  %v9810_v25 = vld [vmem:[%s11858_s8 + $0x4c8] sm:$0xff]  }
0x1e45   :  { %5905 = vmatpush1.bf16.msra.mxu1 %v8359_v53  ;;  %5948 = vmatpush1.bf16.msra.mxu0 %v8361_v56 }
0x1e46   :  { %9043 = vmatprep.subr.bf16.mxu1 %v9805_v62  ;;  %9065 = vmatprep.subr.bf16.mxu0 %v9806_v63  ;;  %v5420_v62 = vrot.slane %v8329_v27, %v10585_v35  ;;  %v5428_v63 = vrot.slane %v8329_v27, %v10588_v36 }
0x1e48   :  { %8369 = vmatmul.mubr.msk.bf16.vlgmr.msra.gmra.mrb[80].mxu1 %vm145_vm4, %v11221_v12  ;;  %8370 = vmatmul.mubr.msk.bf16.vlgmr.msra.gmra.mrb[84].mxu0 %vm145_vm4, %v11221_v12  ;;  %v9821_v12 = vld [vmem:[%s11858_s8 + $0x460] sm:$0xff]  }
0x1e49   :  { %9044 = vmatpush3.bf16.msra.mxu1 %v9807_v0  ;;  %9066 = vmatpush3.bf16.msra.mxu0 %v9808_v1 }
0x1e4a   :  { %9045 = vmatprep.subr.bf16.mxu1 %v9809_v2  ;;  %9067 = vmatprep.subr.bf16.mxu0 %v9810_v25  ;;  %v5424_v2 = vrot.slane %v8329_v27, %v10591_v39  ;;  %v5432_v25 = vrot.slane %v8329_v27, %v10594_v40 }
0x1e4d   :  { %9046 = vmatpush3.bf16.msra.mxu1 %v9811_v29  ;;  %9068 = vmatpush3.bf16.msra.mxu0 %v9812_v3 }
0x1e4e   :  { %9047 = vmatprep.subr.bf16.mxu1 %v9813_v34  ;;  %9069 = vmatprep.subr.bf16.mxu0 %v9814_v30 }
0x1e51   :  { %9048 = vmatpush3.bf16.msra.mxu1 %v9815_v33  ;;  %9070 = vmatpush3.bf16.msra.mxu0 %v9816_v4 }
0x1e52   :  { %9049 = vmatprep.subr.bf16.mxu1 %v9817_v5  ;;  %9071 = vmatprep.subr.bf16.mxu0 %v9818_v7 }
0x1e55   :  { %9050 = vmatpush3.bf16.msra.mxu1 %v9819_v8  ;;  %9072 = vmatpush3.bf16.msra.mxu0 %v9820_v10  ;;  %v11409_v8 = vld [vmem:[%s11859_s7 + $0x18] sm:$0xff] }
0x1e56   :  { %9051 = vmatprep.subr.bf16.mxu1 %v9821_v12  ;;  %9073 = vmatprep.subr.bf16.mxu0 %v9822_v13  ;;  %v5444_v27 = vrot.slane %v11409_v8, %v10374_v51  ;;  %v9844_v51 = vld [vmem:[%s11858_s8 + $0x588] sm:$0xff]  }
0x1e59   :  { %9052 = vmatpush3.bf16.msra.mxu1 %v9823_v17  ;;  %9074 = vmatpush3.bf16.msra.mxu0 %v9824_v20 }
0x1e5a   :  { %9053 = vmatprep.subr.bf16.mxu1 %v9825_v23  ;;  %9075 = vmatprep.subr.bf16.mxu0 %v9826_v26  ;;  %v9839_v26 = vld [vmem:[%s11858_s8 + $0x500] sm:$0xff]  }
0x1e5d   :  { %9054 = vmatpush3.bf16.msra.mxu1 %v9827_v15  ;;  %9076 = vmatpush3.bf16.msra.mxu0 %v9828_v14  ;;  %v9840_v15 = vld [vmem:[%s11858_s8 + $0x580] sm:$0xff]  }
0x1e5e   :  { %9055 = vmatprep.subr.bf16.mxu1 %v9829_v28  ;;  %9077 = vmatprep.subr.bf16.mxu0 %v9830_v46 }
0x1e61   :  { %9056 = vmatpush3.bf16.msra.mxu1 %v9831_v18  ;;  %9078 = vmatpush3.bf16.msra.mxu0 %v9832_v9  ;;  %v9841_v9 = vld [vmem:[%s11858_s8 + $0x548] sm:$0xff]  }
0x1e62   :  { %9057 = vmatprep.subr.bf16.mxu1 %v9833_v57  ;;  %9079 = vmatprep.subr.bf16.mxu0 %v9834_v21  ;;  %v9842_v57 = vld [vmem:[%s11858_s8 + $0x5c8] sm:$0xff]   ;;  %v5436_v21 = vrot.slane %v11409_v8, %v10141_v19 }
0x1e65   :  { %9058 = vmatpush3.bf16.msra.mxu1 %v9835_v60  ;;  %9080 = vmatpush3.bf16.msra.mxu0 %v9836_v22 }
0x1e66   :  { %9087 = vmatprep.subr.bf16.mxu1 %v9837_v45  ;;  %9109 = vmatprep.subr.bf16.mxu0 %v9838_v6 }
0x1f03   :  { %v5678_v37 = vpop.f32.mrb[68].mxu1  ;;  %v5721_v38 = vpop.f32.mrb[72].mxu0 }
0x1f04   :  { %v5679_v41 = vadd.f32 %v5678_v37, %v5404_v32  ;;  %v5722_v42 = vadd.f32 %v5721_v38, %v5412_v31  ;;  %v5680_v43 = vpop.f32.mrb[69].mxu1  ;;  %v5723_v44 = vpop.f32.mrb[73].mxu0  ;;  %v5440_v37 = vrot.slane %v11409_v8, %v10321_v58  ;;  %v9845_v58 = vld [vmem:[%s11858_s8 + $0x550] sm:$0xff]  }
0x1f05   :  { %v5681_v48 = vadd.f32 %v5680_v43, %v5408_v24  ;;  %v5724_v49 = vadd.f32 %v5723_v44, %v5416_v54  ;;  %v5682_v50 = vpop.f32.mrb[70].mxu1  ;;  %v5725_v52 = vpop.f32.mrb[74].mxu0  ;;  %v5448_v43 = vrot.slane %v11409_v8, %v10377_v55 }
0x1f06   :  { %v5683_v59 = vadd.f32 %v5682_v50, %v5404_v32  ;;  %v5726_v47 = vadd.f32 %v5725_v52, %v5412_v31  ;;  %v5684_v53 = vpop.f32.mrb[71].mxu1  ;;  %v5727_v56 = vpop.f32.mrb[75].mxu0  ;;  %v5988_v29 = vmax.f32 %v5679_v41, 0.0  ;;  %v5990_v3 = vmax.f32 %v5722_v42, 0.0  ;;  %v9843_v42 = vld [vmem:[%s11858_s8 + $0x508] sm:$0xff]   ;;  %v9846_v52 = vld [vmem:[%s11858_s8 + $0x5d0] sm:$0xff]  }
0x1f07   :  { %v5685_v0 = vadd.f32 %v5684_v53, %v5408_v24  ;;  %v5728_v1 = vadd.f32 %v5727_v56, %v5416_v54  ;;  %v5989_v33 = vmax.f32 %v5681_v48, 0.0  ;;  %v5991_v4 = vmax.f32 %v5724_v49, 0.0 }
0x1f08   :  { %v6004_v34 = vmax.f32 %v5683_v59, 0.0  ;;  %v6006_v30 = vmax.f32 %v5726_v47, 0.0 }
0x1f09   :  { %v6005_v5 = vmax.f32 %v5685_v0, 0.0  ;;  %v6007_v7 = vmax.f32 %v5728_v1, 0.0 }
0x1f0a   :  { %v6020_v10 = vpack.c.bf16 %v6004_v34, %v5988_v29  ;;  %v6022_v12 = vpack.c.bf16 %v6006_v30, %v5990_v3  ;;  %v9848_v29 = vld [vmem:[%s11858_s8 + $0x590] sm:$0xff]  }
0x1f0b   :  { %v6021_v13 = vpack.c.bf16 %v6005_v5, %v5989_v33  ;;  %v6023_v17 = vpack.c.bf16 %v6007_v7, %v5991_v4  ;;  %v5764_v20 = vpop.f32.mrb[72].mxu1  ;;  %v5807_v23 = vpop.f32.mrb[76].mxu0  ;;  %v9849_v4 = vld [vmem:[%s11858_s8 + $0x558] sm:$0xff]  }
0x1f0c   :  { %v5765_v14 = vadd.f32 %v5764_v20, %v5420_v62  ;;  %v5808_v28 = vadd.f32 %v5807_v23, %v5428_v63  ;;  %v5766_v46 = vpop.f32.mrb[73].mxu1  ;;  %v5809_v18 = vpop.f32.mrb[77].mxu0  ;;  %v9850_v5 = vld [vmem:[%s11858_s8 + $0x5d8] sm:$0xff]  }
0x1f0d   :  { %v5767_v60 = vadd.f32 %v5766_v46, %v5424_v2  ;;  %v5810_v22 = vadd.f32 %v5809_v18, %v5432_v25  ;;  %v5768_v45 = vpop.f32.mrb[74].mxu1  ;;  %v5811_v6 = vpop.f32.mrb[78].mxu0  ;;  %7097 = vmatprep.mubr.bf16.mxu1 %v6021_v13  ;;  %7138 = vmatprep.mubr.bf16.mxu0 %v6023_v17  ;;  %v5452_v17 = vrot.slane %v11409_v8, %v10585_v35 }
0x1f0e   :  { %v5769_v32 = vadd.f32 %v5768_v45, %v5420_v62  ;;  %v5812_v31 = vadd.f32 %v5811_v6, %v5428_v63  ;;  %v5770_v24 = vpop.f32.mrb[75].mxu1  ;;  %v5813_v54 = vpop.f32.mrb[79].mxu0  ;;  %7098 = vmatmul.mubr.bf16.vlgmr.msra.gmra.mrb[84].mxu1 %v6020_v10  ;;  %7139 = vmatmul.mubr.bf16.vlgmr.msra.gmra.mrb[88].mxu0 %v6022_v12  ;;  %v5992_v44 = vmax.f32 %v5765_v14, 0.0  ;;  %v5994_v48 = vmax.f32 %v5808_v28, 0.0 }
0x1f0f   :  { %v5771_v38 = vadd.f32 %v5770_v24, %v5424_v2  ;;  %v5814_v41 = vadd.f32 %v5813_v54, %v5432_v25  ;;  %9088 = vmatpush3.bf16.msra.mxu1 %v9839_v26  ;;  %9110 = vmatpush3.bf16.msra.mxu0 %v9840_v15  ;;  %v5993_v59 = vmax.f32 %v5767_v60, 0.0  ;;  %v5995_v47 = vmax.f32 %v5810_v22, 0.0  ;;  %v9847_v25 = vld [vmem:[%s11858_s8 + $0x510] sm:$0xff]  }
0x1f10   :  { %v6008_v49 = vmax.f32 %v5769_v32, 0.0  ;;  %v6010_v50 = vmax.f32 %v5812_v31, 0.0  ;;  %9089 = vmatprep.subr.bf16.mxu1 %v9841_v9  ;;  %9111 = vmatprep.subr.bf16.mxu0 %v9842_v57  ;;  %v5460_v14 = vrot.slane %v11409_v8, %v10588_v36  ;;  %v5456_v28 = vrot.slane %v11409_v8, %v10591_v39  ;;  %v9851_v9 = vld [vmem:[%s11858_s8 + $0x518] sm:$0xff]   ;;  %v9854_v32 = vld [vmem:[%s11858_s8 + $0x5e0] sm:$0xff]  }
0x1f11   :  { %v6009_v53 = vmax.f32 %v5771_v38, 0.0  ;;  %v6011_v56 = vmax.f32 %v5814_v41, 0.0  ;;  %v9852_v57 = vld [vmem:[%s11858_s8 + $0x598] sm:$0xff]  }
0x1f12   :  { %v11443_v62 = vpack.c.bf16 %v6008_v49, %v5992_v44  ;;  %v11445_v55 = vpack.c.bf16 %v6010_v50, %v5994_v48  ;;  %v9856_v44 = vld [vmem:[%s11858_s8 + $0x5a0] sm:$0xff]  }
0x1f13   :  { %v6025_v63 = vpack.c.bf16 %v6009_v53, %v5993_v59  ;;  %v6027_v0 = vpack.c.bf16 %v6011_v56, %v5995_v47  ;;  %9090 = vmatpush3.bf16.msra.mxu1 %v9843_v42  ;;  %9112 = vmatpush3.bf16.msra.mxu0 %v9844_v51  ;;  %v5850_v1 = vpop.f32.mrb[76].mxu1  ;;  %v5893_v2 = vpop.f32.mrb[80].mxu0  ;;  %v9858_v59 = vld [vmem:[%s11858_s8 + $0x5e8] sm:$0xff]  }
0x1f14   :  { %v5851_v3 = vadd.f32 %v5850_v1, %v5436_v21  ;;  %v5894_v34 = vadd.f32 %v5893_v2, %v5444_v27  ;;  %v5852_v30 = vpop.f32.mrb[77].mxu1  ;;  %v5895_v33 = vpop.f32.mrb[81].mxu0  ;;  %9091 = vmatprep.subr.bf16.mxu1 %v9845_v58  ;;  %9113 = vmatprep.subr.bf16.mxu0 %v9846_v52  ;;  %v9857_v52 = vld [vmem:[%s11858_s8 + $0x568] sm:$0xff]  }
0x1f15   :  { %v5853_v7 = vadd.f32 %v5852_v30, %v5440_v37  ;;  %v5896_v10 = vadd.f32 %v5895_v33, %v5448_v43  ;;  %v5854_v12 = vpop.f32.mrb[78].mxu1  ;;  %v5897_v13 = vpop.f32.mrb[82].mxu0  ;;  %7179 = vmatprep.mubr.bf16.mxu1 %v6025_v63  ;;  %7220 = vmatprep.mubr.bf16.mxu0 %v6027_v0  ;;  %v9860_v30 = vld [vmem:[%s11858_s8 + $0x5a8] sm:$0xff]  }
0x1f16   :  { %v5855_v20 = vadd.f32 %v5854_v12, %v5436_v21  ;;  %v5898_v23 = vadd.f32 %v5897_v13, %v5444_v27  ;;  %v5856_v26 = vpop.f32.mrb[79].mxu1  ;;  %v5899_v15 = vpop.f32.mrb[83].mxu0  ;;  %v5464_v21 = vrot.slane %v11409_v8, %v10594_v40  ;;  %v5996_v60 = vmax.f32 %v5851_v3, 0.0  ;;  %v9853_v27 = vld [vmem:[%s11858_s8 + $0x560] sm:$0xff]   ;;  %v9862_v12 = vld [vmem:[%s11858_s8 + $0x5f0] sm:$0xff]  }
0x1f17   :  { %v5857_v46 = vadd.f32 %v5856_v26, %v5440_v37  ;;  %v5900_v18 = vadd.f32 %v5899_v15, %v5448_v43  ;;  %9092 = vmatpush3.bf16.msra.mxu1 %v9847_v25  ;;  %9114 = vmatpush3.bf16.msra.mxu0 %v9848_v29  ;;  %v5998_v22 = vmax.f32 %v5894_v34, 0.0  ;;  %v5997_v31 = vmax.f32 %v5853_v7, 0.0  ;;  %v9855_v43 = vld [vmem:[%s11858_s8 + $0x520] sm:$0xff]   ;;  %v9859_v34 = vld [vmem:[%s11858_s8 + $0x528] sm:$0xff]  }
0x1f18   :  { %v6012_v45 = vmax.f32 %v5855_v20, 0.0  ;;  %v6014_v6 = vmax.f32 %v5898_v23, 0.0  ;;  %9093 = vmatprep.subr.bf16.mxu1 %v9849_v4  ;;  %9115 = vmatprep.subr.bf16.mxu0 %v9850_v5  ;;  %v5999_v24 = vmax.f32 %v5896_v10, 0.0  ;;  %v9861_v10 = vld [vmem:[%s11858_s8 + $0x570] sm:$0xff]  }
0x1f19   :  { %v6013_v54 = vmax.f32 %v5857_v46, 0.0  ;;  %v6015_v37 = vmax.f32 %v5900_v18, 0.0  ;;  %v9863_v46 = vld [vmem:[%s11858_s8 + $0x530] sm:$0xff]  }
0x1f1a   :  { %v11479_v38 = vpack.c.bf16 %v6012_v45, %v5996_v60  ;;  %v11481_v40 = vpack.c.bf16 %v6014_v6, %v5998_v22  ;;  %v9864_v18 = vld [vmem:[%s11858_s8 + $0x5b0] sm:$0xff]   ;;  %v9868_v60 = vld [vmem:[%s11858_s8 + $0x5b8] sm:$0xff]   ;;  %v9869_v22 = vld [vmem:[%s11858_s8 + $0x640] sm:$0xff]  }
0x1f1b   :  { %v11483_v8 = vpack.c.bf16 %v6013_v54, %v5997_v31  ;;  %v11485_v41 = vpack.c.bf16 %v6015_v37, %v5999_v24  ;;  %9094 = vmatpush3.bf16.msra.mxu1 %v9851_v9  ;;  %9116 = vmatpush3.bf16.msra.mxu0 %v9852_v57  ;;  %v5936_v42 = vpop.f32.mrb[80].mxu1  ;;  %v5979_v51 = vpop.f32.mrb[84].mxu0  ;;  %v9865_v9 = vld [vmem:[%s11858_s8 + $0x578] sm:$0xff]   ;;  %v9870_v45 = vld [vmem:[%s11858_s8 + $0x6c0] sm:$0xff]   ;;  %v9874_v31 = vld [vmem:[%s11858_s8 + $0x6c8] sm:$0xff]  }
0x1f1c   :  { %v5937_v48 = vadd.f32 %v5936_v42, %v5452_v17  ;;  %v5980_v49 = vadd.f32 %v5979_v51, %v5460_v14  ;;  %v5938_v50 = vpop.f32.mrb[81].mxu1  ;;  %v5981_v58 = vpop.f32.mrb[85].mxu0  ;;  %9095 = vmatprep.subr.bf16.mxu1 %v9853_v27  ;;  %9117 = vmatprep.subr.bf16.mxu0 %v9854_v32  ;;  %v9866_v57 = vld [vmem:[%s11858_s8 + $0x5f8] sm:$0xff]   ;;  %v9871_v6 = vld [vmem:[%s11858_s8 + $0x600] sm:$0xff]   ;;  %v9873_v32 = vld [vmem:[%s11858_s8 + $0x648] sm:$0xff]  }
0x1f1d   :  { %v5939_v47 = vadd.f32 %v5938_v50, %v5456_v28  ;;  %v5982_v53 = vadd.f32 %v5981_v58, %v5464_v21  ;;  %v5940_v56 = vpop.f32.mrb[82].mxu1  ;;  %v5983_v63 = vpop.f32.mrb[86].mxu0  ;;  %v9872_v27 = vld [vmem:[%s11858_s8 + $0x680] sm:$0xff]   ;;  %v9875_v24 = vld [vmem:[%s11858_s8 + $0x608] sm:$0xff]   ;;  %v9879_v37 = vld [vmem:[%s11858_s8 + $0x610] sm:$0xff]  }
0x1f1e   :  { %v5941_v0 = vadd.f32 %v5940_v56, %v5452_v17  ;;  %v5984_v1 = vadd.f32 %v5983_v63, %v5460_v14  ;;  %v5942_v2 = vpop.f32.mrb[83].mxu1  ;;  %v5985_v25 = vpop.f32.mrb[87].mxu0  ;;  %v6000_v33 = vmax.f32 %v5937_v48, 0.0  ;;  %v6002_v4 = vmax.f32 %v5980_v49, 0.0  ;;  %v9876_v54 = vld [vmem:[%s11858_s8 + $0x688] sm:$0xff]   ;;  %v9882_v42 = vld [vmem:[%s11858_s8 + $0x6d8] sm:$0xff]  }
0x1f1f   :  { %v5943_v29 = vadd.f32 %v5942_v2, %v5456_v28  ;;  %v5986_v3 = vadd.f32 %v5985_v25, %v5464_v21  ;;  %9096 = vmatpush3.bf16.msra.mxu1 %v9855_v43  ;;  %9118 = vmatpush3.bf16.msra.mxu0 %v9856_v44  ;;  %v6001_v13 = vmax.f32 %v5939_v47, 0.0  ;;  %v6003_v17 = vmax.f32 %v5982_v53, 0.0  ;;  %v9867_v21 = vld [vmem:[%s11858_s8 + $0x538] sm:$0xff]   ;;  %v9885_v44 = vld [vmem:[%s11858_s8 + $0x660] sm:$0xff]   ;;  %v9889_v58 = vld [vmem:[%s11858_s8 + $0x668] sm:$0xff]  }
0x1f20   :  { %v6016_v5 = vmax.f32 %v5941_v0, 0.0  ;;  %v6018_v7 = vmax.f32 %v5984_v1, 0.0  ;;  %9097 = vmatprep.subr.bf16.mxu1 %v9857_v52  ;;  %9119 = vmatprep.subr.bf16.mxu0 %v9858_v59  ;;  %v9883_v51 = vld [vmem:[%s11858_s8 + $0x618] sm:$0xff]   ;;  %v9886_v48 = vld [vmem:[%s11858_s8 + $0x6e0] sm:$0xff]   ;;  %v9890_v52 = vld [vmem:[%s11858_s8 + $0x6e8] sm:$0xff]  }
0x1f21   :  { %v6017_v20 = vmax.f32 %v5943_v29, 0.0  ;;  %v6019_v23 = vmax.f32 %v5986_v3, 0.0  ;;  %v9884_v43 = vld [vmem:[%s11858_s8 + $0x698] sm:$0xff]   ;;  %v9887_v49 = vld [vmem:[%s11858_s8 + $0x620] sm:$0xff]   ;;  %v9891_v59 = vld [vmem:[%s11858_s8 + $0x628] sm:$0xff]  }
0x1f22   :  { %v11511_v26 = vpack.c.bf16 %v6016_v5, %v6000_v33  ;;  %v11513_v15 = vpack.c.bf16 %v6018_v7, %v6002_v4  ;;  %v9888_v50 = vld [vmem:[%s11858_s8 + $0x6a0] sm:$0xff]   ;;  %v9892_v47 = vld [vmem:[%s11858_s8 + $0x6a8] sm:$0xff]   ;;  %v9893_v53 = vld [vmem:[%s11858_s8 + $0x670] sm:$0xff]  }
0x1f23   :  { %v11515_v14 = vpack.c.bf16 %v6017_v20, %v6001_v13  ;;  %v11517_v28 = vpack.c.bf16 %v6019_v23, %v6003_v17  ;;  %9098 = vmatpush3.bf16.msra.mxu1 %v9859_v34  ;;  %9120 = vmatpush3.bf16.msra.mxu0 %v9860_v30  ;;  %v9894_v56 = vld [vmem:[%s11858_s8 + $0x6f0] sm:$0xff]   ;;  %v9897_v1 = vld [vmem:[%s11858_s8 + $0x678] sm:$0xff]   ;;  %v9901_v3 = vld [vmem:[%s11858_s8 + $0x740] sm:$0xff]  }
0x1f24   :  { %9099 = vmatprep.subr.bf16.mxu1 %v9861_v10  ;;  %9121 = vmatprep.subr.bf16.mxu0 %v9862_v12  ;;  %v9895_v63 = vld [vmem:[%s11858_s8 + $0x630] sm:$0xff]   ;;  %v9898_v2 = vld [vmem:[%s11858_s8 + $0x6f8] sm:$0xff]   ;;  %v9902_v34 = vld [vmem:[%s11858_s8 + $0x7c0] sm:$0xff]  }
0x1f25   :  { %v9896_v0 = vld [vmem:[%s11858_s8 + $0x6b0] sm:$0xff]   ;;  %v9899_v25 = vld [vmem:[%s11858_s8 + $0x638] sm:$0xff]   ;;  %v9903_v30 = vld [vmem:[%s11858_s8 + $0x700] sm:$0xff]  }
0x1f26   :  { %v9900_v29 = vld [vmem:[%s11858_s8 + $0x6b8] sm:$0xff]   ;;  %v9904_v33 = vld [vmem:[%s11858_s8 + $0x780] sm:$0xff]   ;;  %v9905_v4 = vld [vmem:[%s11858_s8 + $0x748] sm:$0xff]  }
0x1f27   :  { %9100 = vmatpush3.bf16.msra.mxu1 %v9863_v46  ;;  %9122 = vmatpush3.bf16.msra.mxu0 %v9864_v18  ;;  %v9906_v5 = vld [vmem:[%s11858_s8 + $0x7c8] sm:$0xff]   ;;  %v9911_v12 = vld [vmem:[%s11858_s8 + $0x710] sm:$0xff]   ;;  %v9913_v17 = vld [vmem:[%s11858_s8 + $0x758] sm:$0xff]  }
0x1f28   :  { %9101 = vmatprep.subr.bf16.mxu1 %v9865_v9  ;;  %9123 = vmatprep.subr.bf16.mxu0 %v9866_v57  ;;  %v9907_v7 = vld [vmem:[%s11858_s8 + $0x708] sm:$0xff]   ;;  %v9912_v13 = vld [vmem:[%s11858_s8 + $0x790] sm:$0xff]   ;;  %v9914_v20 = vld [vmem:[%s11858_s8 + $0x7d8] sm:$0xff]  }
0x1f29   :  { %v9908_v10 = vld [vmem:[%s11858_s8 + $0x788] sm:$0xff]   ;;  %v9915_v23 = vld [vmem:[%s11858_s8 + $0x718] sm:$0xff]   ;;  %v9918_v46 = vld [vmem:[%s11858_s8 + $0x7e0] sm:$0xff]  }
0x1f2a   :  { %v9919_v18 = vld [vmem:[%s11858_s8 + $0x720] sm:$0xff]   ;;  %v9921_v57 = vld [vmem:[%s11858_s8 + $0x768] sm:$0xff]  }
0x1f2b   :  { %9102 = vmatpush3.bf16.msra.mxu1 %v9867_v21  ;;  %9124 = vmatpush3.bf16.msra.mxu0 %v9868_v60  ;;  %v9920_v9 = vld [vmem:[%s11858_s8 + $0x7a0] sm:$0xff]   ;;  %v9922_v21 = vld [vmem:[%s11858_s8 + $0x7e8] sm:$0xff]  }
0x1f2c   :  { %9131 = vmatprep.subr.bf16.mxu1 %v9869_v22  ;;  %9153 = vmatprep.subr.bf16.mxu0 %v9870_v45  ;;  %v9923_v60 = vld [vmem:[%s11858_s8 + $0x728] sm:$0xff]   ;;  %v9925_v45 = vld [vmem:[%s11858_s8 + $0x770] sm:$0xff]  }
0x1f2d   :  { %v9924_v22 = vld [vmem:[%s11858_s8 + $0x7a8] sm:$0xff]  }
0x1f2e   :  { %7180 = vmatmul.mubr.bf16.vlgmr.msra.gmra.mrb[88].mxu1 %v11443_v62  ;;  %7221 = vmatmul.mubr.bf16.vlgmr.msra.gmra.mrb[92].mxu0 %v11445_v55  ;;  %v9877_v62 = vld [vmem:[%s11858_s8 + $0x650] sm:$0xff]  }
0x1f2f   :  { %9132 = vmatpush3.bf16.msra.mxu1 %v9871_v6  ;;  %7261 = vmatprep.mubr.bf16.mxu1 %v11483_v8  ;;  %v9878_v55 = vld [vmem:[%s11858_s8 + $0x6d0] sm:$0xff]  }
0x1f30   :  { %9154 = vmatpush3.bf16.msra.mxu0 %v9872_v27  ;;  %7302 = vmatprep.mubr.bf16.mxu0 %v11485_v41  ;;  %v9880_v8 = vld [vmem:[%s11858_s8 + $0x690] sm:$0xff]   ;;  %v9881_v41 = vld [vmem:[%s11858_s8 + $0x658] sm:$0xff]  }
0x1f31   :  { %9133 = vmatprep.subr.bf16.mxu1 %v9873_v32  ;;  %9155 = vmatprep.subr.bf16.mxu0 %v9874_v31  ;;  %v9926_v6 = vld [vmem:[%s11858_s8 + $0x7f0] sm:$0xff]   ;;  %v9929_v31 = vld [vmem:[%s11858_s8 + $0x778] sm:$0xff]  }
0x1f32   :  { %v9927_v27 = vld [vmem:[%s11858_s8 + $0x730] sm:$0xff]  }
0x1f33   :  { %9134 = vmatpush3.bf16.msra.mxu1 %v9875_v24  ;;  %v9928_v32 = vld [vmem:[%s11858_s8 + $0x7b0] sm:$0xff]   ;;  %v9930_v24 = vld [vmem:[%s11858_s8 + $0x7f8] sm:$0xff]  }
0x1f34   :  { %9156 = vmatpush3.bf16.msra.mxu0 %v9876_v54  ;;  %9135 = vmatprep.subr.bf16.mxu1 %v9877_v62  ;;  %v9931_v54 = vld [vmem:[%s11858_s8 + $0x738] sm:$0xff]  }
0x1f35   :  { %9157 = vmatprep.subr.bf16.mxu0 %v9878_v55  ;;  %v9932_v62 = vld [vmem:[%s11858_s8 + $0x7b8] sm:$0xff]  }
0x1f37   :  { %9136 = vmatpush3.bf16.msra.mxu1 %v9879_v37 }
0x1f38   :  { %9158 = vmatpush3.bf16.msra.mxu0 %v9880_v8  ;;  %9137 = vmatprep.subr.bf16.mxu1 %v9881_v41  ;;  %v11746_v8 = vld [vmem:[%s11855_s5 + $0x8] sm:$0x7f] }
0x1f39   :  { %9159 = vmatprep.subr.bf16.mxu0 %v9882_v42  ;;  %v6296_v41 = vrot.slane %v11746_v8, %v10585_v35 }
0x1f3b   :  { %9138 = vmatpush3.bf16.msra.mxu1 %v9883_v51 }
0x1f3c   :  { %9160 = vmatpush3.bf16.msra.mxu0 %v9884_v43  ;;  %9139 = vmatprep.subr.bf16.mxu1 %v9885_v44 }
0x1f3d   :  { %9161 = vmatprep.subr.bf16.mxu0 %v9886_v48 }
0x1f3f   :  { %9140 = vmatpush3.bf16.msra.mxu1 %v9887_v49 }
0x1f40   :  { %9162 = vmatpush3.bf16.msra.mxu0 %v9888_v50  ;;  %9141 = vmatprep.subr.bf16.mxu1 %v9889_v58 }
0x1f41   :  { %9163 = vmatprep.subr.bf16.mxu0 %v9890_v52 }
0x1f43   :  { %9142 = vmatpush3.bf16.msra.mxu1 %v9891_v59 }
0x1f44   :  { %9164 = vmatpush3.bf16.msra.mxu0 %v9892_v47  ;;  %9143 = vmatprep.subr.bf16.mxu1 %v9893_v53 }
0x1f45   :  { %9165 = vmatprep.subr.bf16.mxu0 %v9894_v56 }
0x1f47   :  { %9144 = vmatpush3.bf16.msra.mxu1 %v9895_v63 }
0x1f48   :  { %9166 = vmatpush3.bf16.msra.mxu0 %v9896_v0  ;;  %9145 = vmatprep.subr.bf16.mxu1 %v9897_v1 }
0x1f49   :  { %9167 = vmatprep.subr.bf16.mxu0 %v9898_v2 }
0x1f4b   :  { %9146 = vmatpush3.bf16.msra.mxu1 %v9899_v25 }
0x1f4c   :  { %9168 = vmatpush3.bf16.msra.mxu0 %v9900_v29  ;;  %9175 = vmatprep.subr.bf16.mxu1 %v9901_v3 }
0x1f4d   :  { %9197 = vmatprep.subr.bf16.mxu0 %v9902_v34 }
0x1f4e   :  { %7262 = vmatmul.mubr.bf16.vlgmr.msra.gmra.mrb[92].mxu1 %v11479_v38  ;;  %v9909_v38 = vld [vmem:[%s11858_s8 + $0x750] sm:$0xff]  }
0x1f4f   :  { %7303 = vmatmul.mubr.bf16.vlgmr.msra.gmra.mrb[96].mxu0 %v11481_v40  ;;  %9176 = vmatpush3.bf16.msra.mxu1 %v9903_v30  ;;  %v9910_v40 = vld [vmem:[%s11858_s8 + $0x7d0] sm:$0xff]  }
0x1f50   :  { %7343 = vmatprep.mubr.bf16.mxu1 %v11515_v14  ;;  %9198 = vmatpush3.bf16.msra.mxu0 %v9904_v33  ;;  %v9916_v14 = vld [vmem:[%s11858_s8 + $0x798] sm:$0xff]  }
0x1f51   :  { %7384 = vmatprep.mubr.bf16.mxu0 %v11517_v28  ;;  %9177 = vmatprep.subr.bf16.mxu1 %v9905_v4  ;;  %v9917_v28 = vld [vmem:[%s11858_s8 + $0x760] sm:$0xff]  }
0x1f52   :  { %9199 = vmatprep.subr.bf16.mxu0 %v9906_v5 }
0x1f53   :  { %9178 = vmatpush3.bf16.msra.mxu1 %v9907_v7 }
0x1f54   :  { %9200 = vmatpush3.bf16.msra.mxu0 %v9908_v10  ;;  %9179 = vmatprep.subr.bf16.mxu1 %v9909_v38 }
0x1f55   :  { %9201 = vmatprep.subr.bf16.mxu0 %v9910_v40 }
0x1f57   :  { %9180 = vmatpush3.bf16.msra.mxu1 %v9911_v12 }
0x1f58   :  { %9202 = vmatpush3.bf16.msra.mxu0 %v9912_v13  ;;  %9181 = vmatprep.subr.bf16.mxu1 %v9913_v17 }
0x1f59   :  { %9203 = vmatprep.subr.bf16.mxu0 %v9914_v20 }
0x1f5b   :  { %9182 = vmatpush3.bf16.msra.mxu1 %v9915_v23 }
0x1f5c   :  { %9204 = vmatpush3.bf16.msra.mxu0 %v9916_v14  ;;  %9183 = vmatprep.subr.bf16.mxu1 %v9917_v28 }
0x1f5d   :  { %9205 = vmatprep.subr.bf16.mxu0 %v9918_v46 }
0x1f5f   :  { %9184 = vmatpush3.bf16.msra.mxu1 %v9919_v18 }
0x1f60   :  { %9206 = vmatpush3.bf16.msra.mxu0 %v9920_v9  ;;  %9185 = vmatprep.subr.bf16.mxu1 %v9921_v57 }
0x1f61   :  { %9207 = vmatprep.subr.bf16.mxu0 %v9922_v21 }
0x1f63   :  { %9186 = vmatpush3.bf16.msra.mxu1 %v9923_v60 }
0x1f64   :  { %9208 = vmatpush3.bf16.msra.mxu0 %v9924_v22  ;;  %9187 = vmatprep.subr.bf16.mxu1 %v9925_v45 }
0x1f65   :  { %9209 = vmatprep.subr.bf16.mxu0 %v9926_v6 }
0x1f67   :  { %9188 = vmatpush3.bf16.msra.mxu1 %v9927_v27 }
0x1f68   :  { %9210 = vmatpush3.bf16.msra.mxu0 %v9928_v32  ;;  %9189 = vmatprep.subr.bf16.mxu1 %v9929_v31 }
0x1f69   :  { %9211 = vmatprep.subr.bf16.mxu0 %v9930_v24 }
0x1f6b   :  { %9190 = vmatpush3.bf16.msra.mxu1 %v9931_v54 }
0x1f6c   :  { %9212 = vmatpush3.bf16.msra.mxu0 %v9932_v62 }
0x1f6e   :  { %7344 = vmatmul.mubr.bf16.vlgmr.msra.gmra.mrb[96].mxu1 %v11511_v26 }
0x1f6f   :  { %7385 = vmatmul.mubr.bf16.vlgmr.msra.gmra.mrb[100].mxu0 %v11513_v15  ;;  %9478 = vmatprep.mubr.msk.f32.mxu1 %vm10018_vm5, %v10017_v16 }
0x1f70   :  { %9522 = vmatprep.mubr.msk.f32.mxu0 %vm10018_vm5, %v10017_v16 }
0x1fe1   :  { %v9059_v55 = vpop.f32.mrb[84].mxu1  ;;  %v9081_v37 = vpop.f32.mrb[88].mxu0 }
0x1fe2   :  { %v9060_v42 = vpop.f32.mrb[85].mxu1  ;;  %v9082_v26 = vpop.f32.mrb[89].mxu0 }
0x1fe3   :  { %v9061_v51 = vadd.f32 %v9060_v42, %v9059_v55  ;;  %v9083_v15 = vadd.f32 %v9082_v26, %v9081_v37  ;;  %v9062_v43 = vpop.f32.mrb[86].mxu1  ;;  %v9084_v44 = vpop.f32.mrb[90].mxu0 }
0x1fe4   :  { %v9063_v48 = vpop.f32.mrb[87].mxu1  ;;  %v9085_v49 = vpop.f32.mrb[91].mxu0 }
0x1fe5   :  { %v7100_v50 = vadd.f32 %v9061_v51, %v6296_v41  ;;  %v9064_v58 = vadd.f32 %v9063_v48, %v9062_v43  ;;  %v9086_v52 = vadd.f32 %v9085_v49, %v9084_v44 }
0x1fe7   :  { %v7141_v59 = vadd.f32 %v9083_v15, %v7100_v50  ;;  %v7103_v47 = vadd.f32 %v9064_v58, %v6296_v41 }
0x1fe9   :  { %v7144_v53 = vadd.f32 %v9086_v52, %v7103_v47 }
0x2001   :  { %v9103_v56 = vpop.f32.mrb[88].mxu1  ;;  %v9125_v63 = vpop.f32.mrb[92].mxu0 }
0x2002   :  { %v9104_v0 = vpop.f32.mrb[89].mxu1  ;;  %v9126_v1 = vpop.f32.mrb[93].mxu0 }
0x2003   :  { %v9105_v2 = vadd.f32 %v9104_v0, %v9103_v56  ;;  %v9127_v35 = vadd.f32 %v9126_v1, %v9125_v63  ;;  %v9106_v25 = vpop.f32.mrb[90].mxu1  ;;  %v9128_v29 = vpop.f32.mrb[94].mxu0 }
0x2004   :  { %v9107_v3 = vpop.f32.mrb[91].mxu1  ;;  %v9129_v34 = vpop.f32.mrb[95].mxu0 }
0x2005   :  { %v7182_v30 = vadd.f32 %v9105_v2, %v7141_v59  ;;  %v9108_v33 = vadd.f32 %v9107_v3, %v9106_v25  ;;  %v9130_v4 = vadd.f32 %v9129_v34, %v9128_v29  ;;  %v7435_v2 = vld [vmem:[%s11860_s9 + $0x8] sm:$0xff]  ;;  %v10034_v25 = vmov 0.0|0.0   ;;  %v7436_v29 = vld [vmem:[%s11860_s9 + $0x10] sm:$0xff]  ;;  %v7437_v3 = vld [vmem:[%s11860_s9 + $0x18] sm:$0xff] }
0x2006   :  { %9596 = vmatprep.subr.bf16.mxu1 %v10034_v25  ;;  %9620 = vmatprep.subr.bf16.mxu0 %v10034_v25  ;;  %v9600_v34 = vpack.c.bf16 %v7437_v3, %v7436_v29 }
0x2007   :  { %v7223_v5 = vadd.f32 %v9127_v35, %v7182_v30  ;;  %v7185_v7 = vadd.f32 %v9108_v33, %v7144_v53 }
0x2009   :  { %v7226_v10 = vadd.f32 %v9130_v4, %v7185_v7 }
0x2021   :  { %v9147_v38 = vpop.f32.mrb[92].mxu1 }
0x2022   :  { %v9169_v40 = vpop.f32.mrb[96].mxu0  ;;  %v9148_v12 = vpop.f32.mrb[93].mxu1 }
0x2023   :  { %v9149_v13 = vadd.f32 %v9148_v12, %v9147_v38  ;;  %v9170_v17 = vpop.f32.mrb[97].mxu0  ;;  %v9150_v20 = vpop.f32.mrb[94].mxu1  ;;  %v7424_v38 = vrot.slane %v11746_v8, %v10591_v39  ;;  %v7430_v12 = vrot.slane %v11746_v8, %v10588_v36  ;;  %v8758_v36 = vld [vmem:[%s11860_s9 + $0x30] sm:$0xff]  ;;  %v8759_v8 = vld [vmem:[%s11860_s9 + $0x38] sm:$0xff] }
0x2024   :  { %v9171_v23 = vadd.f32 %v9170_v17, %v9169_v40  ;;  %v9172_v14 = vpop.f32.mrb[98].mxu0  ;;  %v9151_v28 = vpop.f32.mrb[95].mxu1 }
0x2025   :  { %v7264_v46 = vadd.f32 %v9149_v13, %v7223_v5  ;;  %v9152_v18 = vadd.f32 %v9151_v28, %v9150_v20  ;;  %v9173_v9 = vpop.f32.mrb[99].mxu0  ;;  %v8757_v28 = vld [vmem:[%s11860_s9 + $0x28] sm:$0xff] }
0x2026   :  { %v9174_v57 = vadd.f32 %v9173_v9, %v9172_v14  ;;  %v8756_v14 = vld [vmem:[%s11860_s9 + $0x20] sm:$0xff] }
0x2027   :  { %v7305_v21 = vadd.f32 %v9171_v23, %v7264_v46  ;;  %v7267_v60 = vadd.f32 %v9152_v18, %v7226_v10  ;;  %v9603_v9 = vpack.c.bf16 %v8757_v28, %v8756_v14 }
0x2029   :  { %v7308_v22 = vadd.f32 %v9174_v57, %v7267_v60  ;;  %v9606_v60 = vpack.c.bf16 %v8759_v8, %v8758_v36 }
0x2041   :  { %v9191_v45 = vpop.f32.mrb[96].mxu1 }
0x2042   :  { %v9213_v6 = vpop.f32.mrb[100].mxu0  ;;  %v9192_v27 = vpop.f32.mrb[97].mxu1 }
0x2043   :  { %v9193_v32 = vadd.f32 %v9192_v27, %v9191_v45  ;;  %v9214_v31 = vpop.f32.mrb[101].mxu0  ;;  %v9194_v24 = vpop.f32.mrb[98].mxu1  ;;  %v8762_v45 = vld [vmem:[%s11860_s9 + $0x48] sm:$0xff] }
0x2044   :  { %v9215_v54 = vadd.f32 %v9214_v31, %v9213_v6  ;;  %v9216_v62 = vpop.f32.mrb[102].mxu0  ;;  %v9195_v55 = vpop.f32.mrb[99].mxu1  ;;  %v8764_v31 = vld [vmem:[%s11860_s9 + $0x58] sm:$0xff] }
0x2045   :  { %v7346_v37 = vadd.f32 %v9193_v32, %v7305_v21  ;;  %v9196_v41 = vadd.f32 %v9195_v55, %v9194_v24  ;;  %v9217_v42 = vpop.f32.mrb[103].mxu0  ;;  %v8763_v32 = vld [vmem:[%s11860_s9 + $0x50] sm:$0xff]  ;;  %v8767_v55 = vld [vmem:[%s11860_s9 + $0x68] sm:$0xff] }
0x2046   :  { %v9218_v26 = vadd.f32 %v9217_v42, %v9216_v62  ;;  %v8766_v62 = vld [vmem:[%s11860_s9 + $0x60] sm:$0xff]  ;;  %v8768_v42 = vld [vmem:[%s11860_s9 + $0x70] sm:$0xff] }
0x2047   :  { %v7387_v51 = vadd.f32 %v9215_v54, %v7346_v37  ;;  %v7349_v15 = vadd.f32 %v9196_v41, %v7308_v22  ;;  %v8761_v22 = vld [vmem:[%s11860_s9 + $0x40] sm:$0xff]  ;;  %v9612_v54 = vpack.c.bf16 %v8764_v31, %v8763_v32  ;;  %v9615_v37 = vpack.c.bf16 %v8767_v55, %v8766_v62 }
0x2048   :  { %v9609_v6 = vpack.c.bf16 %v8762_v45, %v8761_v22 }
0x2049   :  { %v7390_v43 = vadd.f32 %v9218_v26, %v7349_v15  ;;  %v7393_v44 = vadd.f32 %v7387_v51, %v11215_v61  ;;  %v8769_v26 = vld [vmem:[%s11860_s9 + $0x78] sm:$0xff] }
0x204a   :  { %v9618_v15 = vpack.c.bf16 %v8769_v26, %v8768_v42 }
0x204b   :  { %v7395_v48 = vsel %vm145_vm4, %v7393_v44, 0.0  ;;  %v7394_v49 = vadd.f32 %v7390_v43, %v11217_v11  ;;  %v7434_v11 = vld [vmem:[%s11860_s9] sm:$0xff] }
0x204c   :  { %7396 = vadd.xlane.f32.xlu0 %v7395_v48  ;;  %v9597_v35 = vpack.c.bf16 %v7435_v2, %v7434_v11 }
0x204d   :  { %v7398_v50 = vsel %vm145_vm4, %v7394_v49, 0.0 }
0x204e   :  { %7399 = vadd.xlane.f32.xlu1 %v7398_v50  ;;  %9598 = vmatpush3.bf16.msra.mxu1 %v9597_v35  ;;  %v7433_v50 = vld [vmem:[%s11861_s10] sm:$0x1] }
0x204f   :  { %9622 = vmatpush3.bf16.msra.mxu0 %v9597_v35  ;;  %9599 = vmatprep.subr.bf16.mxu1 %v10034_v25 }
0x2050   :  { %9623 = vmatprep.subr.bf16.mxu0 %v10034_v25 }
0x2052   :  { %9601 = vmatpush3.bf16.msra.mxu1 %v9600_v34 }
0x2053   :  { %9625 = vmatpush3.bf16.msra.mxu0 %v9600_v34  ;;  %9602 = vmatprep.subr.bf16.mxu1 %v10034_v25 }
0x2054   :  { %9626 = vmatprep.subr.bf16.mxu0 %v10034_v25 }
0x20d9   :  { %v7397_v58 = vpop.xlane.xlu0 %7396 }
0x20da   :  { %v7401_v52 = vmul.f32 0.03125, %v7397_v58 }
0x20db   :  { %v7400_v59 = vpop.xlane.xlu1 %7399 }
0x20dc   :  { %v7403_v47 = vsub.f32 %v7393_v44, %v7401_v52  ;;  %v7402_v53 = vmul.f32 0.03125, %v7400_v59 }
0x20de   :  { %v7404_v56 = vsub.f32 %v7394_v49, %v7402_v53  ;;  %v7405_v63 = vmul.f32 %v7403_v47, %v7403_v47 }
0x20e0   :  { %v7407_v0 = vsel %vm145_vm4, %v7405_v63, 0.0  ;;  %v7406_v1 = vmul.f32 %v7404_v56, %v7404_v56 }
0x20e1   :  { %7408 = vadd.xlane.f32.xlu0 %v7407_v0 }
0x20e2   :  { %v7410_v61 = vsel %vm145_vm4, %v7406_v1, 0.0 }
0x20e3   :  { %7411 = vadd.xlane.f32.xlu1 %v7410_v61 }
0x216e   :  { %v7409_v30 = vpop.xlane.xlu0 %7408 }
0x216f   :  { %v7413_v33 = vmul.f32 0.03125, %v7409_v30 }
0x2170   :  { %v7412_v4 = vpop.xlane.xlu1 %7411 }
0x2171   :  { %v7415_v5 = vadd.f32 1e-05, %v7413_v33  ;;  %v7414_v7 = vmul.f32 0.03125, %v7412_v4 }
0x2173   :  { %10009 = vrsqrt.f32 %v7415_v5  ;;  %v7416_v10 = vadd.f32 1e-05, %v7414_v7 }
0x2175   :  { %10011 = vrsqrt.f32 %v7416_v10 }
0x217d   :  { %v10010_v40 = vpop.eup %10009 }
0x217e   :  { %v7419_v13 = vmul.f32 %v10010_v40, %v7403_v47 }
0x217f   :  { %v10012_v17 = vpop.eup %10011 }
0x2180   :  { %v7425_v20 = vmul.f32 %v7424_v38, %v7419_v13  ;;  %v7420_v23 = vmul.f32 %v10012_v17, %v7404_v56 }
0x2182   :  { %v7431_v46 = vadd.f32 %v7430_v12, %v7425_v20  ;;  %v7426_v18 = vmul.f32 %v7424_v38, %v7420_v23 }
0x2184   :  { %v7432_v39 = vadd.f32 %v7430_v12, %v7426_v18  ;;  %v7439_v57 = vrot.slane %v7431_v46, 4  ;;  %v7518_v27 = vrot.slane %v7431_v46, 5  ;;  %v7597_v41 = vrot.slane %v7431_v46, 6 }
0x2185   :  { %v7676_v43 = vrot.slane %v7431_v46, 7 }
0x2186   :  { %9479 = vmatmul.mubr.msk.f32.vlgmr.msra.gmra.mrb[100].mxu1 %vm145_vm4, %v7439_v57  ;;  %v7751_v21 = vrot.slane %v7432_v39, 4  ;;  %v7825_v24 = vrot.slane %v7432_v39, 5  ;;  %v7899_v51 = vrot.slane %v7432_v39, 6  ;;  %v7973_v44 = vrot.slane %v7432_v39, 7 }
0x2187   :  { %9604 = vmatpush3.bf16.msra.mxu1 %v9603_v9  ;;  %9489 = vmatprep.mubr.msk.f32.mxu1 %vm10018_vm5, %v10017_v16 }
0x2188   :  { %9523 = vmatmul.mubr.msk.f32.vlgmr.msra.gmra.mrb[70].mxu0 %vm145_vm4, %v7751_v21  ;;  %9605 = vmatprep.subr.bf16.mxu1 %v10034_v25 }
0x2189   :  { %9628 = vmatpush3.bf16.msra.mxu0 %v9603_v9  ;;  %9533 = vmatprep.mubr.msk.f32.mxu0 %vm10018_vm5, %v10017_v16 }
0x218a   :  { %9629 = vmatprep.subr.bf16.mxu0 %v10034_v25 }
0x218b   :  { %9607 = vmatpush3.bf16.msra.mxu1 %v9606_v60 }
0x218c   :  { %9608 = vmatprep.subr.bf16.mxu1 %v10034_v25 }
0x218d   :  { %9631 = vmatpush3.bf16.msra.mxu0 %v9606_v60 }
0x218e   :  { %9490 = vmatmul.mubr.msk.f32.vlgmr.msra.gmra.mrb[100].mxu1 %vm145_vm4, %v7518_v27  ;;  %9632 = vmatprep.subr.bf16.mxu0 %v10034_v25 }
0x218f   :  { %9610 = vmatpush3.bf16.msra.mxu1 %v9609_v6  ;;  %9500 = vmatprep.mubr.msk.f32.mxu1 %vm10018_vm5, %v10017_v16 }
0x2190   :  { %9534 = vmatmul.mubr.msk.f32.vlgmr.msra.gmra.mrb[70].mxu0 %vm145_vm4, %v7825_v24  ;;  %9611 = vmatprep.subr.bf16.mxu1 %v10034_v25 }
0x2191   :  { %9634 = vmatpush3.bf16.msra.mxu0 %v9609_v6  ;;  %9544 = vmatprep.mubr.msk.f32.mxu0 %vm10018_vm5, %v10017_v16 }
0x2192   :  { %9635 = vmatprep.subr.bf16.mxu0 %v10034_v25 }
0x2193   :  { %9613 = vmatpush3.bf16.msra.mxu1 %v9612_v54 }
0x2194   :  { %9614 = vmatprep.subr.bf16.mxu1 %v10034_v25 }
0x2195   :  { %9637 = vmatpush3.bf16.msra.mxu0 %v9612_v54 }
0x2196   :  { %9501 = vmatmul.mubr.msk.f32.vlgmr.msra.gmra.mrb[100].mxu1 %vm145_vm4, %v7597_v41  ;;  %9638 = vmatprep.subr.bf16.mxu0 %v10034_v25 }
0x2197   :  { %9616 = vmatpush3.bf16.msra.mxu1 %v9615_v37  ;;  %9511 = vmatprep.mubr.msk.f32.mxu1 %vm10018_vm5, %v10017_v16 }
0x2198   :  { %9545 = vmatmul.mubr.msk.f32.vlgmr.msra.gmra.mrb[70].mxu0 %vm145_vm4, %v7899_v51  ;;  %9617 = vmatprep.subr.bf16.mxu1 %v10034_v25 }
0x2199   :  { %9640 = vmatpush3.bf16.msra.mxu0 %v9615_v37  ;;  %9555 = vmatprep.mubr.msk.f32.mxu0 %vm10018_vm5, %v10017_v16 }
0x219a   :  { %9641 = vmatprep.subr.bf16.mxu0 %v10034_v25 }
0x219b   :  { %9619 = vmatpush3.bf16.msra.mxu1 %v9618_v15 }
0x219d   :  { %9643 = vmatpush3.bf16.msra.mxu0 %v9618_v15 }
0x219e   :  { %9512 = vmatmul.mubr.msk.f32.vlgmr.msra.gmra.mrb[100].mxu1 %vm145_vm4, %v7676_v43 }
0x21a0   :  { %9556 = vmatmul.mubr.msk.f32.vlgmr.msra.gmra.mrb[70].mxu0 %vm145_vm4, %v7973_v44 }
0x2271   :  { %v7745_v48 = vpop.f32.mrb[100].mxu1 }
0x2272   :  { %v9513_v49 = vpop.f32.mrb[101].mxu1  ;;  %v9644_v16 = vadd.f32 %v7745_v48, %v7433_v50 }
0x2273   :  { %v8042_v58 = vpop.f32.mrb[70].mxu0 }
0x2274   :  { %v9645_v52 = vadd.f32 %v8042_v58, %v7433_v50  ;;  %v9557_v59 = vpop.f32.mrb[71].mxu0 }
0x2276   :  { %v8051_v47 = vrot.slane %v9645_v52, %v10141_v19 }
0x2278   :  { %v8054_v53 = vsel %vm8053_vm9, %v9644_v16, %v8051_v47 }
0x2279   :  { %8055 = vst [vmem:[%s11862_s11] sm:$0x3] %v8054_v53 }

</bundles_post_ra>
